<compile_context>
chip_gen: v7x
topology: tpu7x:2x2x1
jax: 0.10.0
libtpu: 0.0.40
codegen_flags: <defaults>
</compile_context>

<pallas_src>
import functools

import jax
import jax.numpy as jnp
from jax import lax
from jax.experimental import pallas as pl
from jax.experimental.pallas import tpu as pltpu


NEG_BIG = -1.0e30  # finite "-inf" sentinel: avoids inf/NaN in the online max


# --------------------------------------------------------------------------- #
# scatter branch (last_layer=False)                                            #
# --------------------------------------------------------------------------- #
def _pfn_scatter_kernel(x_ref, seg_ref, wf_ref, vec_ref, out_ref,
                        wmax_ref, sv_ref, esum_ref, cnt_ref, qmax_ref, *, c):
  """One (voxel-tile mi, point-tile ni) grid cell."""
  mi = pl.program_id(0)
  ni = pl.program_id(1)
  n_tile = x_ref.shape[0]
  m_tile = out_ref.shape[1]

  # ---- init per-voxel accumulators at the first point tile ----------------
  @pl.when(ni == 0)
  def _init():
    wmax_ref[...] = jnp.full_like(wmax_ref, NEG_BIG)
    sv_ref[...] = jnp.zeros_like(sv_ref)
    esum_ref[...] = jnp.zeros_like(esum_ref)
    cnt_ref[...] = jnp.zeros_like(cnt_ref)
    qmax_ref[...] = jnp.zeros_like(qmax_ref)

  # ---- fused point-wise projections (kv and w[0] with BN folded) ----------
  vecs = vec_ref[...]                       # [8, 2C] packed small params
  b_fused = vecs[0:1, :]                    # [1, 2C]
  nscale = vecs[1:2, :c]                    # [1, C]  (norm BN, kept separate: v is reused raw)
  nshift = vecs[2:3, :c]
  w2 = vecs[3:4, :c]                        # final Linear(C, 1) weights
  b2 = vecs[4:5, 0:1]

  z = jnp.dot(x_ref[...], wf_ref[...],
              preferred_element_type=jnp.float32) + b_fused            # [Nt, 2C]
  v = z[:, :c]                                                         # kv(inputs)
  x = jnp.maximum(v * nscale + nshift, 0.0)                            # relu(norm(v)) >= 0
  h = jnp.maximum(z[:, c:], 0.0)                                       # relu(BN(w0(inputs)))
  weight = jnp.sum(h * w2, axis=-1, keepdims=True) + b2                # [Nt, 1]

  # ---- one-hot of this voxel tile ------------------------------------------
  seg = seg_ref[...]                                                   # [Nt, 1] int32
  m_start = mi * m_tile
  col = lax.broadcasted_iota(jnp.int32, (n_tile, m_tile), 1) + m_start
  onehot = seg == col                                                  # [Nt, Mt] bool
  onehot_f = onehot.astype(jnp.float32)
  in_tile = jnp.logical_and(seg >= m_start, seg < m_start + m_tile)    # [Nt, 1]

  # ---- online scatter-softmax state update ---------------------------------
  w_masked = jnp.where(onehot, weight, NEG_BIG)                        # [Nt, Mt]
  tile_wmax = jnp.max(w_masked, axis=0, keepdims=True)                 # [1, Mt]
  old_wmax = wmax_ref[...]
  new_wmax = jnp.maximum(old_wmax, tile_wmax)
  alpha = jnp.exp(old_wmax - new_wmax)                                 # [1, Mt]
  wmax_ref[...] = new_wmax

  # per-point gather of its voxel's running max (exact: one nonzero per row)
  gathered = jnp.sum(onehot_f * new_wmax, axis=1, keepdims=True)       # [Nt, 1]
  ex = jnp.where(in_tile, jnp.exp(weight - gathered), 0.0)             # [Nt, 1], <= 1

  # exp-weighted segment sum through the MXU (voxel axis on output lanes)
  contrib_v = lax.dot_general(ex * v, onehot_f, (((0,), (0,)), ((), ())),
                              preferred_element_type=jnp.float32)      # [C, Mt]
  sv_ref[...] = sv_ref[...] * alpha + contrib_v
  esum_ref[...] = esum_ref[...] * alpha + jnp.sum(onehot_f * ex, axis=0,
                                                  keepdims=True)       # [1, Mt]
  cnt_ref[...] = cnt_ref[...] + jnp.sum(onehot_f, axis=0, keepdims=True)

  # ---- running scatter_max(x) (x >= 0, so empty voxels stay at 0) ----------
  q_rows = [jnp.max(onehot_f * x[:, ch:ch + 1], axis=0, keepdims=True)
            for ch in range(c)]                                        # c x [1, Mt]
  qmax_ref[...] = jnp.maximum(qmax_ref[...], jnp.concatenate(q_rows, axis=0))

  # ---- finalize: one lane-dense full-tile store -----------------------------
  @pl.when(ni == pl.num_programs(1) - 1)
  def _finalize():
    cnt = cnt_ref[...]                                                 # [1, Mt]
    nonempty = cnt > 0.5
    denom = jnp.where(nonempty, esum_ref[...] * cnt, 1.0)
    inv = pl.reciprocal(denom, approx=False)                           # [1, Mt]
    weight_x = jnp.where(nonempty, sv_ref[...] * inv, 0.0)             # [C, Mt]
    out_ref[...] = jnp.concatenate([weight_x, qmax_ref[...]], axis=0)  # [2C, Mt]


def pfn_layer_v14(inputs, unq_inv, params, num_voxels, *, n_tile=256, m_tile=512):
  """Pallas forward of PFNLayerV14 (scatter branch). Returns [num_voxels, 2*C]."""
  n, din = inputs.shape
  c = params['wkv'].shape[1]

  # Fold the w-branch BatchNorm into its Linear and fuse both projections.
  w1f = params['w1'] * params['s1']
  b1f = params['b1'] * params['s1'] + params['t1']
  wf = jnp.concatenate([params['wkv'], w1f], axis=1).astype(jnp.float32)   # [Din, 2C]
  b_fused = jnp.concatenate([params['bkv'], b1f], axis=1)                  # [1, 2C]

  # Pack all remaining small vectors into one (8, 2C) array -> one DMA.
  vecs = jnp.zeros((8, 2 * c), jnp.float32)
  vecs = vecs.at[0:1, :].set(b_fused)
  vecs = vecs.at[1:2, :c].set(params['nscale'])
  vecs = vecs.at[2:3, :c].set(params['nshift'])
  vecs = vecs.at[3:4, :c].set(params['w2'])
  vecs = vecs.at[4:5, 0:1].set(params['b2'])

  n_pad = pl.cdiv(n, n_tile) * n_tile
  m_pad = pl.cdiv(num_voxels, m_tile) * m_tile

  x_pad = jnp.zeros((n_pad, din), jnp.float32).at[:n].set(inputs.astype(jnp.float32))
  # Padding points get voxel id -1 -> matched by no one-hot column.
  seg_pad = jnp.full((n_pad, 1), -1, jnp.int32).at[:n, 0].set(
      unq_inv.reshape(-1).astype(jnp.int32))

  grid = (m_pad // m_tile, n_pad // n_tile)
  kernel = functools.partial(_pfn_scatter_kernel, c=c)

  out_t = pl.pallas_call(
      kernel,
      out_shape=jax.ShapeDtypeStruct((2 * c, m_pad), jnp.float32),
      grid_spec=pltpu.PrefetchScalarGridSpec(
          num_scalar_prefetch=0,
          grid=grid,
          in_specs=[
              pl.BlockSpec((n_tile, din), lambda mi, ni: (ni, 0)),
              pl.BlockSpec((n_tile, 1), lambda mi, ni: (ni, 0)),
              pl.BlockSpec((din, 2 * c), lambda mi, ni: (0, 0)),
              pl.BlockSpec((8, 2 * c), lambda mi, ni: (0, 0)),
          ],
          out_specs=pl.BlockSpec((2 * c, m_tile), lambda mi, ni: (0, mi)),
          scratch_shapes=[
              pltpu.VMEM((1, m_tile), jnp.float32),     # running weight max
              pltpu.VMEM((c, m_tile), jnp.float32),     # running exp-weighted v sum
              pltpu.VMEM((1, m_tile), jnp.float32),     # running exp sum
              pltpu.VMEM((1, m_tile), jnp.float32),     # point counts
              pltpu.VMEM((c, m_tile), jnp.float32),     # running feature max
          ]),
      compiler_params=pltpu.CompilerParams(
          dimension_semantics=("parallel", "arbitrary"),
          vmem_limit_bytes=32 * 1024 * 1024),
  )(x_pad, seg_pad, wf, vecs)

  # lane-dense [2C, M_pad] kernel output -> [M, 2C]
  return out_t.T[:num_voxels]


# --------------------------------------------------------------------------- #
# last_layer=True branch: relu(norm(kv(inputs)))                               #
# --------------------------------------------------------------------------- #
def _pfn_last_kernel(x_ref, w_ref, vec_ref, out_ref):
  vecs = vec_ref[...]
  b = vecs[0:1, :]
  nscale = vecs[1:2, :]
  nshift = vecs[2:3, :]
  v = jnp.dot(x_ref[...], w_ref[...], preferred_element_type=jnp.float32) + b
  out_ref[...] = jnp.maximum(v * nscale + nshift, 0.0)


def pfn_layer_v14_last(inputs, params, *, n_tile=256):
  n, din = inputs.shape
  c = params['wkv'].shape[1]
  n_pad = pl.cdiv(n, n_tile) * n_tile
  x_pad = jnp.zeros((n_pad, din), jnp.float32).at[:n].set(inputs.astype(jnp.float32))

  vecs = jnp.zeros((8, c), jnp.float32)
  vecs = vecs.at[0:1, :].set(params['bkv'])
  vecs = vecs.at[1:2, :].set(params['nscale'])
  vecs = vecs.at[2:3, :].set(params['nshift'])

  out = pl.pallas_call(
      _pfn_last_kernel,
      out_shape=jax.ShapeDtypeStruct((n_pad, c), jnp.float32),
      grid_spec=pltpu.PrefetchScalarGridSpec(
          num_scalar_prefetch=0,
          grid=(n_pad // n_tile,),
          in_specs=[
              pl.BlockSpec((n_tile, din), lambda i: (i, 0)),
              pl.BlockSpec((din, c), lambda i: (0, 0)),
              pl.BlockSpec((8, c), lambda i: (0, 0)),
          ],
          out_specs=pl.BlockSpec((n_tile, c), lambda i: (i, 0))),
      compiler_params=pltpu.CompilerParams(dimension_semantics=("parallel",)),
  )(x_pad, params['wkv'].astype(jnp.float32), vecs)
  return out[:n]


# --------------------------------------------------------------------------- #
# pure-JAX references and parameter init                                       #
# --------------------------------------------------------------------------- #
def pfn_layer_v14_ref(inputs, unq_inv, params, num_voxels):
  """Pure-JAX reference mirroring the PyTorch forward (eval-mode BN)."""
  v = inputs @ params['wkv'] + params['bkv']
  x = jnp.maximum(v * params['nscale'] + params['nshift'], 0.0)
  h = inputs @ params['w1'] + params['b1']
  h = jnp.maximum(h * params['s1'] + params['t1'], 0.0)
  weight = jnp.sum(h * params['w2'], axis=-1, keepdims=True) + params['b2']

  q_max = jax.ops.segment_max(x, unq_inv, num_segments=num_voxels)
  wmax = jax.ops.segment_max(weight, unq_inv, num_segments=num_voxels)
  ex = jnp.exp(weight - wmax[unq_inv])
  ssum = jax.ops.segment_sum(ex, unq_inv, num_segments=num_voxels)
  soft_w = ex / ssum[unq_inv]
  seg_sum = jax.ops.segment_sum(soft_w * v, unq_inv, num_segments=num_voxels)
  counts = jax.ops.segment_sum(jnp.ones((inputs.shape[0], 1), jnp.float32),
                               unq_inv, num_segments=num_voxels)
  weight_x = seg_sum / counts
  return jnp.concatenate([weight_x, q_max], axis=-1)


def pfn_layer_v14_last_ref(inputs, params):
  v = inputs @ params['wkv'] + params['bkv']
  return jnp.maximum(v * params['nscale'] + params['nshift'], 0.0)


def make_params(key, in_channel, out_channel, last_layer=False):
  """Deterministic parameter init matching PFNLayerV14.__init__ shapes."""
  c = out_channel if last_layer else out_channel // 2
  ks = jax.random.split(key, 16)

  def nrm(k, shape, scale=0.2):
    return scale * jax.random.normal(k, shape, dtype=jnp.float32)

  # kv: Linear(in_channel, c)
  wkv = nrm(ks[0], (in_channel, c))
  bkv = nrm(ks[1], (1, c))

  # norm: BatchNorm1d(c, eps=1e-3) -> folded (eval mode)
  gamma_n = 1.0 + nrm(ks[2], (1, c), 0.1)
  beta_n = nrm(ks[3], (1, c), 0.1)
  mean_n = nrm(ks[4], (1, c), 0.1)
  var_n = 1.0 + jnp.abs(nrm(ks[5], (1, c), 0.1))
  nscale = gamma_n / jnp.sqrt(var_n + 1e-3)
  nshift = beta_n - mean_n * nscale

  # w[0]: Linear(in_channel, c)
  w1 = nrm(ks[6], (in_channel, c))
  b1 = nrm(ks[7], (1, c))

  # w[1]: BatchNorm1d(c, eps=1e-5) -> folded (eval mode)
  gamma1 = 1.0 + nrm(ks[8], (1, c), 0.1)
  beta1 = nrm(ks[9], (1, c), 0.1)
  mean1 = nrm(ks[10], (1, c), 0.1)
  var1 = 1.0 + jnp.abs(nrm(ks[11], (1, c), 0.1))
  s1 = gamma1 / jnp.sqrt(var1 + 1e-5)
  t1 = beta1 - mean1 * s1

  # w[3]: Linear(c, 1)
  w2 = nrm(ks[12], (1, c))
  b2 = nrm(ks[13], (1, 1))

  return dict(wkv=wkv, bkv=bkv, nscale=nscale, nshift=nshift,
              w1=w1, b1=b1, s1=s1, t1=t1, w2=w2, b2=b2)


if __name__ == "__main__":
  jax.config.update("jax_default_matmul_precision", "highest")  # accurate f32 reference

  key = jax.random.PRNGKey(0)
  k_param, k_param2, k_in, k_perm = jax.random.split(key, 4)

  N = 600       # points (spans several 128-point tiles)
  IN_CH = 8     # in_channel
  OUT_CH = 32   # out_channel (not last layer -> internal C = 16)
  M = 150       # voxels (spans two 128-wide voxel tiles)

  params = make_params(k_param, IN_CH, OUT_CH, last_layer=False)
  inputs = jax.random.normal(k_in, (N, IN_CH), dtype=jnp.float32)
  # Every voxel gets >= 4 points; order shuffled deterministically.
  unq_inv = jax.random.permutation(k_perm, jnp.arange(N, dtype=jnp.int32) % M)

  # ---- scatter branch (last_layer=False) ----
  out = pfn_layer_v14(inputs, unq_inv, params, M, n_tile=128, m_tile=128)
  out = jax.block_until_ready(out)
  ref = pfn_layer_v14_ref(inputs, unq_inv, params, M)
  assert out.shape == (M, OUT_CH), out.shape
  err = float(jnp.max(jnp.abs(out - ref)))
  assert err < 5e-3, f"scatter branch max abs err {err}"

  # ---- last_layer=True branch ----
  params_last = make_params(k_param2, OUT_CH, OUT_CH, last_layer=True)
  out_last = pfn_layer_v14_last(out, params_last, n_tile=128)
  out_last = jax.block_until_ready(out_last)
  ref_last = pfn_layer_v14_last_ref(out, params_last)
  assert out_last.shape == (M, OUT_CH), out_last.shape
  err_last = float(jnp.max(jnp.abs(out_last - ref_last)))
  assert err_last < 5e-3, f"last-layer branch max abs err {err_last}"

  print("KERNEL_OK")
</pallas_src>

<mosaic_0001>
module attributes {stable_mosaic.version = 11 : i64} {
  func.func @_pfn_scatter_kernel(%arg0: i32, %arg1: i32, %arg2: memref<128x8xf32, #tpu.memory_space<vmem>>, %arg3: memref<128x1xi32, #tpu.memory_space<vmem>>, %arg4: memref<8x32xf32, #tpu.memory_space<vmem>>, %arg5: memref<8x32xf32, #tpu.memory_space<vmem>>, %arg6: memref<32x128xf32, #tpu.memory_space<vmem>>, %arg7: memref<1x128xf32, #tpu.memory_space<vmem>>, %arg8: memref<16x128xf32, #tpu.memory_space<vmem>>, %arg9: memref<1x128xf32, #tpu.memory_space<vmem>>, %arg10: memref<1x128xf32, #tpu.memory_space<vmem>>, %arg11: memref<16x128xf32, #tpu.memory_space<vmem>>) attributes {dimension_semantics = [#tpu.dimension_semantics<parallel>, #tpu.dimension_semantics<arbitrary>], iteration_bounds = array<i64: 2, 5>, scalar_prefetch = 0 : i64, scratch_operands = 5 : i64, tpu.core_type = #tpu.core_type<tc>, window_params = [{transform_indices = @transform_0, window_bounds = array<i64: 128, 8>}, {transform_indices = @transform_1, window_bounds = array<i64: 128, 1>}, {pipeline_mode = #tpu.pipeline_mode<synchronous>, transform_indices = @transform_2, window_bounds = array<i64: 8, 32>}, {pipeline_mode = #tpu.pipeline_mode<synchronous>, transform_indices = @transform_3, window_bounds = array<i64: 8, 32>}, {transform_indices = @transform_4, window_bounds = array<i64: 32, 128>}]} {
    %c0_i32 = arith.constant 0 : i32
    %0 = arith.cmpi eq, %arg1, %c0_i32 : i32
    %1 = arith.extui %0 : i1 to i32
    %c0_i32_0 = arith.constant 0 : i32
    %2 = arith.cmpi ne, %1, %c0_i32_0 : i32
    scf.if %2 {
      %cst_56 = arith.constant -1.000000e+30 : f32
      %172 = vector.broadcast %cst_56 : f32 to vector<1x128xf32>
      %c0_57 = arith.constant 0 : index
      %c0_58 = arith.constant 0 : index
      %173 = vector.load %arg7[%c0_57, %c0_58] : memref<1x128xf32, #tpu.memory_space<vmem>>, vector<1x128xf32>
      tpu.vector_store %arg7[%c0_57, %c0_58], %172 {strides = array<i32>} : memref<1x128xf32, #tpu.memory_space<vmem>>, vector<1x128xf32>,
      %cst_59 = arith.constant 0.000000e+00 : f32
      %174 = vector.broadcast %cst_59 : f32 to vector<16x128xf32>
      %c0_60 = arith.constant 0 : index
      %c0_61 = arith.constant 0 : index
      %175 = vector.load %arg8[%c0_60, %c0_61] : memref<16x128xf32, #tpu.memory_space<vmem>>, vector<16x128xf32>
      tpu.vector_store %arg8[%c0_60, %c0_61], %174 {strides = array<i32>} : memref<16x128xf32, #tpu.memory_space<vmem>>, vector<16x128xf32>,
      %cst_62 = arith.constant 0.000000e+00 : f32
      %176 = vector.broadcast %cst_62 : f32 to vector<1x128xf32>
      %c0_63 = arith.constant 0 : index
      %c0_64 = arith.constant 0 : index
      %177 = vector.load %arg9[%c0_63, %c0_64] : memref<1x128xf32, #tpu.memory_space<vmem>>, vector<1x128xf32>
      tpu.vector_store %arg9[%c0_63, %c0_64], %176 {strides = array<i32>} : memref<1x128xf32, #tpu.memory_space<vmem>>, vector<1x128xf32>,
      %cst_65 = arith.constant 0.000000e+00 : f32
      %178 = vector.broadcast %cst_65 : f32 to vector<1x128xf32>
      %c0_66 = arith.constant 0 : index
      %c0_67 = arith.constant 0 : index
      %179 = vector.load %arg10[%c0_66, %c0_67] : memref<1x128xf32, #tpu.memory_space<vmem>>, vector<1x128xf32>
      tpu.vector_store %arg10[%c0_66, %c0_67], %178 {strides = array<i32>} : memref<1x128xf32, #tpu.memory_space<vmem>>, vector<1x128xf32>,
      %cst_68 = arith.constant 0.000000e+00 : f32
      %180 = vector.broadcast %cst_68 : f32 to vector<16x128xf32>
      %c0_69 = arith.constant 0 : index
      %c0_70 = arith.constant 0 : index
      %181 = vector.load %arg11[%c0_69, %c0_70] : memref<16x128xf32, #tpu.memory_space<vmem>>, vector<16x128xf32>
      tpu.vector_store %arg11[%c0_69, %c0_70], %180 {strides = array<i32>} : memref<16x128xf32, #tpu.memory_space<vmem>>, vector<16x128xf32>,
    } else {
    }
    %c0 = arith.constant 0 : index
    %c0_1 = arith.constant 0 : index
    %3 = vector.load %arg5[%c0, %c0_1] : memref<8x32xf32, #tpu.memory_space<vmem>>, vector<8x32xf32>
    %4 = vector.extract_strided_slice %3 {offsets = [0, 0], sizes = [1, 32], strides = [1, 1]} : vector<8x32xf32> to vector<1x32xf32>
    %5 = vector.extract_strided_slice %3 {offsets = [1, 0], sizes = [1, 16], strides = [1, 1]} : vector<8x32xf32> to vector<1x16xf32>
    %6 = vector.extract_strided_slice %3 {offsets = [2, 0], sizes = [1, 16], strides = [1, 1]} : vector<8x32xf32> to vector<1x16xf32>
    %7 = vector.extract_strided_slice %3 {offsets = [3, 0], sizes = [1, 16], strides = [1, 1]} : vector<8x32xf32> to vector<1x16xf32>
    %8 = vector.extract_strided_slice %3 {offsets = [4, 0], sizes = [1, 1], strides = [1, 1]} : vector<8x32xf32> to vector<1x1xf32>
    %c0_2 = arith.constant 0 : index
    %c0_3 = arith.constant 0 : index
    %9 = vector.load %arg2[%c0_2, %c0_3] : memref<128x8xf32, #tpu.memory_space<vmem>>, vector<128x8xf32>
    %c0_4 = arith.constant 0 : index
    %c0_5 = arith.constant 0 : index
    %10 = vector.load %arg4[%c0_4, %c0_5] : memref<8x32xf32, #tpu.memory_space<vmem>>, vector<8x32xf32>
    %cst = arith.constant dense<0.000000e+00> : vector<128x32xf32>
    %11 = tpu.matmul %9, %10, %cst {dimension_numbers = #tpu.dot_dimension_numbers<[1], [0], [0], [1], [0, 0, 1, 1], [], []>, precision = #tpu.contract_precision<fp32>} : vector<128x8xf32>, vector<8x32xf32>, vector<128x32xf32> -> vector<128x32xf32>
    %12 = vector.broadcast %4 : vector<1x32xf32> to vector<128x32xf32>
    %13 = arith.addf %11, %12 : vector<128x32xf32>
    %14 = vector.extract_strided_slice %13 {offsets = [0, 0], sizes = [128, 16], strides = [1, 1]} : vector<128x32xf32> to vector<128x16xf32>
    %15 = vector.broadcast %5 : vector<1x16xf32> to vector<128x16xf32>
    %16 = arith.mulf %14, %15 : vector<128x16xf32>
    %17 = vector.broadcast %6 : vector<1x16xf32> to vector<128x16xf32>
    %18 = arith.addf %16, %17 : vector<128x16xf32>
    %cst_6 = arith.constant 0.000000e+00 : f32
    %19 = vector.broadcast %cst_6 : f32 to vector<128x16xf32>
    %20 = arith.maximumf %18, %19 : vector<128x16xf32>
    %21 = vector.extract_strided_slice %13 {offsets = [0, 16], sizes = [128, 16], strides = [1, 1]} : vector<128x32xf32> to vector<128x16xf32>
    %cst_7 = arith.constant 0.000000e+00 : f32
    %22 = vector.broadcast %cst_7 : f32 to vector<128x16xf32>
    %23 = arith.maximumf %21, %22 : vector<128x16xf32>
    %24 = vector.broadcast %7 : vector<1x16xf32> to vector<128x16xf32>
    %25 = arith.mulf %23, %24 : vector<128x16xf32>
    %cst_8 = arith.constant dense<0.000000e+00> : vector<128xf32>
    %26 = vector.multi_reduction <add>, %25, %cst_8 [1] : vector<128x16xf32> to vector<128xf32>
    %27 = vector.shape_cast %26 : vector<128xf32> to vector<128x1xf32>
    %28 = vector.broadcast %8 : vector<1x1xf32> to vector<128x1xf32>
    %29 = arith.addf %27, %28 : vector<128x1xf32>
    %c0_9 = arith.constant 0 : index
    %c0_10 = arith.constant 0 : index
    %30 = vector.load %arg3[%c0_9, %c0_10] : memref<128x1xi32, #tpu.memory_space<vmem>>, vector<128x1xi32>
    %c128_i32 = arith.constant 128 : i32
    %31 = arith.muli %arg0, %c128_i32 : i32
    %32 = tpu.iota {dimensions = array<i32: 1>} : vector<128x128xi32>
    %33 = vector.broadcast %31 : i32 to vector<128x128xi32>
    %34 = arith.addi %32, %33 : vector<128x128xi32>
    %35 = vector.broadcast %30 : vector<128x1xi32> to vector<128x128xi32>
    %36 = arith.cmpi eq, %35, %34 : vector<128x128xi32>
    %37 = arith.extui %36 : vector<128x128xi1> to vector<128x128xi32>
    %38 = arith.sitofp %37 : vector<128x128xi32> to vector<128x128xf32>
    %39 = vector.broadcast %31 : i32 to vector<128x1xi32>
    %40 = arith.cmpi sge, %30, %39 : vector<128x1xi32>
    %c128_i32_11 = arith.constant 128 : i32
    %41 = arith.addi %31, %c128_i32_11 : i32
    %42 = vector.broadcast %41 : i32 to vector<128x1xi32>
    %43 = arith.cmpi slt, %30, %42 : vector<128x1xi32>
    %44 = arith.andi %40, %43 : vector<128x1xi1>
    %cst_12 = arith.constant -1.000000e+30 : f32
    %45 = vector.shape_cast %29 : vector<128x1xf32> to vector<128x1xf32>
    %46 = vector.broadcast %45 : vector<128x1xf32> to vector<128x128xf32>
    %47 = vector.broadcast %cst_12 : f32 to vector<128x128xf32>
    %48 = arith.select %36, %46, %47 : vector<128x128xi1>, vector<128x128xf32>
    %cst_13 = arith.constant dense<0xFF800000> : vector<128xf32>
    %49 = vector.multi_reduction <maximumf>, %48, %cst_13 [0] : vector<128x128xf32> to vector<128xf32>
    %50 = vector.shape_cast %49 : vector<128xf32> to vector<1x128xf32>
    %c0_14 = arith.constant 0 : index
    %c0_15 = arith.constant 0 : index
    %51 = vector.load %arg7[%c0_14, %c0_15] : memref<1x128xf32, #tpu.memory_space<vmem>>, vector<1x128xf32>
    %52 = arith.maximumf %51, %50 : vector<1x128xf32>
    %53 = arith.subf %51, %52 : vector<1x128xf32>
    %54 = math.exp %53 : vector<1x128xf32>
    %c0_16 = arith.constant 0 : index
    %c0_17 = arith.constant 0 : index
    %55 = vector.load %arg7[%c0_16, %c0_17] : memref<1x128xf32, #tpu.memory_space<vmem>>, vector<1x128xf32>
    tpu.vector_store %arg7[%c0_16, %c0_17], %52 {strides = array<i32>} : memref<1x128xf32, #tpu.memory_space<vmem>>, vector<1x128xf32>,
    %56 = vector.broadcast %52 : vector<1x128xf32> to vector<128x128xf32>
    %57 = arith.mulf %38, %56 : vector<128x128xf32>
    %cst_18 = arith.constant dense<0.000000e+00> : vector<128xf32>
    %58 = vector.multi_reduction <add>, %57, %cst_18 [1] : vector<128x128xf32> to vector<128xf32>
    %59 = vector.shape_cast %58 : vector<128xf32> to vector<128x1xf32>
    %60 = arith.subf %29, %59 : vector<128x1xf32>
    %61 = math.exp %60 : vector<128x1xf32>
    %cst_19 = arith.constant 0.000000e+00 : f32
    %62 = vector.broadcast %cst_19 : f32 to vector<128x1xf32>
    %63 = arith.select %44, %61, %62 : vector<128x1xi1>, vector<128x1xf32>
    %64 = vector.broadcast %63 : vector<128x1xf32> to vector<128x16xf32>
    %65 = arith.mulf %64, %14 : vector<128x16xf32>
    %cst_20 = arith.constant dense<0.000000e+00> : vector<16x128xf32>
    %66 = tpu.matmul %65, %38, %cst_20 {dimension_numbers = #tpu.dot_dimension_numbers<[0], [0], [1], [1], [0, 1, 1, 1], [], []>, precision = #tpu.contract_precision<fp32>} : vector<128x16xf32>, vector<128x128xf32>, vector<16x128xf32> -> vector<16x128xf32>
    %c0_21 = arith.constant 0 : index
    %c0_22 = arith.constant 0 : index
    %67 = vector.load %arg8[%c0_21, %c0_22] : memref<16x128xf32, #tpu.memory_space<vmem>>, vector<16x128xf32>
    %68 = vector.broadcast %54 : vector<1x128xf32> to vector<16x128xf32>
    %69 = arith.mulf %67, %68 : vector<16x128xf32>
    %70 = arith.addf %69, %66 : vector<16x128xf32>
    %c0_23 = arith.constant 0 : index
    %c0_24 = arith.constant 0 : index
    %71 = vector.load %arg8[%c0_23, %c0_24] : memref<16x128xf32, #tpu.memory_space<vmem>>, vector<16x128xf32>
    tpu.vector_store %arg8[%c0_23, %c0_24], %70 {strides = array<i32>} : memref<16x128xf32, #tpu.memory_space<vmem>>, vector<16x128xf32>,
    %c0_25 = arith.constant 0 : index
    %c0_26 = arith.constant 0 : index
    %72 = vector.load %arg9[%c0_25, %c0_26] : memref<1x128xf32, #tpu.memory_space<vmem>>, vector<1x128xf32>
    %73 = arith.mulf %72, %54 : vector<1x128xf32>
    %74 = vector.broadcast %63 : vector<128x1xf32> to vector<128x128xf32>
    %75 = arith.mulf %38, %74 : vector<128x128xf32>
    %cst_27 = arith.constant dense<0.000000e+00> : vector<128xf32>
    %76 = vector.multi_reduction <add>, %75, %cst_27 [0] : vector<128x128xf32> to vector<128xf32>
    %77 = vector.shape_cast %76 : vector<128xf32> to vector<1x128xf32>
    %78 = arith.addf %73, %77 : vector<1x128xf32>
    %c0_28 = arith.constant 0 : index
    %c0_29 = arith.constant 0 : index
    %79 = vector.load %arg9[%c0_28, %c0_29] : memref<1x128xf32, #tpu.memory_space<vmem>>, vector<1x128xf32>
    tpu.vector_store %arg9[%c0_28, %c0_29], %78 {strides = array<i32>} : memref<1x128xf32, #tpu.memory_space<vmem>>, vector<1x128xf32>,
    %c0_30 = arith.constant 0 : index
    %c0_31 = arith.constant 0 : index
    %80 = vector.load %arg10[%c0_30, %c0_31] : memref<1x128xf32, #tpu.memory_space<vmem>>, vector<1x128xf32>
    %cst_32 = arith.constant dense<0.000000e+00> : vector<128xf32>
    %81 = vector.multi_reduction <add>, %38, %cst_32 [0] : vector<128x128xf32> to vector<128xf32>
    %82 = vector.shape_cast %81 : vector<128xf32> to vector<1x128xf32>
    %83 = arith.addf %80, %82 : vector<1x128xf32>
    %c0_33 = arith.constant 0 : index
    %c0_34 = arith.constant 0 : index
    %84 = vector.load %arg10[%c0_33, %c0_34] : memref<1x128xf32, #tpu.memory_space<vmem>>, vector<1x128xf32>
    tpu.vector_store %arg10[%c0_33, %c0_34], %83 {strides = array<i32>} : memref<1x128xf32, #tpu.memory_space<vmem>>, vector<1x128xf32>,
    %85 = vector.extract_strided_slice %20 {offsets = [0, 0], sizes = [128, 1], strides = [1, 1]} : vector<128x16xf32> to vector<128x1xf32>
    %86 = vector.broadcast %85 : vector<128x1xf32> to vector<128x128xf32>
    %87 = arith.mulf %38, %86 : vector<128x128xf32>
    %cst_35 = arith.constant dense<0xFF800000> : vector<128xf32>
    %88 = vector.multi_reduction <maximumf>, %87, %cst_35 [0] : vector<128x128xf32> to vector<128xf32>
    %89 = vector.shape_cast %88 : vector<128xf32> to vector<1x128xf32>
    %90 = vector.extract_strided_slice %20 {offsets = [0, 1], sizes = [128, 1], strides = [1, 1]} : vector<128x16xf32> to vector<128x1xf32>
    %91 = vector.broadcast %90 : vector<128x1xf32> to vector<128x128xf32>
    %92 = arith.mulf %38, %91 : vector<128x128xf32>
    %cst_36 = arith.constant dense<0xFF800000> : vector<128xf32>
    %93 = vector.multi_reduction <maximumf>, %92, %cst_36 [0] : vector<128x128xf32> to vector<128xf32>
    %94 = vector.shape_cast %93 : vector<128xf32> to vector<1x128xf32>
    %95 = vector.extract_strided_slice %20 {offsets = [0, 2], sizes = [128, 1], strides = [1, 1]} : vector<128x16xf32> to vector<128x1xf32>
    %96 = vector.broadcast %95 : vector<128x1xf32> to vector<128x128xf32>
    %97 = arith.mulf %38, %96 : vector<128x128xf32>
    %cst_37 = arith.constant dense<0xFF800000> : vector<128xf32>
    %98 = vector.multi_reduction <maximumf>, %97, %cst_37 [0] : vector<128x128xf32> to vector<128xf32>
    %99 = vector.shape_cast %98 : vector<128xf32> to vector<1x128xf32>
    %100 = vector.extract_strided_slice %20 {offsets = [0, 3], sizes = [128, 1], strides = [1, 1]} : vector<128x16xf32> to vector<128x1xf32>
    %101 = vector.broadcast %100 : vector<128x1xf32> to vector<128x128xf32>
    %102 = arith.mulf %38, %101 : vector<128x128xf32>
    %cst_38 = arith.constant dense<0xFF800000> : vector<128xf32>
    %103 = vector.multi_reduction <maximumf>, %102, %cst_38 [0] : vector<128x128xf32> to vector<128xf32>
    %104 = vector.shape_cast %103 : vector<128xf32> to vector<1x128xf32>
    %105 = vector.extract_strided_slice %20 {offsets = [0, 4], sizes = [128, 1], strides = [1, 1]} : vector<128x16xf32> to vector<128x1xf32>
    %106 = vector.broadcast %105 : vector<128x1xf32> to vector<128x128xf32>
    %107 = arith.mulf %38, %106 : vector<128x128xf32>
    %cst_39 = arith.constant dense<0xFF800000> : vector<128xf32>
    %108 = vector.multi_reduction <maximumf>, %107, %cst_39 [0] : vector<128x128xf32> to vector<128xf32>
    %109 = vector.shape_cast %108 : vector<128xf32> to vector<1x128xf32>
    %110 = vector.extract_strided_slice %20 {offsets = [0, 5], sizes = [128, 1], strides = [1, 1]} : vector<128x16xf32> to vector<128x1xf32>
    %111 = vector.broadcast %110 : vector<128x1xf32> to vector<128x128xf32>
    %112 = arith.mulf %38, %111 : vector<128x128xf32>
    %cst_40 = arith.constant dense<0xFF800000> : vector<128xf32>
    %113 = vector.multi_reduction <maximumf>, %112, %cst_40 [0] : vector<128x128xf32> to vector<128xf32>
    %114 = vector.shape_cast %113 : vector<128xf32> to vector<1x128xf32>
    %115 = vector.extract_strided_slice %20 {offsets = [0, 6], sizes = [128, 1], strides = [1, 1]} : vector<128x16xf32> to vector<128x1xf32>
    %116 = vector.broadcast %115 : vector<128x1xf32> to vector<128x128xf32>
    %117 = arith.mulf %38, %116 : vector<128x128xf32>
    %cst_41 = arith.constant dense<0xFF800000> : vector<128xf32>
    %118 = vector.multi_reduction <maximumf>, %117, %cst_41 [0] : vector<128x128xf32> to vector<128xf32>
    %119 = vector.shape_cast %118 : vector<128xf32> to vector<1x128xf32>
    %120 = vector.extract_strided_slice %20 {offsets = [0, 7], sizes = [128, 1], strides = [1, 1]} : vector<128x16xf32> to vector<128x1xf32>
    %121 = vector.broadcast %120 : vector<128x1xf32> to vector<128x128xf32>
    %122 = arith.mulf %38, %121 : vector<128x128xf32>
    %cst_42 = arith.constant dense<0xFF800000> : vector<128xf32>
    %123 = vector.multi_reduction <maximumf>, %122, %cst_42 [0] : vector<128x128xf32> to vector<128xf32>
    %124 = vector.shape_cast %123 : vector<128xf32> to vector<1x128xf32>
    %125 = vector.extract_strided_slice %20 {offsets = [0, 8], sizes = [128, 1], strides = [1, 1]} : vector<128x16xf32> to vector<128x1xf32>
    %126 = vector.broadcast %125 : vector<128x1xf32> to vector<128x128xf32>
    %127 = arith.mulf %38, %126 : vector<128x128xf32>
    %cst_43 = arith.constant dense<0xFF800000> : vector<128xf32>
    %128 = vector.multi_reduction <maximumf>, %127, %cst_43 [0] : vector<128x128xf32> to vector<128xf32>
    %129 = vector.shape_cast %128 : vector<128xf32> to vector<1x128xf32>
    %130 = vector.extract_strided_slice %20 {offsets = [0, 9], sizes = [128, 1], strides = [1, 1]} : vector<128x16xf32> to vector<128x1xf32>
    %131 = vector.broadcast %130 : vector<128x1xf32> to vector<128x128xf32>
    %132 = arith.mulf %38, %131 : vector<128x128xf32>
    %cst_44 = arith.constant dense<0xFF800000> : vector<128xf32>
    %133 = vector.multi_reduction <maximumf>, %132, %cst_44 [0] : vector<128x128xf32> to vector<128xf32>
    %134 = vector.shape_cast %133 : vector<128xf32> to vector<1x128xf32>
    %135 = vector.extract_strided_slice %20 {offsets = [0, 10], sizes = [128, 1], strides = [1, 1]} : vector<128x16xf32> to vector<128x1xf32>
    %136 = vector.broadcast %135 : vector<128x1xf32> to vector<128x128xf32>
    %137 = arith.mulf %38, %136 : vector<128x128xf32>
    %cst_45 = arith.constant dense<0xFF800000> : vector<128xf32>
    %138 = vector.multi_reduction <maximumf>, %137, %cst_45 [0] : vector<128x128xf32> to vector<128xf32>
    %139 = vector.shape_cast %138 : vector<128xf32> to vector<1x128xf32>
    %140 = vector.extract_strided_slice %20 {offsets = [0, 11], sizes = [128, 1], strides = [1, 1]} : vector<128x16xf32> to vector<128x1xf32>
    %141 = vector.broadcast %140 : vector<128x1xf32> to vector<128x128xf32>
    %142 = arith.mulf %38, %141 : vector<128x128xf32>
    %cst_46 = arith.constant dense<0xFF800000> : vector<128xf32>
    %143 = vector.multi_reduction <maximumf>, %142, %cst_46 [0] : vector<128x128xf32> to vector<128xf32>
    %144 = vector.shape_cast %143 : vector<128xf32> to vector<1x128xf32>
    %145 = vector.extract_strided_slice %20 {offsets = [0, 12], sizes = [128, 1], strides = [1, 1]} : vector<128x16xf32> to vector<128x1xf32>
    %146 = vector.broadcast %145 : vector<128x1xf32> to vector<128x128xf32>
    %147 = arith.mulf %38, %146 : vector<128x128xf32>
    %cst_47 = arith.constant dense<0xFF800000> : vector<128xf32>
    %148 = vector.multi_reduction <maximumf>, %147, %cst_47 [0] : vector<128x128xf32> to vector<128xf32>
    %149 = vector.shape_cast %148 : vector<128xf32> to vector<1x128xf32>
    %150 = vector.extract_strided_slice %20 {offsets = [0, 13], sizes = [128, 1], strides = [1, 1]} : vector<128x16xf32> to vector<128x1xf32>
    %151 = vector.broadcast %150 : vector<128x1xf32> to vector<128x128xf32>
    %152 = arith.mulf %38, %151 : vector<128x128xf32>
    %cst_48 = arith.constant dense<0xFF800000> : vector<128xf32>
    %153 = vector.multi_reduction <maximumf>, %152, %cst_48 [0] : vector<128x128xf32> to vector<128xf32>
    %154 = vector.shape_cast %153 : vector<128xf32> to vector<1x128xf32>
    %155 = vector.extract_strided_slice %20 {offsets = [0, 14], sizes = [128, 1], strides = [1, 1]} : vector<128x16xf32> to vector<128x1xf32>
    %156 = vector.broadcast %155 : vector<128x1xf32> to vector<128x128xf32>
    %157 = arith.mulf %38, %156 : vector<128x128xf32>
    %cst_49 = arith.constant dense<0xFF800000> : vector<128xf32>
    %158 = vector.multi_reduction <maximumf>, %157, %cst_49 [0] : vector<128x128xf32> to vector<128xf32>
    %159 = vector.shape_cast %158 : vector<128xf32> to vector<1x128xf32>
    %160 = vector.extract_strided_slice %20 {offsets = [0, 15], sizes = [128, 1], strides = [1, 1]} : vector<128x16xf32> to vector<128x1xf32>
    %161 = vector.broadcast %160 : vector<128x1xf32> to vector<128x128xf32>
    %162 = arith.mulf %38, %161 : vector<128x128xf32>
    %cst_50 = arith.constant dense<0xFF800000> : vector<128xf32>
    %163 = vector.multi_reduction <maximumf>, %162, %cst_50 [0] : vector<128x128xf32> to vector<128xf32>
    %164 = vector.shape_cast %163 : vector<128xf32> to vector<1x128xf32>
    %c0_51 = arith.constant 0 : index
    %c0_52 = arith.constant 0 : index
    %165 = vector.load %arg11[%c0_51, %c0_52] : memref<16x128xf32, #tpu.memory_space<vmem>>, vector<16x128xf32>
    %166 = tpu.concatenate %89, %94, %99, %104, %109, %114, %119, %124, %129, %134, %139, %144, %149, %154, %159, %164 in 0 : vector<1x128xf32>, vector<1x128xf32>, vector<1x128xf32>, vector<1x128xf32>, vector<1x128xf32>, vector<1x128xf32>, vector<1x128xf32>, vector<1x128xf32>, vector<1x128xf32>, vector<1x128xf32>, vector<1x128xf32>, vector<1x128xf32>, vector<1x128xf32>, vector<1x128xf32>, vector<1x128xf32>, vector<1x128xf32> -> vector<16x128xf32>
    %167 = arith.maximumf %165, %166 : vector<16x128xf32>
    %c0_53 = arith.constant 0 : index
    %c0_54 = arith.constant 0 : index
    %168 = vector.load %arg11[%c0_53, %c0_54] : memref<16x128xf32, #tpu.memory_space<vmem>>, vector<16x128xf32>
    tpu.vector_store %arg11[%c0_53, %c0_54], %167 {strides = array<i32>} : memref<16x128xf32, #tpu.memory_space<vmem>>, vector<16x128xf32>,
    %c4_i32 = arith.constant 4 : i32
    %169 = arith.cmpi eq, %arg1, %c4_i32 : i32
    %170 = arith.extui %169 : i1 to i32
    %c0_i32_55 = arith.constant 0 : i32
    %171 = arith.cmpi ne, %170, %c0_i32_55 : i32
    scf.if %171 {
      %c0_56 = arith.constant 0 : index
      %c0_57 = arith.constant 0 : index
      %172 = vector.load %arg10[%c0_56, %c0_57] : memref<1x128xf32, #tpu.memory_space<vmem>>, vector<1x128xf32>
      %cst_58 = arith.constant 5.000000e-01 : f32
      %173 = vector.broadcast %cst_58 : f32 to vector<1x128xf32>
      %174 = arith.cmpf ogt, %172, %173 : vector<1x128xf32>
      %c0_59 = arith.constant 0 : index
      %c0_60 = arith.constant 0 : index
      %175 = vector.load %arg9[%c0_59, %c0_60] : memref<1x128xf32, #tpu.memory_space<vmem>>, vector<1x128xf32>
      %176 = arith.mulf %175, %172 : vector<1x128xf32>
      %cst_61 = arith.constant 1.000000e+00 : f32
      %177 = vector.broadcast %cst_61 : f32 to vector<1x128xf32>
      %178 = arith.select %174, %176, %177 : vector<1x128xi1>, vector<1x128xf32>
      %179 = tpu.reciprocal %178 : vector<1x128xf32> -> vector<1x128xf32>
      %c0_62 = arith.constant 0 : index
      %c0_63 = arith.constant 0 : index
      %180 = vector.load %arg8[%c0_62, %c0_63] : memref<16x128xf32, #tpu.memory_space<vmem>>, vector<16x128xf32>
      %181 = vector.broadcast %179 : vector<1x128xf32> to vector<16x128xf32>
      %182 = arith.mulf %180, %181 : vector<16x128xf32>
      %cst_64 = arith.constant 0.000000e+00 : f32
      %183 = vector.shape_cast %174 : vector<1x128xi1> to vector<1x128xi1>
      %184 = vector.broadcast %183 : vector<1x128xi1> to vector<16x128xi1>
      %185 = vector.broadcast %cst_64 : f32 to vector<16x128xf32>
      %186 = arith.select %184, %182, %185 : vector<16x128xi1>, vector<16x128xf32>
      %c0_65 = arith.constant 0 : index
      %c0_66 = arith.constant 0 : index
      %187 = vector.load %arg11[%c0_65, %c0_66] : memref<16x128xf32, #tpu.memory_space<vmem>>, vector<16x128xf32>
      %188 = tpu.concatenate %186, %187 in 0 : vector<16x128xf32>, vector<16x128xf32> -> vector<32x128xf32>
      %c0_67 = arith.constant 0 : index
      %c0_68 = arith.constant 0 : index
      %189 = vector.load %arg6[%c0_67, %c0_68] : memref<32x128xf32, #tpu.memory_space<vmem>>, vector<32x128xf32>
      tpu.vector_store %arg6[%c0_67, %c0_68], %188 {strides = array<i32>} : memref<32x128xf32, #tpu.memory_space<vmem>>, vector<32x128xf32>,
    } else {
    }
    return
  }
  func.func @transform_0(%arg0: i32, %arg1: i32) -> (i32, i32) {
    %c0_i32 = arith.constant 0 : i32
    %c0_i32_0 = arith.constant 0 : i32
    return %arg1, %c0_i32 : i32, i32
  }
  func.func @transform_1(%arg0: i32, %arg1: i32) -> (i32, i32) {
    %c0_i32 = arith.constant 0 : i32
    %c0_i32_0 = arith.constant 0 : i32
    return %arg1, %c0_i32 : i32, i32
  }
  func.func @transform_2(%arg0: i32, %arg1: i32) -> (i32, i32) {
    %c0_i32 = arith.constant 0 : i32
    %c0_i32_0 = arith.constant 0 : i32
    %c0_i32_1 = arith.constant 0 : i32
    return %c0_i32, %c0_i32_0 : i32, i32
  }
  func.func @transform_3(%arg0: i32, %arg1: i32) -> (i32, i32) {
    %c0_i32 = arith.constant 0 : i32
    %c0_i32_0 = arith.constant 0 : i32
    %c0_i32_1 = arith.constant 0 : i32
    return %c0_i32, %c0_i32_0 : i32, i32
  }
  func.func @transform_4(%arg0: i32, %arg1: i32) -> (i32, i32) {
    %c0_i32 = arith.constant 0 : i32
    %c0_i32_0 = arith.constant 0 : i32
    return %c0_i32, %arg0 : i32, i32
  }
}

</mosaic_0001>

<bundles_post_ra>
// kernel: tpu_custom_call.1
= control target key start
LH: loop header
LB: loop body
LE: loop exit
PB: predicated region body
PF: predicated region fallthrough
CT: control target
= control target key end

     0   :  { %9 = vsyncpa [#allocation8], 0  ;;  %s9074_s0 = inlined_call_operand.vmem [shape: f32[640,8], index: 0, kind: input, shape index: {}]   ;;  %s9075_s1 = inlined_call_operand.vmem [shape: s32[640,1], index: 1, kind: input, shape index: {}]   ;;  %s9076_s2 = inlined_call_operand.vmem [shape: f32[8,32], index: 2, kind: input, shape index: {}]   ;;  %s9077_s3 = inlined_call_operand.vmem [shape: f32[8,32], index: 3, kind: input, shape index: {}]   ;;  %s9078_s4 = inlined_call_operand.hbm [shape: f32[32,256], index: 4, kind: output, shape index: {}]  }
   0x1   :  { %11 = vsyncpa [#allocation8 + $0x1], 0  ;;  %s6031_s15 = smov 0   ;;  %s6033_s16 = smov 0  }
   0x2   :  { %s6035_s17 = smov 0   ;;  %s6037_s18 = smov 0  }
   0x3   :  { %s6039_s19 = smov 0   ;;  %s6041_s20 = smov 0  }
   0x4   :  { %s6043_s21 = smov 0   ;;  %s6045_s22 = smov 0  }
   0x5 LB: > { %s4724_s23 = sadd.s32 4294967295, %s5977_s22   ;;  %s4725_s24 = sadd.s32 4294967294, %s5977_s22   ;;  %s5977_s22 = sphi %s6045_s22, %s17_s22   ;;  %s5973_s21 = sphi %s6043_s21, %s9955_s21   ;;  %s5969_s20 = sphi %s6041_s20, %s9954_s20   ;;  %s5965_s19 = sphi %s6039_s19, %s9953_s19   ;;  %s5961_s18 = sphi %s6037_s18, %s9952_s18   ;;  %s5957_s17 = sphi %s6035_s17, %s9951_s17   ;;  %s5953_s16 = sphi %s6033_s16, %s9950_s16   ;;  %s5949_s15 = sphi %s6031_s15, %s9949_s15  }
   0x6   : > { %s26_s25 = sadd.s32 1, %s5969_s20  ;;  %s29_s26 = sadd.s32 1, %s5973_s21 }
   0x7   : > { %p27_p0 = scmp.ge.s32.totalorder %s26_s25, 5  ;;  %p140_p1 = scmp.ne.s32.totalorder %s5957_s17, %s5953_s16 }
   0x8   : > { %p141_p2 = scmp.eq.s32.totalorder %s4724_s23, 9  ;;  %p146_p4 = scmp.ne.s32.totalorder %s5953_s16, %s5949_s15 }
   0x9   : > { %s9957_s25 = smov (%p27_p0, %s26_s25), 0  ;;  %s9959_s26 = smov (!%p27_p0, %s29_s26), %s5973_s21 }
   0xa   : > { %p6080_p3 = por %p141_p2, %p140_p1  ;;  %p31_p5 = scmp.ge.s32.totalorder %s9959_s26, 2 }
   0xb   : > { %p147_p6 = scmp.eq.s32.totalorder %s4725_s24, 9  ;;  %p4728_p7 = scmp.ge.s32.totalorder %s5977_s22, 1 }
   0xc   : > { %p189_p8 = scmp.lt.s32.totalorder %s5977_s22, 11  ;;  %s9961_s26 = smov (%p31_p5, %s9959_s26), 0 }
   0xd   : > { %p6090_p9 = por %p147_p6, %p146_p4  ;;  %s127_s29 = ssub.s32 %s5973_s21, %s9961_s26 }
   0xe   : > { %p190_p10 = pnand %p4728_p7, %p189_p8  ;;  %s130_s30 = sadd.s32 1, %s5957_s17 }
   0xf   : > { %p128_p11 = scmp.eq.s32.totalorder %s127_s29, 0 }
  0x10   : > { %193 = sbr.rel (%p190_p10) target bundleno = 1907 (0x773), region = 36 }
  0x11   : > { %s6098_s5 = scalar_select %p128_p11, %s5957_s17, %s130_s30  }
  0x17   : > { %s217_s6 = sand.u32 1, %s5953_s16   ;;  %s4730_s7 = sshll.u32 %s5961_s18, 4 }
  0x18   : > { %s4729_s8 = sshll.u32 %s217_s6, 5  ;;  %p221_p12 = scmp.lt.s32.totalorder %s4730_s7, 79 }
  0x19   : > { %s6114_s24 = scalar_lea.vmem [#allocation7], %s4729_s8  ;;  %p4734_p13 = scmp.ne.s32.totalorder %s5961_s18, 0 }
  0x1a   : > { %s9963_s7 = smov (!%p221_p12, %s4730_s7), 79  ;;  %v5979_v0 = vmov (!%p4734_p13), -1e+30   ;;  %v5980_v1 = vmov (!%p4734_p13), 0.0  }
  0x1b   : > { %s4731_s9 = sshll.u32 %s9963_s7, 3  ;;  %235 = sbr.rel (%p4734_p13) target bundleno = 34 (0x22), region = 40  ;;  %236 = vst [vmem:[#allocation2] sm:$0x1] (!%p4734_p13), %v5979_v0  ;;  %237 = vst [vmem:[#allocation3] sm:$0xff] (!%p4734_p13), %v5980_v1 }
  0x1c   : > { %s6107_s12 = scalar_lea.vmem %s9074_s0, %s4731_s9  ;;  %s6112_s23 = scalar_lea.vmem %s9075_s1, %s4731_s9  ;;  %238 = vst [vmem:[#allocation3 + $0x8] sm:$0xff] (!%p4734_p13), %v5980_v1  ;;  %239 = vst [vmem:[#allocation4] sm:$0x1] (!%p4734_p13), %v5980_v1 }
  0x1d   : > { %240 = vst [vmem:[#allocation5] sm:$0x1] (!%p4734_p13), %v5980_v1  ;;  %241 = vst [vmem:[#allocation6] sm:$0xff] (!%p4734_p13), %v5980_v1 }
  0x1e   : > { %242 = vst [vmem:[#allocation6 + $0x8] sm:$0xff] (!%p4734_p13), %v5980_v1 }
  0x22 PF: > { %v260_v2 = vld [vmem:[%s9076_s2] sm:$0xff]  ;;  %vm265_vm0 = vcmask 64512   ;;  %v245_v4 = vld [vmem:[%s6107_s12 + $0x8] sm:$0xff]  ;;  %v246_v8 = vld [vmem:[%s6107_s12 + $0x10] sm:$0xff]  ;;  %s6328_s7 = sshll.u32 %s5965_s19, 7  ;;  %s5982_s10 = smov 16  }
  0x23   : > { %v244_v3 = vld [vmem:[%s6107_s12] sm:$0xff]  ;;  %v6122_v5 = vand.u32 4294901760, %v260_v2  ;;  %v270_v7 = vsel %vm265_vm0, %v245_v4, 0  ;;  %v247_v9 = vld [vmem:[%s6107_s12 + $0x18] sm:$0xff]  ;;  %v273_v13 = vsel %vm265_vm0, %v246_v8, 0  ;;  %v249_v15 = vld [vmem:[%s6107_s12 + $0x28] sm:$0xff] }
  0x24   : > { %v267_v6 = vsel %vm265_vm0, %v244_v3, 0  ;;  %v248_v10 = vld [vmem:[%s6107_s12 + $0x20] sm:$0xff]  ;;  %v6131_v12 = vand.u32 4294901760, %v270_v7  ;;  %v276_v14 = vsel %vm265_vm0, %v247_v9, 0  ;;  %v6140_v17 = vand.u32 4294901760, %v273_v13  ;;  %v250_v20 = vld [vmem:[%s6107_s12 + $0x30] sm:$0xff] }
  0x25   : > { %v6129_v11 = vand.u32 4294901760, %v267_v6  ;;  %5015 = vmatprep.subr.mxu0 %v6122_v5  ;;  %v6138_v16 = vsub.f32 %v260_v2, %v6122_v5  ;;  %v6142_v18 = vand.u32 4294901760, %v276_v14  ;;  %v279_v19 = vsel %vm265_vm0, %v248_v10, 0  ;;  %v251_v41 = vld [vmem:[%s6107_s12 + $0x38] sm:$0xff]  ;;  %v252_v46 = vld [vmem:[%s6107_s12 + $0x40] sm:$0xff]  ;;  %v253_v51 = vld [vmem:[%s6107_s12 + $0x48] sm:$0xff] }
  0x26   : > { %5016 = vmatpush3.msra.mxu0 %v6122_v5  ;;  %v6151_v22 = vsub.f32 %v270_v7, %v6131_v12  ;;  %v6153_v23 = vand.u32 4294901760, %v279_v19  ;;  %v282_v24 = vsel %vm265_vm0, %v249_v15, 0  ;;  %v6160_v26 = vsub.f32 %v273_v13, %v6140_v17  ;;  %v254_v52 = vld [vmem:[%s6107_s12 + $0x50] sm:$0xff]  ;;  %v255_v57 = vld [vmem:[%s6107_s12 + $0x58] sm:$0xff]  ;;  %v256_v62 = vld [vmem:[%s6107_s12 + $0x60] sm:$0xff]  ;;  %s1767_s8 = sadd.s32 128, %s6328_s7 }
  0x27   : > { %v6148_v21 = vsub.f32 %v267_v6, %v6129_v11  ;;  %v6157_v25 = vand.u32 4294901760, %v6138_v16  ;;  %v6163_v27 = vsub.f32 %v276_v14, %v6142_v18  ;;  %v6165_v28 = vand.u32 4294901760, %v282_v24  ;;  %v257_v63 = vld [vmem:[%s6107_s12 + $0x68] sm:$0xff]  ;;  %v258_v15 = vld [vmem:[%s6107_s12 + $0x70] sm:$0xff]  ;;  %s5986_s11 = smov 112   ;;  %p4800_p0 = scmp.ne.s32.totalorder %s5961_s18, 4 }
  0x28   : > { %v392_v30 = vand.u32 4294901760, %v6151_v22  ;;  %v6170_v31 = vsub.f32 %v279_v19, %v6153_v23  ;;  %v285_v32 = vsel %vm265_vm0, %v250_v20, 0  ;;  %v402_v34 = vand.u32 4294901760, %v6160_v26 }
  0x29   : > { %v382_v29 = vand.u32 4294901760, %v6148_v21  ;;  %v544_v33 = vsub.f32 %v6138_v16, %v6157_v25  ;;  %v412_v35 = vand.u32 4294901760, %v6163_v27  ;;  %v6178_v36 = vsub.f32 %v282_v24, %v6165_v28 }
  0x2a   : > { %v393_v38 = vsub.f32 %v6151_v22, %v392_v30  ;;  %v422_v39 = vand.u32 4294901760, %v6170_v31  ;;  %v6187_v40 = vand.u32 4294901760, %v285_v32  ;;  %v403_v43 = vsub.f32 %v6160_v26, %v402_v34 }
  0x2b   : > { %v383_v37 = vsub.f32 %v6148_v21, %v382_v29  ;;  %v545_v42 = vand.u32 4294901760, %v544_v33  ;;  %v413_v44 = vsub.f32 %v6163_v27, %v412_v35  ;;  %v432_v45 = vand.u32 4294901760, %v6178_v36 }
  0x2c   : > { %v394_v48 = vand.u32 4294901760, %v393_v38  ;;  %v423_v49 = vsub.f32 %v6170_v31, %v422_v39  ;;  %v6202_v50 = vsub.f32 %v285_v32, %v6187_v40  ;;  %v404_v53 = vand.u32 4294901760, %v403_v43 }
  0x2d   : > { %v384_v47 = vand.u32 4294901760, %v383_v37  ;;  %5041 = vmatprep.subr.mxu0 %v545_v42  ;;  %v414_v54 = vand.u32 4294901760, %v413_v44  ;;  %v433_v55 = vsub.f32 %v6178_v36, %v432_v45  ;;  %v288_v56 = vsel %vm265_vm0, %v251_v41, 0 }
  0x2e   : > { %v424_v58 = vand.u32 4294901760, %v423_v49  ;;  %v442_v59 = vand.u32 4294901760, %v6202_v50  ;;  %v6212_v60 = vand.u32 4294901760, %v288_v56  ;;  %v291_v61 = vsel %vm265_vm0, %v252_v46, 0 }
  0x2f   : > { %5017 = vmatprep.mubr.f32.mxu0 %v384_v47  ;;  %v434_v0 = vand.u32 4294901760, %v433_v55  ;;  %v6217_v1 = vand.u32 4294901760, %v291_v61  ;;  %v294_v2 = vsel %vm265_vm0, %v253_v51, 0  ;;  %v297_v3 = vsel %vm265_vm0, %v254_v52, 0  ;;  %v259_v51 = vld [vmem:[%s6107_s12 + $0x78] sm:$0xff] }
  0x30   : > { %5018 = vmatmul.mubr.f32.vlgmr.msra.gmra.mrb[0].mxu0 %v394_v48  ;;  %v443_v4 = vsub.f32 %v6202_v50, %v442_v59  ;;  %v6225_v6 = vsub.f32 %v288_v56, %v6212_v60  ;;  %v6227_v7 = vand.u32 4294901760, %v294_v2  ;;  %v6229_v8 = vand.u32 4294901760, %v297_v3 }
  0x31   : > { %5042 = vmatpush3.msra.mxu0 %v545_v42  ;;  %5020 = vmatprep.mubr.f32.mxu0 %v404_v53  ;;  %v6232_v9 = vsub.f32 %v291_v61, %v6217_v1  ;;  %v300_v10 = vsel %vm265_vm0, %v255_v57, 0  ;;  %v303_v13 = vsel %vm265_vm0, %v256_v62, 0  ;;  %v306_v14 = vsel %vm265_vm0, %v257_v63, 0 }
  0x32   : > { %5067 = vmatprep.subr.mxu0 %v6138_v16  ;;  %v444_v19 = vand.u32 4294901760, %v443_v4  ;;  %v452_v20 = vand.u32 4294901760, %v6225_v6  ;;  %v6241_v24 = vsub.f32 %v294_v2, %v6227_v7  ;;  %v6244_v32 = vsub.f32 %v297_v3, %v6229_v8 }
  0x33   : > { %v462_v33 = vand.u32 4294901760, %v6232_v9  ;;  %v6247_v37 = vand.u32 4294901760, %v300_v10  ;;  %v6249_v38 = vand.u32 4294901760, %v303_v13  ;;  %v6251_v41 = vand.u32 4294901760, %v306_v14 }
  0x34   : > { %5021 = vmatmul.mubr.f32.gmra.mrb[2].mxu0 %v414_v54  ;;  %v453_v42 = vsub.f32 %v6225_v6, %v452_v20  ;;  %v472_v43 = vand.u32 4294901760, %v6241_v24  ;;  %v482_v44 = vand.u32 4294901760, %v6244_v32  ;;  %v309_v46 = vsel %vm265_vm0, %v258_v15, 0 }
  0x35   : > { %5023 = vmatprep.mubr.f32.mxu0 %v424_v58  ;;  %v463_v47 = vsub.f32 %v6232_v9, %v462_v33  ;;  %v6263_v48 = vsub.f32 %v300_v10, %v6247_v37  ;;  %v6266_v49 = vsub.f32 %v303_v13, %v6249_v38  ;;  %v6270_v52 = vsub.f32 %v306_v14, %v6251_v41 }
  0x36   : > { %v6272_v53 = vand.u32 4294901760, %v309_v46  ;;  %v454_v54 = vand.u32 4294901760, %v453_v42  ;;  %v473_v55 = vsub.f32 %v6241_v24, %v472_v43  ;;  %v483_v56 = vsub.f32 %v6244_v32, %v482_v44 }
  0x37   : > { %v492_v57 = vand.u32 4294901760, %v6263_v48  ;;  %v464_v58 = vand.u32 4294901760, %v463_v47  ;;  %v9085_v61 = vand.u32 4294901760, %v6266_v49  ;;  %v312_v63 = vsel %vm265_vm0, %v259_v51, 0 }
  0x38   : > { %5024 = vmatmul.mubr.f32.gmra.mrb[4].mxu0 %v434_v0  ;;  %v6283_v62 = vsub.f32 %v309_v46, %v6272_v53  ;;  %v6286_v0 = vand.u32 4294901760, %v312_v63  ;;  %v474_v2 = vand.u32 4294901760, %v473_v55  ;;  %v9084_v4 = vand.u32 4294901760, %v6270_v52 }
  0x39   : > { %5026 = vmatprep.mubr.f32.mxu0 %v444_v19  ;;  %v493_v3 = vsub.f32 %v6263_v48, %v492_v57  ;;  %v484_v13 = vand.u32 4294901760, %v483_v56  ;;  %v503_v14 = vsub.f32 %v6266_v49, %v9085_v61  ;;  %v6420_v61 = vld [vmem:[%s6112_s23 + $0x70] sm:$0xff]  ;;  %vm1565_vm3 = vcmask 130048  }
  0x3a   : > { %v6293_v10 = vsub.f32 %v312_v63, %v6286_v0  ;;  %v9083_v15 = vand.u32 4294901760, %v6283_v62  ;;  %v513_v42 = vsub.f32 %v6270_v52, %v9084_v4  ;;  %v6331_v63 = vld [vmem:[%s6112_s23 + $0x8] sm:$0xff]  ;;  %v6410_v4 = vld [vmem:[%s6112_s23] sm:$0xff]  ;;  %9317 = vst [vmem:[#allocation22_spill] sm:$0xff] %v6420_v61 }
  0x3b   : > { %v494_v19 = vand.u32 4294901760, %v493_v3  ;;  %v504_v47 = vand.u32 4294901760, %v503_v14  ;;  %9305 = vst [vmem:[#allocation10_spill] sm:$0xff] %v6331_v63  ;;  %v6343_v14 = vld [vmem:[%s6112_s23 + $0x10] sm:$0xff]  ;;  %9315 = vst [vmem:[#allocation20_spill] sm:$0xff] %v6410_v4 }
  0x3c   : > { %5027 = vmatmul.mubr.f32.gmra.mrb[6].mxu0 %v454_v54  ;;  %v9082_v46 = vand.u32 4294901760, %v6293_v10  ;;  %v523_v51 = vsub.f32 %v6283_v62, %v9083_v15  ;;  %v514_v54 = vand.u32 4294901760, %v513_v42  ;;  %9307 = vst [vmem:[#allocation12_spill] sm:$0xff] %v6343_v14 }
  0x3d   : > { %5029 = vmatprep.mubr.f32.mxu0 %v464_v58 }
  0x3e   : > { %v533_v55 = vsub.f32 %v6293_v10, %v9082_v46  ;;  %v524_v56 = vand.u32 4294901760, %v523_v51  ;;  %v6379_v46 = vld [vmem:[%s6112_s23 + $0x28] sm:$0xff] }
  0x3f   : > { %9310 = vst [vmem:[#allocation15_spill] sm:$0xff] %v6379_v46 }
  0x40   : > { %5030 = vmatmul.mubr.f32.gmra.mrb[8].mxu0 %v474_v2  ;;  %v534_v58 = vand.u32 4294901760, %v533_v55  ;;  %v9079_v2 = vmov 0  }
  0x41   : > { %5032 = vmatprep.mubr.f32.mxu0 %v484_v13  ;;  %5777 = vset.pattern.permute.xlu1 %v9079_v2  ;;  %v6339_v13 = vstv %s1767_s8 }
  0x42   : > { %9306 = vst [vmem:[#allocation11_spill] sm:$0xff] %v6339_v13  ;;  %1659 = vperm.xlu1 %5777, %v6331_v63   ;;  %5776 = vset.pattern.permute.xlu0 %v9079_v2 }
  0x44   : > { %5033 = vmatmul.mubr.f32.gmra.mrb[10].mxu0 %v494_v19  ;;  %v6349_v19 = vld [vmem:[%s9077_s3] sm:$0xff] }
  0x45   : > { %5035 = vmatprep.mubr.f32.mxu0 %v504_v47 }
  0x46   : > { %1662 = vperm.xlu1 %5777, %v6343_v14  }
  0x48   : > { %5036 = vmatmul.mubr.f32.gmra.mrb[12].mxu0 %v514_v54  ;;  %v6360_v54 = vld [vmem:[%s6112_s23 + $0x18] sm:$0xff] }
  0x49   : > { %5038 = vmatprep.mubr.f32.mxu0 %v524_v56  ;;  %9308 = vst [vmem:[#allocation13_spill] sm:$0xff] %v6360_v54 }
  0x4a   : > { %1665 = vperm.xlu1 %5777, %v6360_v54  }
  0x4c   : > { %5039 = vmatmul.mubr.f32.gmra.mrb[14].mxu0 %v534_v58 }
  0x4d   : > { %5043 = vmatprep.mubr.f32.mxu0 %v6129_v11 }
  0x50   : > { %5044 = vmatmul.mubr.f32.vlgmr.msra.gmra.mrb[0].mxu0 %v6131_v12 }
  0x51   : > { %5068 = vmatpush3.msra.mxu0 %v6138_v16  ;;  %5046 = vmatprep.mubr.f32.mxu0 %v6140_v17  ;;  %v9081_v16 = vlaneseq }
  0x52   : > { %5093 = vmatprep.subr.mxu0 %v6122_v5 }
  0x53   : > { %v6337_v3 = vshrl.u32 %v9081_v16, 7  ;;  %v6376_v16 = vld [vmem:[%s6112_s23 + $0x20] sm:$0xff] }
  0x54   : > { %5047 = vmatmul.mubr.f32.gmra.mrb[2].mxu0 %v6142_v18  ;;  %9309 = vst [vmem:[#allocation14_spill] sm:$0xff] %v6376_v16  ;;  %1668 = vperm.xlu1 %5777, %v6376_v16  }
  0x55   : > { %5049 = vmatprep.mubr.f32.mxu0 %v6153_v23  ;;  %v1407_v42 = vsub.s32 1, %v6337_v3  ;;  %v1427_v47 = vsub.s32 2, %v6337_v3  ;;  %v1479_v51 = vsub.s32 3, %v6337_v3  ;;  %v1616_v55 = vsub.s32 4, %v6337_v3 }
  0x57   : > { %v1480_v56 = vrot.slane %v6349_v19, %v1479_v51  ;;  %v6370_v58 = vrot.slane %v6349_v19, %v1407_v42  ;;  %v6373_v2 = vrot.slane %v6349_v19, %v1427_v47  ;;  %v6382_v15 = vrot.slane %v6349_v19, %v1616_v55  ;;  %v6390_v42 = vld [vmem:[%s6112_s23 + $0x30] sm:$0xff]  ;;  %v6396_v47 = vld [vmem:[%s6112_s23 + $0x38] sm:$0xff]  ;;  %v6399_v51 = vld [vmem:[%s6112_s23 + $0x40] sm:$0xff] }
  0x58   : > { %5050 = vmatmul.mubr.f32.gmra.mrb[4].mxu0 %v6165_v28  ;;  %9311 = vst [vmem:[#allocation16_spill] sm:$0xff] %v6390_v42  ;;  %9312 = vst [vmem:[#allocation17_spill] sm:$0xff] %v6396_v47  ;;  %v6407_v55 = vld [vmem:[%s6112_s23 + $0x50] sm:$0xff]  ;;  %1671 = vperm.xlu1 %5777, %v6379_v46  }
  0x59   : > { %5052 = vmatprep.mubr.f32.mxu0 %v6187_v40  ;;  %1482 = vrot.lane.b32.xlu0 %v1480_v56, %s5982_s10  ;;  %9313 = vst [vmem:[#allocation18_spill] sm:$0xff] %v6399_v51  ;;  %9314 = vst [vmem:[#allocation19_spill] sm:$0xff] %v6407_v55  ;;  %v6417_v56 = vld [vmem:[%s6112_s23 + $0x60] sm:$0xff] }
  0x5a   : > { %9316 = vst [vmem:[#allocation21_spill] sm:$0xff] %v6417_v56 }
  0x5c   : > { %5053 = vmatmul.mubr.f32.gmra.mrb[6].mxu0 %v6212_v60  ;;  %1674 = vperm.xlu1 %5777, %v6390_v42  }
  0x5d   : > { %5055 = vmatprep.mubr.f32.mxu0 %v6217_v1  ;;  %1656 = vperm.xlu0 %5776, %v6410_v4  }
  0x60   : > { %5056 = vmatmul.mubr.f32.gmra.mrb[8].mxu0 %v6227_v7  ;;  %1677 = vperm.xlu1 %5777, %v6396_v47  }
  0x61   : > { %5058 = vmatprep.mubr.f32.mxu0 %v6229_v8 }
  0x64   : > { %5059 = vmatmul.mubr.f32.gmra.mrb[10].mxu0 %v6247_v37  ;;  %1680 = vperm.xlu1 %5777, %v6399_v51  }
  0x65   : > { %5061 = vmatprep.mubr.f32.mxu0 %v6249_v38 }
  0x68   : > { %5062 = vmatmul.mubr.f32.gmra.mrb[12].mxu0 %v6251_v41  ;;  %1686 = vperm.xlu1 %5777, %v6407_v55  }
  0x69   : > { %5064 = vmatprep.mubr.f32.mxu0 %v6272_v53 }
  0x6c   : > { %5065 = vmatmul.mubr.f32.gmra.mrb[14].mxu0 %v6286_v0  ;;  %1692 = vperm.xlu1 %5777, %v6417_v56  }
  0x6d   : > { %5069 = vmatprep.mubr.f32.mxu0 %v6148_v21  ;;  %v9318_v21 = vand.u32 4294901760, %v6266_v49 }
  0x70   : > { %5070 = vmatmul.mubr.f32.vlgmr.msra.gmra.mrb[0].mxu0 %v6151_v22  ;;  %1698 = vperm.xlu1 %5777, %v6420_v61   ;;  %v9319_v22 = vand.u32 4294901760, %v6270_v52 }
  0x71   : > { %5094 = vmatpush3.msra.mxu0 %v6122_v5  ;;  %5072 = vmatprep.mubr.f32.mxu0 %v6160_v26  ;;  %v9321_v26 = vand.u32 4294901760, %v6293_v10 }
  0x72   : > { %5119 = vmatprep.subr.mxu0 %v6157_v25 }
  0x74   : > { %5073 = vmatmul.mubr.f32.gmra.mrb[2].mxu0 %v6163_v27  ;;  %v9324_v27 = vlaneseq }
  0x75   : > { %5075 = vmatprep.mubr.f32.mxu0 %v6170_v31 }
  0x78   : > { %5076 = vmatmul.mubr.f32.gmra.mrb[4].mxu0 %v6178_v36 }
  0x79   : > { %5078 = vmatprep.mubr.f32.mxu0 %v6202_v50  ;;  %v9332_v50 = vmov 0 }
  0x7c   : > { %5079 = vmatmul.mubr.f32.gmra.mrb[6].mxu0 %v6225_v6 }
  0x7d   : > { %5081 = vmatprep.mubr.f32.mxu0 %v6232_v9 }
  0x80   : > { %5082 = vmatmul.mubr.f32.gmra.mrb[8].mxu0 %v6241_v24 }
  0x81   : > { %5084 = vmatprep.mubr.f32.mxu0 %v6244_v32 }
  0x84   : > { %5085 = vmatmul.mubr.f32.gmra.mrb[10].mxu0 %v6263_v48 }
  0x85   : > { %5087 = vmatprep.mubr.f32.mxu0 %v6266_v49 }
  0x88   : > { %5088 = vmatmul.mubr.f32.gmra.mrb[12].mxu0 %v6270_v52 }
  0x89   : > { %5090 = vmatprep.mubr.f32.mxu0 %v6283_v62 }
  0x8c   : > { %5091 = vmatmul.mubr.f32.gmra.mrb[14].mxu0 %v6293_v10 }
  0x8d   : > { %5095 = vmatprep.mubr.f32.mxu0 %v382_v29  ;;  %v6526_v29 = vstv %s6328_s7 }
  0x8e   : > { %9325 = vst [vmem:[#allocation25_spill] sm:$0xff] %v6526_v29 }
  0x90   : > { %5096 = vmatmul.mubr.f32.vlgmr.msra.gmra.mrb[0].mxu0 %v392_v30 }
  0x91   : > { %5120 = vmatpush3.msra.mxu0 %v6157_v25  ;;  %5098 = vmatprep.mubr.f32.mxu0 %v402_v34  ;;  %v9320_v25 = vand.u32 4294901760, %v6283_v62 }
  0x92   : > { %5145 = vmatprep.subr.mxu0 %v6122_v5 }
  0x94   : > { %5099 = vmatmul.mubr.f32.gmra.mrb[2].mxu0 %v412_v35 }
  0x95   : > { %5101 = vmatprep.mubr.f32.mxu0 %v422_v39  ;;  %v9326_v39 = vmov 0 }
  0x98   : > { %5102 = vmatmul.mubr.f32.gmra.mrb[4].mxu0 %v432_v45  ;;  %v9086_v45 = vmov 1.0|1.0  }
  0x99   : > { %5104 = vmatprep.mubr.f32.mxu0 %v442_v59 }
  0x9c   : > { %5105 = vmatmul.mubr.f32.gmra.mrb[6].mxu0 %v452_v20 }
  0x9d   : > { %5107 = vmatprep.mubr.f32.mxu0 %v462_v33 }
  0xa0   : > { %5108 = vmatmul.mubr.f32.gmra.mrb[8].mxu0 %v472_v43 }
  0xa1   : > { %5110 = vmatprep.mubr.f32.mxu0 %v482_v44 }
  0xa4   : > { %5111 = vmatmul.mubr.f32.gmra.mrb[10].mxu0 %v492_v57 }
  0xa5   : > { %5113 = vmatprep.mubr.f32.mxu0 %v9318_v21 }
  0xa8   : > { %5114 = vmatmul.mubr.f32.gmra.mrb[12].mxu0 %v9319_v22 }
  0xa9   : > { %5116 = vmatprep.mubr.f32.mxu0 %v9320_v25 }
  0xac   : > { %5117 = vmatmul.mubr.f32.gmra.mrb[14].mxu0 %v9321_v26 }
  0xad   : > { %5121 = vmatprep.mubr.f32.mxu0 %v6129_v11 }
  0xb0   : > { %5122 = vmatmul.mubr.f32.vlgmr.msra.gmra.mrb[0].mxu0 %v6131_v12 }
  0xb1   : > { %5146 = vmatpush3.msra.mxu0 %v6122_v5  ;;  %5124 = vmatprep.mubr.f32.mxu0 %v6140_v17  ;;  %v9088_v5 = vmov 2  }
  0xb2   : > { %5779 = vset.pattern.permute.xlu1 %v9088_v5 }
  0xb4   : > { %5125 = vmatmul.mubr.f32.gmra.mrb[2].mxu0 %v6142_v18 }
  0xb5   : > { %5127 = vmatprep.mubr.f32.mxu0 %v6153_v23 }
  0xb8   : > { %5128 = vmatmul.mubr.f32.gmra.mrb[4].mxu0 %v6165_v28 }
  0xb9   : > { %5130 = vmatprep.mubr.f32.mxu0 %v6187_v40 }
  0xbc   : > { %5131 = vmatmul.mubr.f32.gmra.mrb[6].mxu0 %v6212_v60 }
  0xbd   : > { %5133 = vmatprep.mubr.f32.mxu0 %v6217_v1 }
  0xc0   : > { %5134 = vmatmul.mubr.f32.gmra.mrb[8].mxu0 %v6227_v7 }
  0xc1   : > { %5136 = vmatprep.mubr.f32.mxu0 %v6229_v8 }
  0xc4   : > { %5137 = vmatmul.mubr.f32.gmra.mrb[10].mxu0 %v6247_v37 }
  0xc5   : > { %5139 = vmatprep.mubr.f32.mxu0 %v6249_v38 }
  0xc8   : > { %5140 = vmatmul.mubr.f32.gmra.mrb[12].mxu0 %v6251_v41 }
  0xc9   : > { %5142 = vmatprep.mubr.f32.mxu0 %v6272_v53 }
  0xcb   : > { %v6531_v31 = vpop.permute.xlu0 %1482 }
  0xcc   : > { %5143 = vmatmul.mubr.f32.gmra.mrb[14].mxu0 %v6286_v0 }
  0xcd   : > { %5147 = vmatprep.mubr.f32.mxu0 %v6129_v11  ;;  %v9090_v11 = vmov 1  }
  0xce   : > { %5778 = vset.pattern.permute.xlu0 %v9090_v11 }
  0xd0   : > { %5148 = vmatmul.mubr.f32.vlgmr.msra.gmra.mrb[0].mxu0 %v6131_v12  ;;  %v6516_v12 = vpop.permute.xlu1 %1659 }
  0xd1   : > { %5150 = vmatprep.mubr.f32.mxu0 %v6140_v17 }
  0xd4   : > { %5151 = vmatmul.mubr.f32.gmra.mrb[2].mxu0 %v6142_v18  ;;  %v6518_v17 = vpop.permute.xlu1 %1662 }
  0xd5   : > { %5153 = vmatprep.mubr.f32.mxu0 %v6153_v23  ;;  %9322 = vst [vmem:[#allocation23_spill] sm:$0xff] %v6518_v17 }
  0xd8   : > { %5154 = vmatmul.mubr.f32.gmra.mrb[4].mxu0 %v6165_v28  ;;  %v6520_v18 = vpop.permute.xlu1 %1665  ;;  %v1652_v28 = vand.u32 127, %v9324_v27 }
  0xd9   : > { %5156 = vmatprep.mubr.f32.mxu0 %v6187_v40  ;;  %9323 = vst [vmem:[#allocation24_spill] sm:$0xff] %v6520_v18  ;;  %v9329_v40 = vmov 0 }
  0xda   : > { %v6529_v30 = vadd.s32 %v6526_v29, %v1652_v28 }
  0xdc   : > { %5157 = vmatmul.mubr.f32.gmra.mrb[6].mxu0 %v6212_v60  ;;  %v6522_v23 = vpop.permute.xlu1 %1668  ;;  %vm1704_vm13 = vcmp.eq.s32.totalorder %v6516_v12, %v6529_v30  ;;  %v6537_v35 = vpop.permute.xlu0 %1656  ;;  %vm9170_vm14 = vcmp.eq.s32.totalorder %v6520_v18, %v6529_v30  ;;  %vm9173_vm12 = vcmp.eq.s32.totalorder %v6518_v17, %v6529_v30  ;;  %v9335_v60 = vmov 0 }
  0xdd   : > { %5159 = vmatprep.mubr.f32.mxu0 %v6217_v1  ;;  %vm1703_vm15 = vcmp.eq.s32.totalorder %v6537_v35, %v6529_v30  ;;  %vm6563_vm11 = vmpackc.low %vm9170_vm14, %vm9173_vm12  ;;  %vm1707_vm8 = vcmp.eq.s32.totalorder %v6522_v23, %v6529_v30  ;;  %v6616_v1 = vsub.s32 0, %v6337_v3 }
  0xde   : > { %vm6551_vm0 = vmpackc.low %vm1704_vm13, %vm1703_vm15  ;;  %v9330_v40 = vsel %vm6563_vm11, 4294967295, %v9329_v40 }
  0xdf   : > { %v9327_v39 = vsel %vm6551_vm0, 4294967295, %v9326_v39  ;;  %9331 = vst [vmem:[#allocation27_spill] sm:$0xff] %v9330_v40  ;;  %5382 = vmatprep.subr.msk.bf16.mxu1 %vm6551_vm0, %v9086_v45  ;;  %9338 = vst [vmem:[#allocation30_spill] sm:$0xff] %v6616_v1  ;;  %v6626_v6 = vrot.slane %v6349_v19, %v6616_v1  ;;  %v9357_v40 = vmov 1  }
  0xe0   : > { %5160 = vmatmul.mubr.f32.gmra.mrb[8].mxu0 %v6227_v7  ;;  %v6533_v34 = vpop.permute.xlu1 %1671  ;;  %9328 = vst [vmem:[#allocation26_spill] sm:$0xff] %v9327_v39  ;;  %5384 = vmatpush3.bf16.msk.msra.mxu1 %vm6551_vm0, %v9086_v45 }
  0xe1   : > { %5162 = vmatprep.mubr.f32.mxu0 %v6229_v8  ;;  %vm1708_vm9 = vcmp.eq.s32.totalorder %v6533_v34, %v6529_v30  ;;  %5386 = vmatprep.subr.msk.bf16.mxu1 %vm6563_vm11, %v9086_v45 }
  0xe2   : > { %vm6586_vm7 = vmpackc.low %vm1708_vm9, %vm1707_vm8 }
  0xe3   : > { %v9333_v50 = vsel %vm6586_vm7, 4294967295, %v9332_v50 }
  0xe4   : > { %5163 = vmatmul.mubr.f32.gmra.mrb[10].mxu0 %v6247_v37  ;;  %v6543_v36 = vpop.permute.xlu1 %1674  ;;  %9334 = vst [vmem:[#allocation28_spill] sm:$0xff] %v9333_v50  ;;  %5388 = vmatpush3.bf16.msk.msra.mxu1 %vm6563_vm11, %v9086_v45 }
  0xe5   : > { %5165 = vmatprep.mubr.f32.mxu0 %v6249_v38  ;;  %vm1709_vm5 = vcmp.eq.s32.totalorder %v6543_v36, %v6529_v30  ;;  %5390 = vmatprep.subr.msk.bf16.mxu1 %vm6586_vm7, %v9086_v45 }
  0xe8   : > { %5166 = vmatmul.mubr.f32.gmra.mrb[12].mxu0 %v6251_v41  ;;  %v6590_v59 = vpop.permute.xlu1 %1677  ;;  %5392 = vmatpush3.bf16.msk.msra.mxu1 %vm6586_vm7, %v9086_v45 }
  0xe9   : > { %5168 = vmatprep.mubr.f32.mxu0 %v6272_v53  ;;  %vm1710_vm6 = vcmp.eq.s32.totalorder %v6590_v59, %v6529_v30 }
  0xea   : > { %vm6608_vm4 = vmpackc.low %vm1710_vm6, %vm1709_vm5 }
  0xeb   : > { %v9336_v60 = vsel %vm6608_vm4, 4294967295, %v9335_v60  ;;  %5394 = vmatprep.subr.msk.bf16.mxu1 %vm6608_vm4, %v9086_v45 }
  0xec   : > { %5169 = vmatmul.mubr.f32.gmra.mrb[14].mxu0 %v6286_v0  ;;  %9337 = vst [vmem:[#allocation29_spill] sm:$0xff] %v9336_v60  ;;  %5396 = vmatpush3.bf16.msk.msra.mxu1 %vm6608_vm4, %v9086_v45 }
 0x1a3   : > { %v5149_v7 = vpop.f32.mrb[0].mxu0 }
 0x1a4   : > { %v6629_v8 = vadd.f32 %v5149_v7, %v6626_v6  ;;  %v1311_v9 = vpop.f32.mrb[1].mxu0 }
 0x1a5   : > { %v6632_v20 = vadd.f32 %v1311_v9, %v6626_v6 }
 0x1a6   : > { %9339 = vst [vmem:[#allocation31_spill] sm:$0xff] %v6629_v8  ;;  %v1410_v24 = vmul.f32 %v6629_v8, %v6370_v58  ;;  %v1462_v32 = vmax.f32 %v6629_v8, 0.0 }
 0x1a7   : > { %9340 = vst [vmem:[#allocation32_spill] sm:$0xff] %v6632_v20  ;;  %v1409_v33 = vmul.f32 %v6632_v20, %v6370_v58  ;;  %v1461_v37 = vmax.f32 %v6632_v20, 0.0  ;;  %v5152_v38 = vpop.f32.mrb[2].mxu0 }
 0x1a8   : > { %v1430_v41 = vadd.f32 %v6373_v2, %v1410_v24  ;;  %v6642_v43 = vadd.f32 %v5152_v38, %v6626_v6  ;;  %v1323_v44 = vpop.f32.mrb[3].mxu0  ;;  %v1486_v48 = vmul.f32 %v6531_v31, %v1462_v32 }
 0x1a9   : > { %v1429_v49 = vadd.f32 %v6373_v2, %v1409_v33  ;;  %v6647_v52 = vadd.f32 %v1323_v44, %v6626_v6  ;;  %v1485_v53 = vmul.f32 %v6531_v31, %v1461_v37 }
 0x1aa   : > { %9341 = vst [vmem:[#allocation33_spill] sm:$0xff] %v6642_v43  ;;  %v1412_v57 = vmul.f32 %v6642_v43, %v6370_v58  ;;  %1519 = vrot.lane.b32.xlu1 %v1486_v48, %s5986_s11  ;;  %v6656_v10 = vmax.f32 %v1430_v41, 0.0 }
 0x1ab   : > { %9342 = vst [vmem:[#allocation34_spill] sm:$0xff] %v6647_v52  ;;  %v1411_v62 = vmul.f32 %v6647_v52, %v6370_v58  ;;  %v5155_v0 = vpop.f32.mrb[4].mxu0  ;;  %1517 = vrot.lane.b32.xlu0 %v1485_v53, %s5986_s11  ;;  %v1463_v19 = vmax.f32 %v6647_v52, 0.0  ;;  %v6680_v37 = vmax.f32 %v1429_v49, 0.0 }
 0x1ac   : > { %9343 = vst [vmem:[#allocation35_spill] sm:$0xff] %v6656_v10  ;;  %v1432_v3 = vadd.f32 %v6373_v2, %v1412_v57  ;;  %v6661_v21 = vadd.f32 %v5155_v0, %v6626_v6  ;;  %v1335_v22 = vpop.f32.mrb[5].mxu0 }
 0x1ad   : > { %v1431_v25 = vadd.f32 %v6373_v2, %v1411_v62  ;;  %v6665_v26 = vadd.f32 %v1335_v22, %v6626_v6  ;;  %v1487_v33 = vmul.f32 %v6531_v31, %v1463_v19  ;;  %9347 = vst [vmem:[#allocation39_spill] sm:$0xff] %v6680_v37 }
 0x1ae   : > { %9344 = vst [vmem:[#allocation36_spill] sm:$0xff] %v6661_v21  ;;  %v1414_v27 = vmul.f32 %v6661_v21, %v6370_v58  ;;  %3156 = vperm.xlu1 %5779, %v6656_v10  }
 0x1af   : > { %9345 = vst [vmem:[#allocation37_spill] sm:$0xff] %v6665_v26  ;;  %v1413_v28 = vmul.f32 %v6665_v26, %v6370_v58  ;;  %v5158_v7 = vpop.f32.mrb[6].mxu0  ;;  %3055 = vperm.xlu0 %5778, %v6656_v10   ;;  %v6692_v57 = vmax.f32 %v1431_v25, 0.0  ;;  %v1465_v49 = vmax.f32 %v6665_v26, 0.0 }
 0x1b0   : > { %v6674_v9 = vadd.f32 %v6373_v2, %v1414_v27  ;;  %v6677_v24 = vadd.f32 %v5158_v7, %v6626_v6  ;;  %v1347_v32 = vpop.f32.mrb[7].mxu0 }
 0x1b1   : > { %v1433_v38 = vadd.f32 %v6373_v2, %v1413_v28  ;;  %v6684_v41 = vadd.f32 %v1347_v32, %v6626_v6  ;;  %9349 = vst [vmem:[#allocation41_spill] sm:$0xff] %v6692_v57  ;;  %v1464_v28 = vmax.f32 %v6642_v43, 0.0 }
 0x1b2   : > { %9346 = vst [vmem:[#allocation38_spill] sm:$0xff] %v6677_v24  ;;  %v1416_v44 = vmul.f32 %v6677_v24, %v6370_v58  ;;  %1521 = vrot.lane.b32.xlu1 %v1487_v33, %s5986_s11 }
 0x1b3   : > { %9348 = vst [vmem:[#allocation40_spill] sm:$0xff] %v6684_v41  ;;  %v1415_v48 = vmul.f32 %v6684_v41, %v6370_v58  ;;  %v5161_v53 = vpop.f32.mrb[8].mxu0  ;;  %3051 = vperm.xlu0 %5778, %v6680_v37   ;;  %v6732_v60 = vmax.f32 %v1433_v38, 0.0  ;;  %v9111_v38 = vmov 0.0  }
 0x1b4   : > { %v6696_v62 = vadd.f32 %v6373_v2, %v1416_v44  ;;  %v6699_v0 = vadd.f32 %v5161_v53, %v6626_v6  ;;  %v1359_v19 = vpop.f32.mrb[9].mxu0  ;;  %v1489_v53 = vmul.f32 %v6531_v31, %v1465_v49  ;;  %v1467_v49 = vmax.f32 %v6684_v41, 0.0 }
 0x1b5   : > { %v1435_v22 = vadd.f32 %v6373_v2, %v1415_v48  ;;  %v6703_v27 = vadd.f32 %v1359_v19, %v6626_v6  ;;  %9354 = vst [vmem:[#allocation46_spill] sm:$0xff] %v6732_v60  ;;  %v6776_v39 = vsel %vm1707_vm8, 1.0, %v9111_v38  ;;  %v6784_v26 = vsel %vm1708_vm9, 1.0, %v9111_v38 }
 0x1b6   : > { %9350 = vst [vmem:[#allocation42_spill] sm:$0xff] %v6699_v0  ;;  %v1418_v25 = vmul.f32 %v6699_v0, %v6370_v58  ;;  %3160 = vperm.xlu1 %5779, %v6692_v57   ;;  %9359 = vst [vmem:[#allocation50_spill] sm:$0xff] %v6776_v39  ;;  %v6790_v43 = vsel %vm1709_vm5, 1.0, %v9111_v38  ;;  %v6796_v52 = vsel %vm1710_vm6, 1.0, %v9111_v38  ;;  %v1491_v56 = vmul.f32 %v6531_v31, %v1467_v49 }
 0x1b7   : > { %9351 = vst [vmem:[#allocation43_spill] sm:$0xff] %v6703_v27  ;;  %v1417_v7 = vmul.f32 %v6703_v27, %v6370_v58  ;;  %v5164_v32 = vpop.f32.mrb[10].mxu0  ;;  %5780 = vset.pattern.permute.xlu0 %v9088_v5  ;;  %v6810_v55 = vsel %vm1703_vm15, 1.0, %v9111_v38  ;;  %v6843_v42 = vsub.f32 %v6784_v26, %v6784_v26  ;;  %v6851_v46 = vsub.f32 %v6796_v52, %v6796_v52 }
 0x1b8   : > { %v6713_v33 = vadd.f32 %v6373_v2, %v1418_v25  ;;  %v6716_v44 = vadd.f32 %v5164_v32, %v6626_v6  ;;  %v1371_v48 = vpop.f32.mrb[11].mxu0  ;;  %3152 = vperm.xlu0 %5780, %v6680_v37   ;;  %v1488_v25 = vmul.f32 %v6531_v31, %v1464_v28  ;;  %v6853_v16 = vmax.f32 %v1435_v22, 0.0 }
 0x1b9   : > { %v6721_v19 = vadd.f32 %v6373_v2, %v1417_v7  ;;  %v6724_v45 = vadd.f32 %v1371_v48, %v6626_v6  ;;  %9365 = vst [vmem:[#allocation56_spill] sm:$0xff] %v6843_v42  ;;  %9367 = vst [vmem:[#allocation58_spill] sm:$0xff] %v6851_v46  ;;  %v1469_v54 = vmax.f32 %v6703_v27, 0.0 }
 0x1ba   : > { %9352 = vst [vmem:[#allocation44_spill] sm:$0xff] %v6716_v44  ;;  %v1420_v5 = vmul.f32 %v6716_v44, %v6370_v58  ;;  %1525 = vrot.lane.b32.xlu1 %v1489_v53, %s5986_s11  ;;  %9368 = vst [vmem:[#allocation59_spill] sm:$0xff] %v6853_v16 }
 0x1bb   : > { %9353 = vst [vmem:[#allocation45_spill] sm:$0xff] %v6724_v45  ;;  %v1419_v32 = vmul.f32 %v6724_v45, %v6370_v58  ;;  %v5167_v11 = vpop.f32.mrb[12].mxu0  ;;  %v1493_v18 = vmul.f32 %v6531_v31, %v1469_v54 }
 0x1bc   : > { %v6736_v7 = vadd.f32 %v6373_v2, %v1420_v5  ;;  %v6739_v48 = vadd.f32 %v5167_v11, %v6626_v6  ;;  %v1383_v50 = vpop.f32.mrb[13].mxu0  ;;  %1523 = vrot.lane.b32.xlu0 %v1488_v25, %s5986_s11  ;;  %v6753_v5 = vsel %vm1704_vm13, 1.0, %v9111_v38  ;;  %v6759_v11 = vsel %vm9173_vm12, 1.0, %v9111_v38 }
 0x1bd   : > { %v6743_v53 = vadd.f32 %v6373_v2, %v1419_v32  ;;  %v6746_v28 = vadd.f32 %v1383_v50, %v6626_v6  ;;  %5781 = vset.pattern.permute.xlu0 %v9357_v40  ;;  %v6761_v25 = vmax.f32 %v1432_v3, 0.0  ;;  %v6770_v32 = vsel %vm9170_vm14, 1.0, %v9111_v38 }
 0x1be   : > { %9355 = vst [vmem:[#allocation47_spill] sm:$0xff] %v6739_v48  ;;  %v1422_v50 = vmul.f32 %v6739_v48, %v6370_v58  ;;  %3168 = vperm.xlu1 %5779, %v6732_v60   ;;  %v6829_v38 = vsub.f32 %v6759_v11, %v6759_v11 }
 0x1bf   : > { %9356 = vst [vmem:[#allocation48_spill] sm:$0xff] %v6746_v28  ;;  %9358 = vst [vmem:[#allocation49_spill] sm:$0xff] %v6761_v25  ;;  %v1421_v3 = vmul.f32 %v6746_v28, %v6370_v58  ;;  %v5170_v41 = vpop.f32.mrb[14].mxu0 }
 0x1c0   : > { %v6799_v8 = vadd.f32 %v6373_v2, %v1422_v50  ;;  %v6802_v20 = vadd.f32 %v5170_v41, %v6626_v6  ;;  %v1395_v61 = vpop.f32.mrb[15].mxu0  ;;  %3063 = vperm.xlu0 %5781, %v6761_v25   ;;  %v6818_v41 = vsub.f32 %v6810_v55, %v6810_v55  ;;  %v6822_v50 = vsub.f32 %v6753_v5, %v6753_v5 }
 0x1c1   : > { %v1441_v51 = vadd.f32 %v6373_v2, %v1421_v3  ;;  %v6814_v47 = vadd.f32 %v1395_v61, %v6626_v6  ;;  %9362 = vst [vmem:[#allocation53_spill] sm:$0xff] %v6829_v38  ;;  %v6833_v61 = vsub.f32 %v6770_v32, %v6770_v32  ;;  %v6837_v6 = vsub.f32 %v6776_v39, %v6776_v39 }
 0x1c2   : > { %9360 = vst [vmem:[#allocation51_spill] sm:$0xff] %v6802_v20  ;;  %v1424_v49 = vmul.f32 %v6802_v20, %v6370_v58  ;;  %1529 = vrot.lane.b32.xlu1 %v1491_v56, %s5986_s11  ;;  %v6847_v56 = vsub.f32 %v6790_v43, %v6790_v43  ;;  %v6864_v13 = vpack.c.bf16 %v6822_v50, %v6818_v41  ;;  %v9136_v22 = vand.u32 4294901760, %v6818_v41 }
 0x1c3   : > { %9361 = vst [vmem:[#allocation52_spill] sm:$0xff] %v6814_v47  ;;  %9363 = vst [vmem:[#allocation54_spill] sm:$0xff] %v6833_v61  ;;  %v1423_v3 = vmul.f32 %v6814_v47, %v6370_v58  ;;  %v9369_v58 = vmov 2   ;;  %v9132_v4 = vand.u32 4294901760, %v6822_v50  ;;  %v9134_v27 = vand.u32 4294901760, %v6829_v38 }
 0x1c4   : > { %9364 = vst [vmem:[#allocation55_spill] sm:$0xff] %v6837_v6  ;;  %9366 = vst [vmem:[#allocation57_spill] sm:$0xff] %v6847_v56  ;;  %v6857_v14 = vadd.f32 %v6373_v2, %v1424_v49  ;;  %5782 = vset.pattern.permute.xlu0 %v9369_v58  ;;  %v9133_v49 = vand.u32 4294901760, %v6833_v61  ;;  %v9373_v1 = vand.u32 4294901760, %v6837_v6  ;;  %v9375_v54 = vand.u32 4294901760, %v6847_v56 }
 0x1c5   : > { %v1443_v63 = vadd.f32 %v6373_v2, %v1423_v3  ;;  %3164 = vperm.xlu0 %5782, %v6761_v25   ;;  %9370 = vst [vmem:[#allocation60_spill] sm:$0xff] %v6864_v13  ;;  %v9135_v2 = vand.u32 4294901760, %v6843_v42  ;;  %v1466_v13 = vmax.f32 %v6661_v21, 0.0  ;;  %v6881_v17 = vpack.c.bf16 %v9132_v4, %v9136_v22 }
 0x1c6   : > { %3176 = vperm.xlu1 %5779, %v6853_v16   ;;  %v6887_v29 = vpack.c.bf16 %v9133_v49, %v9134_v27  ;;  %v9376_v21 = vand.u32 4294901760, %v6851_v46  ;;  %v6906_v49 = vmax.f32 %v6721_v19, 0.0  ;;  %v6996_v22 = vmax.f32 %v6857_v14, 0.0 }
 0x1c7   : > { %9371 = vst [vmem:[#allocation61_spill] sm:$0xff] %v6881_v17  ;;  %v6894_v3 = vpack.c.bf16 %v9135_v2, %v9373_v1  ;;  %v1490_v27 = vmul.f32 %v6531_v31, %v1466_v13  ;;  %v6912_v1 = vmax.f32 %v6674_v9, 0.0  ;;  %v6923_v13 = vmax.f32 %v6743_v53, 0.0 }
 0x1c8   : > { %9372 = vst [vmem:[#allocation62_spill] sm:$0xff] %v6887_v29  ;;  %v6900_v4 = vpack.c.bf16 %v9376_v21, %v9375_v54  ;;  %9378 = vst [vmem:[#allocation65_spill] sm:$0xff] %v6906_v49  ;;  %v1471_v21 = vmax.f32 %v6724_v45, 0.0  ;;  %v1473_v9 = vmax.f32 %v6746_v28, 0.0  ;;  %v6934_v53 = vmax.f32 %v1441_v51, 0.0 }
 0x1c9   : > { %5783 = vset.pattern.permute.xlu0 %v9357_v40  ;;  %9374 = vst [vmem:[#allocation63_spill] sm:$0xff] %v6894_v3  ;;  %9379 = vst [vmem:[#allocation66_spill] sm:$0xff] %v6912_v1  ;;  %v1470_v51 = vmax.f32 %v6699_v0, 0.0  ;;  %v9145_v14 = vmov 3   ;;  %v9392_v3 = vmov 0  }
 0x1ca   : > { %9377 = vst [vmem:[#allocation64_spill] sm:$0xff] %v6900_v4  ;;  %1533 = vrot.lane.b32.xlu1 %v1493_v18, %s5986_s11  ;;  %3059 = vperm.xlu0 %5783, %v6692_v57   ;;  %v1495_v18 = vmul.f32 %v6531_v31, %v1471_v21  ;;  %9380 = vst [vmem:[#allocation67_spill] sm:$0xff] %v6923_v13  ;;  %v1497_v19 = vmul.f32 %v6531_v31, %v1473_v9  ;;  %v1475_v21 = vmax.f32 %v6814_v47, 0.0 }
 0x1cb   : > { %5789 = vset.pattern.permute.xlu1 %v9357_v40  ;;  %9381 = vst [vmem:[#allocation68_spill] sm:$0xff] %v6934_v53  ;;  %v6945_v9 = vmax.f32 %v1443_v63, 0.0  ;;  %v1472_v63 = vmax.f32 %v6716_v44, 0.0  ;;  %9387 = vst [vmem:[#allocation74_spill] sm:$0xff] %v6996_v22  ;;  %v9434_v44 = vmov 3  }
 0x1cc   : > { %v1499_v2 = vmul.f32 %v6531_v31, %v1475_v21  ;;  %v6974_v21 = vpop.permute.xlu1 %1680 }
 0x1cd   : > { %9383 = vst [vmem:[#allocation70_spill] sm:$0xff] %v6945_v9 }
 0x1ce   : > { %3083 = vperm.xlu1 %5789, %v6906_v49   ;;  %1527 = vrot.lane.b32.xlu0 %v1490_v27, %s5986_s11  ;;  %v1468_v27 = vmax.f32 %v6677_v24, 0.0 }
 0x1d0   : > { %v1492_v54 = vmul.f32 %v6531_v31, %v1468_v27  ;;  %v1496_v27 = vmul.f32 %v6531_v31, %v1472_v63 }
 0x1d2   : > { %5790 = vset.pattern.permute.xlu1 %v9369_v58  ;;  %3071 = vperm.xlu0 %5783, %v6912_v1  }
 0x1d3   : > { %3184 = vperm.xlu1 %5790, %v6906_v49  }
 0x1d6   : > { %5784 = vset.pattern.permute.xlu0 %v9369_v58 }
 0x1d7   : > { %1537 = vrot.lane.b32.xlu1 %v1495_v18, %s5986_s11  ;;  %3172 = vperm.xlu0 %5784, %v6912_v1   ;;  %v6938_v18 = vmax.f32 %v6696_v62, 0.0  ;;  %v1494_v62 = vmul.f32 %v6531_v31, %v1470_v51  ;;  %v6981_v51 = vpop.permute.xlu1 %1686 }
 0x1d8   : > { %vm9182_vm2 = vcmp.eq.s32.totalorder %v6981_v51, %v6529_v30 }
 0x1d9   : > { %9382 = vst [vmem:[#allocation69_spill] sm:$0xff] %v6938_v18 }
 0x1db   : > { %3192 = vperm.xlu1 %5790, %v6923_v13   ;;  %5785 = vset.pattern.permute.xlu0 %v9357_v40  ;;  %v6986_v63 = vpop.permute.xlu1 %1692 }
 0x1dc   : > { %3067 = vperm.xlu0 %5785, %v6732_v60  }
 0x1df   : > { %1541 = vrot.lane.b32.xlu1 %v1497_v19, %s5986_s11  ;;  %v6965_v19 = vmax.f32 %v6736_v7, 0.0  ;;  %v6978_v7 = vmax.f32 %v6799_v8, 0.0 }
 0x1e0   : > { %1531 = vrot.lane.b32.xlu0 %v1492_v54, %s5986_s11 }
 0x1e1   : > { %9385 = vst [vmem:[#allocation72_spill] sm:$0xff] %v6965_v19  ;;  %9386 = vst [vmem:[#allocation73_spill] sm:$0xff] %v6978_v7 }
 0x1e3   : > { %3200 = vperm.xlu1 %5790, %v6934_v53  }
 0x1e4   : > { %3079 = vperm.xlu0 %5785, %v6938_v18  }
 0x1e7   : > { %1545 = vrot.lane.b32.xlu1 %v1499_v2, %s5986_s11  ;;  %v6955_v2 = vmax.f32 %v6713_v33, 0.0  ;;  %v1474_v33 = vmax.f32 %v6739_v48, 0.0 }
 0x1e8   : > { %5786 = vset.pattern.permute.xlu0 %v9369_v58 }
 0x1e9   : > { %3180 = vperm.xlu0 %5786, %v6938_v18   ;;  %9384 = vst [vmem:[#allocation71_spill] sm:$0xff] %v6955_v2  ;;  %v1498_v54 = vmul.f32 %v6531_v31, %v1474_v33 }
 0x1eb   : > { %3208 = vperm.xlu1 %5790, %v6945_v9  }
 0x1ed   : > { %5787 = vset.pattern.permute.xlu0 %v9357_v40 }
 0x1ee   : > { %3075 = vperm.xlu0 %5787, %v6853_v16  }
 0x1ef   : > { %5799 = vset.pattern.permute.xlu1 %v9145_v14 }
 0x1f2   : > { %1535 = vrot.lane.b32.xlu0 %v1494_v62, %s5986_s11  ;;  %v1476_v62 = vmax.f32 %v6802_v20, 0.0 }
 0x1f4   : > { %v1500_v8 = vmul.f32 %v6531_v31, %v1476_v62 }
 0x1f6   : > { %3087 = vperm.xlu0 %5787, %v6955_v2  }
 0x1fa   : > { %5788 = vset.pattern.permute.xlu0 %v9369_v58 }
 0x1fb   : > { %3188 = vperm.xlu0 %5788, %v6955_v2  }
 0x1ff   : > { %1539 = vrot.lane.b32.xlu0 %v1496_v27, %s5986_s11 }
 0x200   : > { %5791 = vset.pattern.permute.xlu0 %v9357_v40 }
 0x203   : > { %3095 = vperm.xlu0 %5791, %v6965_v19  }
 0x207   : > { %5792 = vset.pattern.permute.xlu0 %v9369_v58 }
 0x208   : > { %3196 = vperm.xlu0 %5792, %v6965_v19  }
 0x20c   : > { %5793 = vset.pattern.permute.xlu0 %v9357_v40 }
 0x20d   : > { %3091 = vperm.xlu0 %5793, %v6923_v13  }
 0x211   : > { %1543 = vrot.lane.b32.xlu0 %v1498_v54, %s5986_s11  ;;  %v6992_v54 = vpop.permute.xlu1 %1698 }
 0x215   : > { %3103 = vperm.xlu0 %5793, %v6978_v7  }
 0x219   : > { %5794 = vset.pattern.permute.xlu0 %v9369_v58 }
 0x21a   : > { %3204 = vperm.xlu0 %5794, %v6978_v7  }
 0x21c   : > { %v1520_v4 = vpop.permute.xlu1 %1519 }
 0x21d   : > { %v1518_v27 = vpop.permute.xlu0 %1517 }
 0x21e   : > { %5795 = vset.pattern.permute.xlu0 %v9357_v40  ;;  %v1566_v33 = vsel %vm1565_vm3, %v1518_v27, 0.0 }
 0x21f   : > { %1567 = vadd.xlane.f32.xlu1 %v1566_v33  ;;  %3099 = vperm.xlu0 %5795, %v6934_v53  }
 0x223   : > { %1547 = vrot.lane.b32.xlu0 %v1500_v8, %s5986_s11 }
 0x227   : > { %3111 = vperm.xlu0 %5795, %v6996_v22  }
 0x22b   : > { %5796 = vset.pattern.permute.xlu0 %v9369_v58 }
 0x22c   : > { %3212 = vperm.xlu0 %5796, %v6996_v22  }
 0x22d   : > { %v7001_v27 = vpop.permute.xlu1 %3156 }
 0x22e   : > { %9388 = vst [vmem:[#allocation75_spill] sm:$0xff] %v7001_v27  ;;  %v7003_v33 = vpop.permute.xlu0 %3055 }
 0x22f   : > { %9389 = vst [vmem:[#allocation76_spill] sm:$0xff] %v7003_v33 }
 0x230   : > { %5797 = vset.pattern.permute.xlu0 %v9357_v40 }
 0x231   : > { %v1522_v31 = vpop.permute.xlu1 %1521  ;;  %3107 = vperm.xlu0 %5797, %v6945_v9  }
 0x232   : > { %v7007_v62 = vpop.permute.xlu0 %3051 }
 0x233   : > { %9390 = vst [vmem:[#allocation77_spill] sm:$0xff] %v7007_v62 }
 0x235   : > { %v7010_v8 = vpop.permute.xlu1 %3160  ;;  %5798 = vset.pattern.permute.xlu0 %v9392_v3 }
 0x236   : > { %9391 = vst [vmem:[#allocation78_spill] sm:$0xff] %v7010_v8 }
 0x237   : > { %v7013_v58 = vpop.permute.xlu0 %3152 }
 0x238   : > { %9393 = vst [vmem:[#allocation79_spill] sm:$0xff] %v7013_v58 }
 0x239   : > { %v1526_v29 = vpop.permute.xlu1 %1525 }
 0x23b   : > { %v1524_v17 = vpop.permute.xlu0 %1523 }
 0x23c   : > { %v1575_v33 = vsel %vm1565_vm3, %v1524_v17, 0.0  ;;  %v1569_v17 = vsel %vm1565_vm3, %v1520_v4, 0.0 }
 0x23d   : > { %v7016_v27 = vpop.permute.xlu1 %3168  ;;  %1576 = vadd.xlane.f32.xlu1 %v1575_v33 }
 0x23e   : > { %9394 = vst [vmem:[#allocation80_spill] sm:$0xff] %v7016_v27 }
 0x23f   : > { %v7018_v40 = vpop.permute.xlu0 %3063 }
 0x240   : > { %9395 = vst [vmem:[#allocation81_spill] sm:$0xff] %v7018_v40 }
 0x241   : > { %v1530_v46 = vpop.permute.xlu1 %1529 }
 0x242   : > { %v1584_v4 = vsel %vm1565_vm3, %v1530_v46, 0.0 }
 0x244   : > { %v7020_v62 = vpop.permute.xlu0 %3164 }
 0x245   : > { %9396 = vst [vmem:[#allocation82_spill] sm:$0xff] %v7020_v62  ;;  %v7022_v56 = vpop.permute.xlu1 %3176  ;;  %v1572_v62 = vsel %vm1565_vm3, %v1522_v31, 0.0 }
 0x246   : > { %9397 = vst [vmem:[#allocation83_spill] sm:$0xff] %v7022_v56 }
 0x249   : > { %v1534_v14 = vpop.permute.xlu1 %1533  ;;  %v7024_v8 = vpop.permute.xlu0 %3059 }
 0x24a   : > { %9398 = vst [vmem:[#allocation84_spill] sm:$0xff] %v7024_v8  ;;  %v1578_v8 = vsel %vm1565_vm3, %v1526_v29, 0.0 }
 0x24d   : > { %v7026_v42 = vpop.permute.xlu1 %3083  ;;  %v1528_v58 = vpop.permute.xlu0 %1527 }
 0x24e   : > { %9399 = vst [vmem:[#allocation85_spill] sm:$0xff] %v7026_v42  ;;  %v1581_v6 = vsel %vm1565_vm3, %v1528_v58, 0.0 }
 0x24f   : > { %1582 = vadd.xlane.f32.xlu1 %v1581_v6 }
 0x250   : > { %1570 = vadd.xlane.f32.xlu0 %v1569_v17 }
 0x251   : > { %v7030_v33 = vpop.permute.xlu0 %3071 }
 0x252   : > { %9400 = vst [vmem:[#allocation86_spill] sm:$0xff] %v7030_v33  ;;  %v7032_v40 = vpop.permute.xlu1 %3184 }
 0x253   : > { %9401 = vst [vmem:[#allocation87_spill] sm:$0xff] %v7032_v40  ;;  %v1590_v40 = vsel %vm1565_vm3, %v1534_v14, 0.0 }
 0x254   : > { %1573 = vadd.xlane.f32.xlu0 %v1572_v62 }
 0x256   : > { %v1538_v56 = vpop.permute.xlu1 %1537  ;;  %v7035_v27 = vpop.permute.xlu0 %3172 }
 0x257   : > { %9402 = vst [vmem:[#allocation88_spill] sm:$0xff] %v7035_v27  ;;  %v1596_v29 = vsel %vm1565_vm3, %v1538_v56, 0.0 }
 0x258   : > { %1579 = vadd.xlane.f32.xlu0 %v1578_v8 }
 0x25a   : > { %v7038_v42 = vpop.permute.xlu1 %3192 }
 0x25b   : > { %9403 = vst [vmem:[#allocation89_spill] sm:$0xff] %v7038_v42  ;;  %v7040_v58 = vpop.permute.xlu0 %3067 }
 0x25c   : > { %9404 = vst [vmem:[#allocation90_spill] sm:$0xff] %v7040_v58  ;;  %1585 = vadd.xlane.f32.xlu0 %v1584_v4 }
 0x25e   : > { %v1542_v6 = vpop.permute.xlu1 %1541 }
 0x25f   : > { %v1532_v17 = vpop.permute.xlu0 %1531  ;;  %v1602_v8 = vsel %vm1565_vm3, %v1542_v6, 0.0 }
 0x260   : > { %1591 = vadd.xlane.f32.xlu0 %v1590_v40  ;;  %v1587_v31 = vsel %vm1565_vm3, %v1532_v17, 0.0 }
 0x261   : > { %1588 = vadd.xlane.f32.xlu1 %v1587_v31 }
 0x262   : > { %v7045_v62 = vpop.permute.xlu1 %3200 }
 0x263   : > { %9405 = vst [vmem:[#allocation91_spill] sm:$0xff] %v7045_v62  ;;  %v7047_v27 = vpop.permute.xlu0 %3079  ;;  %v7063_v62 = vld [vmem:[%s6112_s23 + $0x48] sm:$0xff] }
 0x264   : > { %9406 = vst [vmem:[#allocation92_spill] sm:$0xff] %v7047_v27  ;;  %1597 = vadd.xlane.f32.xlu0 %v1596_v29  ;;  %9411 = vst [vmem:[#allocation97_spill] sm:$0xff] %v7063_v62 }
 0x266   : > { %v1546_v46 = vpop.permute.xlu1 %1545 }
 0x267   : > { %v1608_v14 = vsel %vm1565_vm3, %v1546_v46, 0.0 }
 0x268   : > { %1603 = vadd.xlane.f32.xlu0 %v1602_v8  ;;  %v7051_v4 = vpop.permute.xlu0 %3180 }
 0x269   : > { %9407 = vst [vmem:[#allocation93_spill] sm:$0xff] %v7051_v4 }
 0x26a   : > { %v7092_v27 = vpop.permute.xlu1 %3208 }
 0x26b   : > { %9421 = vst [vmem:[#allocation107_spill] sm:$0xff] %v7092_v27 }
 0x26c   : > { %1609 = vadd.xlane.f32.xlu0 %v1608_v14  ;;  %v7069_v14 = vld [vmem:[%s6112_s23 + $0x58] sm:$0xff] }
 0x26d   : > { %v7054_v40 = vpop.permute.xlu0 %3075  ;;  %9413 = vst [vmem:[#allocation99_spill] sm:$0xff] %v7069_v14 }
 0x26e   : > { %9408 = vst [vmem:[#allocation94_spill] sm:$0xff] %v7054_v40 }
 0x271   : > { %v1536_v17 = vpop.permute.xlu0 %1535 }
 0x272   : > { %v1593_v31 = vsel %vm1565_vm3, %v1536_v17, 0.0 }
 0x273   : > { %1594 = vadd.xlane.f32.xlu1 %v1593_v31  ;;  %v7075_v31 = vld [vmem:[%s6112_s23 + $0x68] sm:$0xff] }
 0x274   : > { %9415 = vst [vmem:[#allocation101_spill] sm:$0xff] %v7075_v31 }
 0x275   : > { %v7057_v56 = vpop.permute.xlu0 %3087 }
 0x276   : > { %9409 = vst [vmem:[#allocation95_spill] sm:$0xff] %v7057_v56 }
 0x27a   : > { %v7059_v29 = vpop.permute.xlu0 %3188 }
 0x27b   : > { %9410 = vst [vmem:[#allocation96_spill] sm:$0xff] %v7059_v29  ;;  %v7079_v29 = vld [vmem:[%s6112_s23 + $0x78] sm:$0xff] }
 0x27c   : > { %9416 = vst [vmem:[#allocation102_spill] sm:$0xff] %v7079_v29 }
 0x27e   : > { %v1540_v6 = vpop.permute.xlu0 %1539 }
 0x27f   : > { %v1599_v8 = vsel %vm1565_vm3, %v1540_v6, 0.0 }
 0x280   : > { %1600 = vadd.xlane.f32.xlu1 %v1599_v8 }
 0x282   : > { %1683 = vperm.xlu0 %5798, %v7063_v62   ;;  %v7066_v46 = vpop.permute.xlu0 %3095 }
 0x283   : > { %9412 = vst [vmem:[#allocation98_spill] sm:$0xff] %v7066_v46 }
 0x286   : > { %1689 = vperm.xlu0 %5798, %v7069_v14  }
 0x287   : > { %v7072_v17 = vpop.permute.xlu0 %3196 }
 0x288   : > { %9414 = vst [vmem:[#allocation100_spill] sm:$0xff] %v7072_v17 }
 0x28a   : > { %1695 = vperm.xlu0 %5798, %v7075_v31  }
 0x28c   : > { %v7081_v6 = vpop.permute.xlu0 %3091 }
 0x28d   : > { %9417 = vst [vmem:[#allocation103_spill] sm:$0xff] %v7081_v6 }
 0x28e   : > { %1701 = vperm.xlu0 %5798, %v7079_v29   ;;  %v9441_v29 = vmov 1.0|1.0  }
 0x290   : > { %v1544_v8 = vpop.permute.xlu0 %1543 }
 0x291   : > { %v1605_v56 = vsel %vm1565_vm3, %v1544_v8, 0.0 }
 0x292   : > { %1606 = vadd.xlane.f32.xlu1 %v1605_v56 }
 0x294   : > { %v7085_v46 = vpop.permute.xlu0 %3103 }
 0x295   : > { %9418 = vst [vmem:[#allocation104_spill] sm:$0xff] %v7085_v46 }
 0x299   : > { %v7087_v42 = vpop.permute.xlu0 %3204 }
 0x29a   : > { %9419 = vst [vmem:[#allocation105_spill] sm:$0xff] %v7087_v42 }
 0x29e   : > { %v7089_v40 = vpop.permute.xlu0 %3099 }
 0x29f   : > { %9420 = vst [vmem:[#allocation106_spill] sm:$0xff] %v7089_v40 }
 0x2a2   : > { %v1548_v17 = vpop.permute.xlu0 %1547 }
 0x2a3   : > { %v1611_v4 = vsel %vm1565_vm3, %v1548_v17, 0.0  ;;  %vm9169_vm3 = vcmp.eq.s32.totalorder %v6974_v21, %v6529_v30 }
 0x2a4   : > { %1612 = vadd.xlane.f32.xlu1 %v1611_v4 }
 0x2a6   : > { %v7100_v56 = vpop.permute.xlu0 %3111 }
 0x2a7   : > { %9422 = vst [vmem:[#allocation108_spill] sm:$0xff] %v7100_v56 }
 0x2ab   : > { %v7102_v8 = vpop.permute.xlu0 %3212 }
 0x2ac   : > { %v1568_v33 = vpop.xlane.xlu1 %1567  ;;  %9423 = vst [vmem:[#allocation109_spill] sm:$0xff] %v7102_v8 }
 0x2ad   : > { %v7096_v6 = vadd.f32 %v6382_v15, %v1568_v33 }
 0x2b0   : > { %v7104_v40 = vpop.permute.xlu0 %3107 }
 0x2b1   : > { %9424 = vst [vmem:[#allocation110_spill] sm:$0xff] %v7104_v40 }
 0x2b5   : > { %3253 = vperm.xlu1 %5799, %v6680_v37  }
 0x2b9   : > { %5800 = vset.pattern.permute.xlu1 %v9392_v3 }
 0x2ba   : > { %1803 = vperm.xlu1 %5800, %v7096_v6  }
 0x2ca   : > { %v1577_v42 = vpop.xlane.xlu1 %1576 }
 0x2cb   : > { %v7111_v33 = vadd.f32 %v6382_v15, %v1577_v42 }
 0x2cd   : > { %9425 = vst [vmem:[#allocation111_spill] sm:$0xff] %v7111_v33 }
 0x2dc   : > { %v1583_v58 = vpop.xlane.xlu1 %1582 }
 0x2dd   : > { %v1571_v17 = vpop.xlane.xlu0 %1570  ;;  %v7121_v8 = vadd.f32 %v6382_v15, %v1583_v58 }
 0x2de   : > { %v7107_v4 = vadd.f32 %v6382_v15, %v1571_v17  ;;  %v2910_v17 = vadd.f32 %v6753_v5, %v6810_v55 }
 0x2df   : > { %9427 = vst [vmem:[#allocation113_spill] sm:$0xff] %v7121_v8 }
 0x2e0   : > { %1808 = vperm.xlu0 %5798, %v7107_v4  }
 0x2e1   : > { %v1574_v27 = vpop.xlane.xlu0 %1573 }
 0x2e2   : > { %v7114_v46 = vadd.f32 %v6382_v15, %v1574_v27  ;;  %v2911_v27 = vadd.f32 %v6759_v11, %v2910_v17 }
 0x2e4   : > { %9426 = vst [vmem:[#allocation112_spill] sm:$0xff] %v7114_v46  ;;  %1818 = vperm.xlu0 %5798, %v7111_v33   ;;  %1813 = vperm.xlu1 %5800, %v7114_v46   ;;  %v2912_v20 = vadd.f32 %v6770_v32, %v2911_v27 }
 0x2e5   : > { %v1580_v40 = vpop.xlane.xlu0 %1579 }
 0x2e6   : > { %v7124_v56 = vadd.f32 %v6382_v15, %v1580_v40 }
 0x2e8   : > { %9428 = vst [vmem:[#allocation114_spill] sm:$0xff] %v7124_v56  ;;  %1828 = vperm.xlu0 %5798, %v7121_v8   ;;  %1823 = vperm.xlu1 %5800, %v7124_v56  }
 0x2e9   : > { %v1586_v42 = vpop.xlane.xlu0 %1585 }
 0x2ea   : > { %v7130_v61 = vadd.f32 %v6382_v15, %v1586_v42  ;;  %v2913_v42 = vadd.f32 %v6776_v39, %v2912_v20 }
 0x2ec   : > { %9429 = vst [vmem:[#allocation115_spill] sm:$0xff] %v7130_v61  ;;  %1833 = vperm.xlu1 %5800, %v7130_v61   ;;  %v2914_v28 = vadd.f32 %v6784_v26, %v2913_v42 }
 0x2ed   : > { %v1592_v38 = vpop.xlane.xlu0 %1591 }
 0x2ee   : > { %v7135_v58 = vadd.f32 %v6382_v15, %v1592_v38  ;;  %v1589_v40 = vpop.xlane.xlu1 %1588 }
 0x2ef   : > { %v7138_v47 = vadd.f32 %v6382_v15, %v1589_v40  ;;  %v2915_v40 = vadd.f32 %v6790_v43, %v2914_v28 }
 0x2f0   : > { %9430 = vst [vmem:[#allocation116_spill] sm:$0xff] %v7135_v58  ;;  %1843 = vperm.xlu1 %5800, %v7135_v58   ;;  %v9446_v58 = vand.u32 4294901760, %v6822_v50 }
 0x2f1   : > { %9431 = vst [vmem:[#allocation117_spill] sm:$0xff] %v7138_v47  ;;  %1838 = vperm.xlu0 %5798, %v7138_v47   ;;  %v1598_v17 = vpop.xlane.xlu0 %1597  ;;  %v2916_v20 = vadd.f32 %v6796_v52, %v2915_v40 }
 0x2f2   : > { %v7144_v48 = vadd.f32 %v6382_v15, %v1598_v17 }
 0x2f4   : > { %9432 = vst [vmem:[#allocation118_spill] sm:$0xff] %v7144_v48  ;;  %1853 = vperm.xlu1 %5800, %v7144_v48  }
 0x2f5   : > { %v1604_v27 = vpop.xlane.xlu0 %1603 }
 0x2f6   : > { %v7148_v38 = vadd.f32 %v6382_v15, %v1604_v27  ;;  %v9435_v27 = vmov 0.0  }
 0x2f7   : > { %v7164_v42 = vsel %vm9169_vm3, 1.0, %v9435_v27  ;;  %v7202_v31 = vsel %vm9182_vm2, 1.0, %v9435_v27 }
 0x2f8   : > { %9433 = vst [vmem:[#allocation119_spill] sm:$0xff] %v7148_v38  ;;  %1863 = vperm.xlu1 %5800, %v7148_v38   ;;  %9436 = vst [vmem:[#allocation120_spill] sm:$0xff] %v7164_v42  ;;  %v2917_v24 = vadd.f32 %v7164_v42, %v2916_v20  ;;  %v9445_v38 = vand.u32 4294901760, %v6818_v41 }
 0x2f9   : > { %v7154_v45 = vpop.xlane.xlu0 %1609 }
 0x2fa   : > { %v2275_v48 = vsub.f32 %v6818_v41, %v9445_v38 }
 0x2fc   : > { %5802 = vset.pattern.permute.xlu1 %v9434_v44 }
 0x2fd   : > { %3261 = vperm.xlu1 %5802, %v6692_v57  }
 0x300   : > { %v1595_v17 = vpop.xlane.xlu1 %1594 }
 0x301   : > { %v7167_v28 = vadd.f32 %v6382_v15, %v1595_v17  ;;  %3265 = vperm.xlu1 %5802, %v6761_v25   ;;  %v7170_v0 = vpop.permute.xlu0 %1683  ;;  %v9438_v17 = vmov 0 }
 0x302   : > { %vm9183_vm1 = vcmp.eq.s32.totalorder %v7170_v0, %v6529_v30 }
 0x303   : > { %9437 = vst [vmem:[#allocation121_spill] sm:$0xff] %v7167_v28  ;;  %v7181_v40 = vsel %vm9183_vm1, 1.0, %v9435_v27  ;;  %vm7189_vm10 = vmpackc.low %vm9183_vm1, %vm9169_vm3  ;;  %1848 = vperm.xlu0 %5798, %v7167_v28   ;;  %vm9189_vm3 = vcmp.eq.s32.totalorder %v6986_v63, %v6529_v30  ;;  %v2282_v28 = vsub.f32 %v6822_v50, %v9446_v58  ;;  %v9448_v58 = vmov 0 }
 0x304   : > { %v9439_v17 = vsel %vm7189_vm10, 4294967295, %v9438_v17  ;;  %v2918_v20 = vadd.f32 %v7181_v40, %v2917_v24  ;;  %5398 = vmatprep.subr.msk.bf16.mxu1 %vm7189_vm10, %v9441_v29  ;;  %v7245_v61 = vsel %vm9189_vm3, 1.0, %v9435_v27 }
 0x305   : > { %9440 = vst [vmem:[#allocation122_spill] sm:$0xff] %v9439_v17  ;;  %3273 = vperm.xlu1 %5802, %v6912_v1   ;;  %5400 = vmatpush3.bf16.msk.msra.mxu1 %vm7189_vm10, %v9441_v29  ;;  %v7208_v14 = vpop.permute.xlu0 %1689  ;;  %v9442_v17 = vmov 0 }
 0x306   : > { %v2919_v24 = vadd.f32 %v7202_v31, %v2918_v20  ;;  %vm9181_vm14 = vcmp.eq.s32.totalorder %v7208_v14, %v6529_v30 }
 0x307   : > { %v7219_v62 = vsel %vm9181_vm14, 1.0, %v9435_v27  ;;  %vm7227_vm12 = vmpackc.low %vm9181_vm14, %vm9182_vm2  ;;  %vm1717_vm14 = vcmp.eq.s32.totalorder %v6992_v54, %v6529_v30 }
 0x308   : > { %v9443_v17 = vsel %vm7227_vm12, 4294967295, %v9442_v17  ;;  %v2920_v20 = vadd.f32 %v7219_v62, %v2919_v24  ;;  %5402 = vmatprep.subr.msk.bf16.mxu1 %vm7227_vm12, %v9441_v29  ;;  %v7282_v47 = vsel %vm1717_vm14, 1.0, %v9435_v27 }
 0x309   : > { %9444 = vst [vmem:[#allocation123_spill] sm:$0xff] %v9443_v17  ;;  %3281 = vperm.xlu1 %5802, %v6938_v18   ;;  %5404 = vmatpush3.bf16.msk.msra.mxu1 %vm7227_vm12, %v9441_v29  ;;  %v7251_v24 = vpop.permute.xlu0 %1695  ;;  %v2283_v17 = vand.u32 4294901760, %v2282_v28  ;;  %9451 = vst [vmem:[#allocation126_spill] sm:$0xff] %v7282_v47 }
 0x30a   : > { %v2921_v41 = vadd.f32 %v7245_v61, %v2920_v20  ;;  %vm9190_vm2 = vcmp.eq.s32.totalorder %v7251_v24, %v6529_v30  ;;  %v2276_v20 = vand.u32 4294901760, %v2275_v48 }
 0x30b   : > { %v7262_v50 = vsel %vm9190_vm2, 1.0, %v9435_v27  ;;  %vm7270_vm1 = vmpackc.low %vm9190_vm2, %vm9189_vm3 }
 0x30c   : > { %9447 = vst [vmem:[#allocation124_spill] sm:$0xff] %v7262_v50  ;;  %v9449_v58 = vsel %vm7270_vm1, 4294967295, %v9448_v58  ;;  %v2922_v38 = vadd.f32 %v7262_v50, %v2921_v41  ;;  %5406 = vmatprep.subr.msk.bf16.mxu1 %vm7270_vm1, %v9441_v29 }
 0x30d   : > { %9450 = vst [vmem:[#allocation125_spill] sm:$0xff] %v9449_v58  ;;  %v1601_v56 = vpop.xlane.xlu1 %1600  ;;  %3289 = vperm.xlu1 %5802, %v6955_v2   ;;  %5408 = vmatpush3.bf16.msk.msra.mxu1 %vm7270_vm1, %v9441_v29  ;;  %v7288_v41 = vpop.permute.xlu0 %1701 }
 0x30e   : > { %v7291_v8 = vadd.f32 %v6382_v15, %v1601_v56  ;;  %v2923_v48 = vadd.f32 %v7282_v47, %v2922_v38  ;;  %vm1718_vm3 = vcmp.eq.s32.totalorder %v7288_v41, %v6529_v30  ;;  %v9453_v56 = vmov 0  ;;  %v9475_v41 = vld [vmem:[#allocation30_spill] sm:$0xff] }
 0x30f   : > { %v7300_v28 = vsel %vm1718_vm3, 1.0, %v9435_v27  ;;  %vm7308_vm2 = vmpackc.low %vm1718_vm3, %vm1717_vm14  ;;  %v7317_v27 = vpack.c.bf16 %v2283_v17, %v2276_v20  ;;  %v2909_v20 = vld [vmem:[#allocation5] sm:$0x1] }
 0x310   : > { %9452 = vst [vmem:[#allocation127_spill] sm:$0xff] %v7291_v8  ;;  %v9454_v56 = vsel %vm7308_vm2, 4294967295, %v9453_v56  ;;  %v2924_v38 = vadd.f32 %v7300_v28, %v2923_v48  ;;  %1858 = vperm.xlu0 %5798, %v7291_v8   ;;  %5410 = vmatprep.subr.msk.bf16.mxu1 %vm7308_vm2, %v9441_v29  ;;  %v7327_v8 = vadd.f32 %v6382_v15, %v7154_v45 }
 0x311   : > { %9455 = vst [vmem:[#allocation128_spill] sm:$0xff] %v9454_v56  ;;  %9456 = vst [vmem:[#allocation129_spill] sm:$0xff] %v7317_v27  ;;  %3297 = vperm.xlu1 %5802, %v6965_v19   ;;  %5412 = vmatpush3.bf16.msk.msra.mxu1 %vm7308_vm2, %v9441_v29 }
 0x312   : > { %v2925_v58 = vrot.slane %v2924_v38, 4  ;;  %5414 = vmatprep.subr.bf16.mxu1 %v7317_v27  ;;  %9457 = vst [vmem:[#allocation130_spill] sm:$0xff] %v7327_v8 }
 0x314   : > { %v2926_v46 = vadd.f32 %v2925_v58, %v2924_v38 }
 0x315   : > { %3305 = vperm.xlu1 %5802, %v6978_v7  }
 0x316   : > { %v2927_v48 = vrot.slane %v2926_v46, 2 }
 0x318   : > { %v2928_v33 = vadd.f32 %v2927_v48, %v2926_v46 }
 0x319   : > { %5804 = vset.pattern.permute.xlu1 %v9392_v3 }
 0x31a   : > { %v2929_v17 = vrot.slane %v2928_v33, 1  ;;  %1873 = vperm.xlu1 %5804, %v7327_v8  }
 0x31c   : > { %v2930_v56 = vadd.f32 %v2929_v17, %v2928_v33 }
 0x31e   : > { %v2931_v29 = vadd.f32 %v2930_v56, %v2909_v20  ;;  %5805 = vset.pattern.permute.xlu1 %v9434_v44 }
 0x31f   : > { %v1607_v27 = vpop.xlane.xlu1 %1606 }
 0x320   : > { %2932 = vst [vmem:[#allocation5] sm:$0x1] %v2931_v29  ;;  %v7333_v58 = vadd.f32 %v6382_v15, %v1607_v27 }
 0x322   : > { %1868 = vperm.xlu0 %5798, %v7333_v58  }
 0x331   : > { %v1613_v45 = vpop.xlane.xlu1 %1612 }
 0x332   : > { %v7337_v46 = vadd.f32 %v6382_v15, %v1613_v45 }
 0x334   : > { %1878 = vperm.xlu0 %5798, %v7337_v46  }
 0x335   : > { %v7350_v15 = vpop.permute.xlu1 %3253 }
 0x336   : > { %9458 = vst [vmem:[#allocation131_spill] sm:$0xff] %v7350_v15 }
 0x338   : > { %5801 = vset.pattern.permute.xlu0 %v9434_v44 }
 0x339   : > { %3257 = vperm.xlu0 %5801, %v6656_v10   ;;  %v1804_v44 = vpop.permute.xlu1 %1803 }
 0x33d   : > { %3269 = vperm.xlu0 %5801, %v6732_v60  }
 0x341   : > { %3277 = vperm.xlu0 %5801, %v6853_v16  }
 0x345   : > { %3285 = vperm.xlu0 %5801, %v6906_v49  }
 0x349   : > { %3293 = vperm.xlu0 %5801, %v6923_v13  }
 0x34d   : > { %3301 = vperm.xlu0 %5801, %v6934_v53  }
 0x351   : > { %3309 = vperm.xlu0 %5801, %v6945_v9  }
 0x355   : > { %5803 = vset.pattern.permute.xlu0 %v9392_v3 }
 0x356   : > { %2935 = vperm.xlu0 %5803, %v6680_v37  }
 0x35a   : > { %2940 = vperm.xlu0 %5803, %v6656_v10  }
 0x35e   : > { %2945 = vperm.xlu0 %5803, %v6692_v57  }
 0x35f   : > { %v1809_v45 = vpop.permute.xlu0 %1808 }
 0x362   : > { %2950 = vperm.xlu0 %5803, %v6761_v25  }
 0x363   : > { %v1814_v29 = vpop.permute.xlu1 %1813  ;;  %v1819_v25 = vpop.permute.xlu0 %1818 }
 0x366   : > { %2955 = vperm.xlu0 %5803, %v6732_v60  }
 0x367   : > { %v1824_v33 = vpop.permute.xlu1 %1823  ;;  %v1829_v57 = vpop.permute.xlu0 %1828 }
 0x36a   : > { %2960 = vperm.xlu0 %5803, %v6912_v1  }
 0x36b   : > { %v1834_v56 = vpop.permute.xlu1 %1833 }
 0x36e   : > { %2965 = vperm.xlu0 %5803, %v6853_v16  }
 0x36f   : > { %v1844_v38 = vpop.permute.xlu1 %1843 }
 0x370   : > { %v1839_v37 = vpop.permute.xlu0 %1838 }
 0x371   : > { %v1888_v34 = vsel %vm1710_vm6, %v1839_v37, -1e+30  ;;  %vm9471_vm6 = vcmp.eq.s32.totalorder %v6981_v51, %v6529_v30 }
 0x372   : > { %2970 = vperm.xlu0 %5803, %v6938_v18  }
 0x373   : > { %v1854_v27 = vpop.permute.xlu1 %1853 }
 0x374   : > { %v1891_v59 = vsel %vm9471_vm6, %v1854_v27, -1e+30 }
 0x377   : > { %v1864_v48 = vpop.permute.xlu1 %1863 }
 0x37c   : > { %v7359_v17 = vpop.permute.xlu1 %3261 }
 0x37d   : > { %9459 = vst [vmem:[#allocation132_spill] sm:$0xff] %v7359_v17  ;;  %v1886_v17 = vsel %vm1708_vm9, %v1829_v57, -1e+30  ;;  %vm9465_vm9 = vcmp.eq.s32.totalorder %v7170_v0, %v6529_v30  ;;  %v9466_v57 = vld [vmem:[#allocation23_spill] sm:$0xff] }
 0x380   : > { %v7361_v20 = vpop.permute.xlu1 %3265 }
 0x381   : > { %9460 = vst [vmem:[#allocation133_spill] sm:$0xff] %v7361_v20  ;;  %v1882_v20 = vsel %vm1704_vm13, %v1809_v45, -1e+30  ;;  %vm9467_vm13 = vcmp.eq.s32.totalorder %v9466_v57, %v6529_v30 }
 0x382   : > { %v1849_v18 = vpop.permute.xlu0 %1848  ;;  %v1883_v12 = vsel %vm9467_vm13, %v1814_v29, -1e+30  ;;  %vm9474_vm13 = vcmp.eq.s32.totalorder %v6986_v63, %v6529_v30 }
 0x383   : > { %v1890_v35 = vsel %vm9465_vm9, %v1849_v18, -1e+30  ;;  %vm9473_vm9 = vcmp.eq.s32.totalorder %v7251_v24, %v6529_v30 }
 0x384   : > { %v7363_v15 = vpop.permute.xlu1 %3273 }
 0x385   : > { %9461 = vst [vmem:[#allocation134_spill] sm:$0xff] %v7363_v15  ;;  %v1881_v15 = vsel %vm1703_vm15, %v1804_v44, -1e+30  ;;  %v9468_v44 = vld [vmem:[#allocation24_spill] sm:$0xff]  ;;  %vm9472_vm15 = vcmp.eq.s32.totalorder %v7208_v14, %v6529_v30 }
 0x388   : > { %v7365_v60 = vpop.permute.xlu1 %3281 }
 0x38c   : > { %v7367_v1 = vpop.permute.xlu1 %3289 }
 0x38d   : > { %9462 = vst [vmem:[#allocation135_spill] sm:$0xff] %v7367_v1 }
 0x38f   : > { %v1859_v10 = vpop.permute.xlu0 %1858 }
 0x390   : > { %v7369_v16 = vpop.permute.xlu1 %3297  ;;  %v1892_v37 = vsel %vm9472_vm15, %v1859_v10, -1e+30 }
 0x391   : > { %9463 = vst [vmem:[#allocation136_spill] sm:$0xff] %v7369_v16  ;;  %v1885_v16 = vsel %vm1707_vm8, %v1824_v33, -1e+30  ;;  %vm9469_vm8 = vcmp.eq.s32.totalorder %v9468_v44, %v6529_v30  ;;  %v1898_v33 = vmax.f32 %v1882_v20, %v1886_v17 }
 0x392   : > { %v1884_v23 = vsel %vm9469_vm8, %v1819_v25, -1e+30  ;;  %v1897_v18 = vmax.f32 %v1881_v15, %v1885_v16 }
 0x393   : > { %v1900_v29 = vmax.f32 %v1884_v23, %v1888_v34  ;;  %v1902_v17 = vmax.f32 %v1898_v33, %v1890_v35 }
 0x394   : > { %v7371_v8 = vpop.permute.xlu1 %3305 }
 0x395   : > { %9464 = vst [vmem:[#allocation137_spill] sm:$0xff] %v7371_v8  ;;  %v1887_v8 = vsel %vm1709_vm5, %v1834_v56, -1e+30  ;;  %vm9470_vm5 = vcmp.eq.s32.totalorder %v6974_v21, %v6529_v30  ;;  %v1893_v21 = vsel %vm9474_vm13, %v1864_v48, -1e+30  ;;  %v1904_v14 = vmax.f32 %v1900_v29, %v1892_v37 }
 0x396   : > { %v1889_v36 = vsel %vm9470_vm5, %v1844_v38, -1e+30  ;;  %v1899_v25 = vmax.f32 %v1883_v12, %v1887_v8  ;;  %v7421_v12 = vld [vmem:[#allocation2] sm:$0x1] }
 0x397   : > { %v1901_v38 = vmax.f32 %v1897_v18, %v1889_v36 }
 0x398   : > { %v1903_v27 = vmax.f32 %v1899_v25, %v1891_v59 }
 0x399   : > { %v1874_v56 = vpop.permute.xlu1 %1873 }
 0x39a   : > { %v1895_v51 = vsel %vm1717_vm14, %v1874_v56, -1e+30 }
 0x39b   : > { %v1907_v8 = vmax.f32 %v1903_v27, %v1895_v51 }
 0x3a1   : > { %v1869_v1 = vpop.permute.xlu0 %1868 }
 0x3a2   : > { %v1894_v0 = vsel %vm9473_vm9, %v1869_v1, -1e+30  ;;  %v1905_v1 = vmax.f32 %v1901_v38, %v1893_v21 }
 0x3a3   : > { %v1906_v10 = vmax.f32 %v1902_v17, %v1894_v0 }
 0x3a5   : > { %v1909_v15 = vmax.f32 %v1905_v1, %v1906_v10  ;;  %v9476_v1 = vld [vmem:[#allocation25_spill] sm:$0xff] }
 0x3b3   : > { %v1879_v20 = vpop.permute.xlu0 %1878 }
 0x3b4   : > { %v1896_v16 = vsel %vm1718_vm3, %v1879_v20, -1e+30 }
 0x3b5   : > { %v1908_v24 = vmax.f32 %v1904_v14, %v1896_v16  ;;  %v5869_v16 = vld [vmem:[%s6112_s23] sm:$0xff] }
 0x3b6   : > { %vm1751_vm14 = vcmp.ge.s32.totalorder %v5869_v16, %v9476_v1 }
 0x3b7   : > { %v1910_v45 = vmax.f32 %v1907_v8, %v1908_v24  ;;  %v5870_v8 = vld [vmem:[%s6112_s23 + $0x8] sm:$0xff]  ;;  %v9477_v24 = vld [vmem:[#allocation20_spill] sm:$0xff] }
 0x3b8   : > { %vm1752_vm3 = vcmp.ge.s32.totalorder %v5870_v8, %v9476_v1  ;;  %v7533_v16 = vpop.permute.xlu0 %3257  ;;  %v9515_v8 = vld [vmem:[#allocation19_spill] sm:$0xff] }
 0x3b9   : > { %v1911_v63 = vmax.f32 %v1909_v15, %v1910_v45  ;;  %v9478_v15 = vld [vmem:[#allocation11_spill] sm:$0xff]  ;;  %9514 = vst [vmem:[#allocation23_spill] sm:$0xff] %v7533_v16  ;;  %v9544_v16 = vld [vmem:[#allocation114_spill] sm:$0xff] }
 0x3ba   : > { %vm9479_vm8 = vcmp.lt.s32.totalorder %v9477_v24, %v9478_v15 }
 0x3bb   : > { %v1912_v48 = vrot.slane %v1911_v63, 4  ;;  %vm7454_vm5 = vmand %vm1751_vm14, %vm9479_vm8 }
 0x3bd   : > { %v1913_v34 = vmax.f32 %v1911_v63, %v1912_v48  ;;  %v5871_v63 = vld [vmem:[%s6112_s23 + $0x10] sm:$0xff]  ;;  %v9482_v48 = vld [vmem:[#allocation10_spill] sm:$0xff] }
 0x3be   : > { %vm1753_vm6 = vcmp.ge.s32.totalorder %v5871_v63, %v9476_v1  ;;  %vm9483_vm15 = vcmp.lt.s32.totalorder %v9482_v48, %v9478_v15  ;;  %v9519_v63 = vld [vmem:[#allocation21_spill] sm:$0xff]  ;;  %v5989_v48 = vmov 4  }
 0x3bf   : > { %v1914_v35 = vrot.slane %v1913_v34, 2  ;;  %vm7463_vm9 = vmand %vm1752_vm3, %vm9483_vm15 }
 0x3c1   : > { %v1915_v54 = vmax.f32 %v1913_v34, %v1914_v35  ;;  %v5872_v35 = vld [vmem:[%s6112_s23 + $0x18] sm:$0xff] }
 0x3c2   : > { %vm1754_vm13 = vcmp.ge.s32.totalorder %v5872_v35, %v9476_v1  ;;  %v5880_v35 = vld [vmem:[%s6112_s23 + $0x70] sm:$0xff] }
 0x3c3   : > { %v1916_v57 = vrot.slane %v1915_v54, 1  ;;  %vm1765_vm0 = vcmp.ge.s32.totalorder %v5880_v35, %v9476_v1 }
 0x3c5   : > { %v1917_v44 = vmax.f32 %v1915_v54, %v1916_v57  ;;  %v9486_v54 = vld [vmem:[#allocation12_spill] sm:$0xff] }
 0x3c6   : > { %vm9487_vm14 = vcmp.lt.s32.totalorder %v9486_v54, %v9478_v15  ;;  %v7555_v54 = vpop.permute.xlu0 %3269 }
 0x3c7   : > { %v7424_v23 = vmax.f32 %v7421_v12, %v1917_v44  ;;  %vm7472_vm8 = vmand %vm1753_vm6, %vm9487_vm14  ;;  %v5873_v44 = vld [vmem:[%s6112_s23 + $0x20] sm:$0xff]  ;;  %9523 = vst [vmem:[#allocation24_spill] sm:$0xff] %v7555_v54 }
 0x3c8   : > { %vm1755_vm2 = vcmp.ge.s32.totalorder %v5873_v44, %v9476_v1  ;;  %v9524_v44 = vld [vmem:[#allocation22_spill] sm:$0xff] }
 0x3c9   : > { %1923 = vst [vmem:[#allocation2] sm:$0x1] %v7424_v23  ;;  %v1928_v33 = vrot.slane %v7424_v23, %v9475_v41 }
 0x3cb   : > { %v1931_v36 = vmul.f32 %v6753_v5, %v1928_v33  ;;  %v1930_v56 = vmul.f32 %v6810_v55, %v1928_v33  ;;  %v1932_v59 = vmul.f32 %v6759_v11, %v1928_v33  ;;  %v1933_v37 = vmul.f32 %v6770_v32, %v1928_v33 }
 0x3cc   : > { %v1934_v0 = vmul.f32 %v6776_v39, %v1928_v33  ;;  %v1935_v18 = vmul.f32 %v6784_v26, %v1928_v33  ;;  %v1936_v25 = vmul.f32 %v6790_v43, %v1928_v33  ;;  %v1937_v29 = vmul.f32 %v6796_v52, %v1928_v33 }
 0x3cd   : > { %1948 = vadd.xlane.f32.xlu0 %v1931_v36  ;;  %1946 = vadd.xlane.f32.xlu1 %v1930_v56  ;;  %v1938_v17 = vmul.f32 %v7164_v42, %v1928_v33  ;;  %v1939_v21 = vmul.f32 %v7181_v40, %v1928_v33  ;;  %v1940_v51 = vmul.f32 %v7202_v31, %v1928_v33  ;;  %v5874_v56 = vld [vmem:[%s6112_s23 + $0x28] sm:$0xff] }
 0x3ce   : > { %v1941_v38 = vmul.f32 %v7219_v62, %v1928_v33  ;;  %v1942_v27 = vmul.f32 %v7245_v61, %v1928_v33  ;;  %v1943_v14 = vmul.f32 %v7262_v50, %v1928_v33  ;;  %v1944_v10 = vmul.f32 %v7282_v47, %v1928_v33 }
 0x3cf   : > { %v1945_v20 = vmul.f32 %v7300_v28, %v1928_v33  ;;  %v9490_v33 = vld [vmem:[#allocation13_spill] sm:$0xff]  ;;  %vm1756_vm1 = vcmp.ge.s32.totalorder %v5874_v56, %v9476_v1  ;;  %v7565_v56 = vpop.permute.xlu0 %3277 }
 0x3d0   : > { %vm9491_vm3 = vcmp.lt.s32.totalorder %v9490_v33, %v9478_v15  ;;  %9528 = vst [vmem:[#allocation25_spill] sm:$0xff] %v7565_v56  ;;  %v9541_v56 = vld [vmem:[#allocation111_spill] sm:$0xff] }
 0x3d1   : > { %1950 = vadd.xlane.f32.xlu0 %v1932_v59  ;;  %1952 = vadd.xlane.f32.xlu1 %v1933_v37  ;;  %vm7481_vm15 = vmand %vm1754_vm13, %vm9491_vm3  ;;  %v9494_v59 = vld [vmem:[#allocation14_spill] sm:$0xff]  ;;  %v9563_v33 = vld [vmem:[#allocation59_spill] sm:$0xff] }
 0x3d2   : > { %vm9495_vm6 = vcmp.lt.s32.totalorder %v9494_v59, %v9478_v15 }
 0x3d3   : > { %vm7490_vm14 = vmand %vm1755_vm2, %vm9495_vm6  ;;  %v7569_v59 = vpop.permute.xlu0 %3285 }
 0x3d4   : > { %9529 = vst [vmem:[#allocation20_spill] sm:$0xff] %v7569_v59 }
 0x3d5   : > { %1954 = vadd.xlane.f32.xlu0 %v1934_v0  ;;  %1956 = vadd.xlane.f32.xlu1 %v1935_v18  ;;  %v5875_v0 = vld [vmem:[%s6112_s23 + $0x30] sm:$0xff] }
 0x3d6   : > { %vm1757_vm12 = vcmp.ge.s32.totalorder %v5875_v0, %v9476_v1  ;;  %v9498_v18 = vld [vmem:[#allocation15_spill] sm:$0xff] }
 0x3d7   : > { %vm9499_vm13 = vcmp.lt.s32.totalorder %v9498_v18, %v9478_v15  ;;  %v7572_v0 = vpop.permute.xlu0 %3293 }
 0x3d8   : > { %vm7499_vm3 = vmand %vm1756_vm1, %vm9499_vm13  ;;  %9530 = vst [vmem:[#allocation11_spill] sm:$0xff] %v7572_v0 }
 0x3d9   : > { %1958 = vadd.xlane.f32.xlu0 %v1936_v25  ;;  %1960 = vadd.xlane.f32.xlu1 %v1937_v29  ;;  %v5876_v29 = vld [vmem:[%s6112_s23 + $0x38] sm:$0xff] }
 0x3da   : > { %vm1758_vm10 = vcmp.ge.s32.totalorder %v5876_v29, %v9476_v1 }
 0x3db   : > { %v7574_v18 = vpop.permute.xlu0 %3301 }
 0x3dc   : > { %9531 = vst [vmem:[#allocation10_spill] sm:$0xff] %v7574_v18 }
 0x3dd   : > { %1962 = vadd.xlane.f32.xlu0 %v1938_v17  ;;  %1964 = vadd.xlane.f32.xlu1 %v1939_v21  ;;  %v9502_v17 = vld [vmem:[#allocation16_spill] sm:$0xff] }
 0x3de   : > { %vm9503_vm2 = vcmp.lt.s32.totalorder %v9502_v17, %v9478_v15 }
 0x3df   : > { %vm7509_vm6 = vmand %vm1757_vm12, %vm9503_vm2  ;;  %v7576_v29 = vpop.permute.xlu0 %3309 }
 0x3e0   : > { %9532 = vst [vmem:[#allocation12_spill] sm:$0xff] %v7576_v29 }
 0x3e1   : > { %1966 = vadd.xlane.f32.xlu0 %v1940_v51  ;;  %1968 = vadd.xlane.f32.xlu1 %v1941_v38  ;;  %v5877_v51 = vld [vmem:[%s6112_s23 + $0x40] sm:$0xff] }
 0x3e2   : > { %vm1759_vm4 = vcmp.ge.s32.totalorder %v5877_v51, %v9476_v1  ;;  %v9506_v38 = vld [vmem:[#allocation17_spill] sm:$0xff] }
 0x3e3   : > { %vm9507_vm1 = vcmp.lt.s32.totalorder %v9506_v38, %v9478_v15  ;;  %v7578_v17 = vpop.permute.xlu0 %2935 }
 0x3e4   : > { %vm7518_vm13 = vmand %vm1758_vm10, %vm9507_vm1  ;;  %vm9516_vm10 = vcmp.lt.s32.totalorder %v9515_v8, %v9478_v15  ;;  %9533 = vst [vmem:[#allocation13_spill] sm:$0xff] %v7578_v17  ;;  %v9542_v17 = vld [vmem:[#allocation112_spill] sm:$0xff] }
 0x3e5   : > { %1970 = vadd.xlane.f32.xlu0 %v1942_v27  ;;  %1972 = vadd.xlane.f32.xlu1 %v1943_v14  ;;  %v9510_v14 = vld [vmem:[#allocation18_spill] sm:$0xff] }
 0x3e6   : > { %vm9511_vm7 = vcmp.lt.s32.totalorder %v9510_v14, %v9478_v15 }
 0x3e7   : > { %vm7526_vm11 = vmand %vm1759_vm4, %vm9511_vm7  ;;  %vm9520_vm7 = vcmp.lt.s32.totalorder %v9519_v63, %v9478_v15  ;;  %v7580_v51 = vpop.permute.xlu0 %2940 }
 0x3e8   : > { %9534 = vst [vmem:[#allocation14_spill] sm:$0xff] %v7580_v51 }
 0x3e9   : > { %1974 = vadd.xlane.f32.xlu0 %v1944_v10  ;;  %1976 = vadd.xlane.f32.xlu1 %v1945_v20  ;;  %v5878_v20 = vld [vmem:[%s6112_s23 + $0x50] sm:$0xff]  ;;  %v9555_v10 = vld [vmem:[#allocation101_spill] sm:$0xff] }
 0x3ea   : > { %vm1761_vm12 = vcmp.ge.s32.totalorder %v5878_v20, %v9476_v1 }
 0x3eb   : > { %vm7538_vm2 = vmand %vm1761_vm12, %vm9516_vm10  ;;  %vm9525_vm12 = vcmp.lt.s32.totalorder %v9524_v44, %v9478_v15  ;;  %v7582_v38 = vpop.permute.xlu0 %2945 }
 0x3ec   : > { %vm7560_vm10 = vmand %vm1765_vm0, %vm9525_vm12  ;;  %9535 = vst [vmem:[#allocation15_spill] sm:$0xff] %v7582_v38 }
 0x3ef   : > { %v7584_v14 = vpop.permute.xlu0 %2950 }
 0x3f0   : > { %9536 = vst [vmem:[#allocation16_spill] sm:$0xff] %v7584_v14 }
 0x3f3   : > { %v7586_v20 = vpop.permute.xlu0 %2955 }
 0x3f4   : > { %9537 = vst [vmem:[#allocation17_spill] sm:$0xff] %v7586_v20 }
 0x3f7   : > { %v7588_v8 = vpop.permute.xlu0 %2960 }
 0x3f8   : > { %9538 = vst [vmem:[#allocation18_spill] sm:$0xff] %v7588_v8  ;;  %v9543_v8 = vld [vmem:[#allocation113_spill] sm:$0xff] }
 0x3fa   : > { %3313 = vperm.xlu1 %5805, %v6996_v22  }
 0x3fe   : > { %5806 = vset.pattern.permute.xlu1 %v9392_v3  ;;  %v5879_v3 = vld [vmem:[%s6112_s23 + $0x60] sm:$0xff] }
 0x3ff   : > { %2975 = vperm.xlu0 %5803, %v6906_v49   ;;  %vm1763_vm4 = vcmp.ge.s32.totalorder %v5879_v3, %v9476_v1  ;;  %v7590_v3 = vpop.permute.xlu0 %2965 }
 0x400   : > { %vm7548_vm1 = vmand %vm1763_vm4, %vm9520_vm7  ;;  %9539 = vst [vmem:[#allocation19_spill] sm:$0xff] %v7590_v3 }
 0x403   : > { %2980 = vperm.xlu0 %5803, %v6955_v2   ;;  %v7592_v63 = vpop.permute.xlu0 %2970 }
 0x404   : > { %9540 = vst [vmem:[#allocation21_spill] sm:$0xff] %v7592_v63 }
 0x407   : > { %2985 = vperm.xlu0 %5803, %v6923_v13  }
 0x40b   : > { %2990 = vperm.xlu0 %5803, %v6965_v19  }
 0x40f   : > { %2995 = vperm.xlu0 %5803, %v6934_v53  }
 0x413   : > { %3000 = vperm.xlu0 %5803, %v6978_v7  }
 0x417   : > { %3005 = vperm.xlu0 %5803, %v6945_v9  }
 0x45a   : > { %v1947_v35 = vpop.xlane.xlu1 %1946  ;;  %v1949_v44 = vpop.xlane.xlu0 %1948 }
 0x45b   : > { %v1978_v30 = vsub.f32 %v7096_v6, %v1947_v35  ;;  %v1979_v41 = vsub.f32 %v7107_v4, %v1949_v44 }
 0x45d   : > { %v1994_v29 = vmul.f32 1.442695, %v1978_v30  ;;  %v1996_v18 = vmul.f32 1.442695, %v1979_v41 }
 0x45e   : > { %v1953_v0 = vpop.xlane.xlu1 %1952  ;;  %v1951_v59 = vpop.xlane.xlu0 %1950 }
 0x45f   : > { %5835 = vpow2.f32 %v1994_v29  ;;  %v1981_v54 = vsub.f32 %v9541_v56, %v1953_v0  ;;  %v1980_v20 = vsub.f32 %v9542_v17, %v1951_v59  ;;  %v9545_v29 = vld [vmem:[#allocation117_spill] sm:$0xff]  ;;  %v9546_v56 = vld [vmem:[#allocation115_spill] sm:$0xff] }
 0x460   : > { %5837 = vpow2.f32 %v1996_v18 }
 0x461   : > { %v2000_v38 = vmul.f32 1.442695, %v1981_v54  ;;  %v1998_v14 = vmul.f32 1.442695, %v1980_v20 }
 0x462   : > { %v1957_v51 = vpop.xlane.xlu1 %1956  ;;  %v1955_v3 = vpop.xlane.xlu0 %1954 }
 0x463   : > { %v1983_v63 = vsub.f32 %v9543_v8, %v1957_v51  ;;  %v1982_v6 = vsub.f32 %v9544_v16, %v1955_v3  ;;  %5839 = vpow2.f32 %v1998_v14  ;;  %v9548_v8 = vld [vmem:[#allocation116_spill] sm:$0xff] }
 0x464   : > { %5841 = vpow2.f32 %v2000_v38  ;;  %v9547_v38 = vld [vmem:[#allocation121_spill] sm:$0xff] }
 0x465   : > { %v2004_v4 = vmul.f32 1.442695, %v1983_v63  ;;  %v2002_v30 = vmul.f32 1.442695, %v1982_v6 }
 0x466   : > { %v1961_v41 = vpop.xlane.xlu1 %1960  ;;  %v1959_v35 = vpop.xlane.xlu0 %1958 }
 0x467   : > { %v1985_v44 = vsub.f32 %v9545_v29, %v1961_v41  ;;  %v1984_v0 = vsub.f32 %v9546_v56, %v1959_v35  ;;  %5843 = vpow2.f32 %v2002_v30  ;;  %v9550_v56 = vld [vmem:[#allocation118_spill] sm:$0xff] }
 0x468   : > { %5845 = vpow2.f32 %v2004_v4 }
 0x469   : > { %v5836_v59 = vpop.eup %5835  ;;  %v2008_v54 = vmul.f32 1.442695, %v1985_v44  ;;  %v2006_v18 = vmul.f32 1.442695, %v1984_v0  ;;  %v9549_v44 = vld [vmem:[#allocation127_spill] sm:$0xff] }
 0x46a   : > { %v5838_v17 = vpop.eup %5837  ;;  %v1965_v20 = vpop.xlane.xlu1 %1964  ;;  %v2026_v16 = vsel %vm7454_vm5, %v5836_v59, 0.0 }
 0x46b   : > { %v1963_v51 = vpop.xlane.xlu0 %1962  ;;  %v1987_v14 = vsub.f32 %v9547_v38, %v1965_v20  ;;  %2044 = vperm.xlu0 %5803, %v2026_v16   ;;  %v2027_v63 = vsel %vm7463_vm9, %v5838_v17, 0.0  ;;  %5847 = vpow2.f32 %v2006_v18 }
 0x46c   : > { %v1986_v3 = vsub.f32 %v9548_v8, %v1963_v51  ;;  %2049 = vperm.xlu1 %5806, %v2027_v63   ;;  %5849 = vpow2.f32 %v2008_v54 }
 0x46d   : > { %v2012_v6 = vmul.f32 1.442695, %v1987_v14  ;;  %v5840_v30 = vpop.eup %5839  ;;  %v9551_v14 = vld [vmem:[#allocation119_spill] sm:$0xff] }
 0x46e   : > { %v2010_v4 = vmul.f32 1.442695, %v1986_v3  ;;  %v1969_v41 = vpop.xlane.xlu1 %1968  ;;  %v5842_v29 = vpop.eup %5841  ;;  %v2028_v59 = vsel %vm7472_vm8, %v5840_v30, 0.0 }
 0x46f   : > { %v1967_v35 = vpop.xlane.xlu0 %1966  ;;  %v1989_v45 = vsub.f32 %v9549_v44, %v1969_v41  ;;  %3010 = vperm.xlu0 %5803, %v6996_v22   ;;  %v2029_v51 = vsel %vm7481_vm15, %v5842_v29, 0.0  ;;  %v9553_v44 = vld [vmem:[#allocation97_spill] sm:$0xff] }
 0x470   : > { %v1988_v0 = vsub.f32 %v9550_v56, %v1967_v35  ;;  %5851 = vpow2.f32 %v2010_v4  ;;  %2054 = vperm.xlu1 %5806, %v2028_v59   ;;  %v9552_v35 = vld [vmem:[#allocation130_spill] sm:$0xff]  ;;  %vm1760_vm0 = vcmp.ge.s32.totalorder %v9553_v44, %v9476_v1  ;;  %vm1778_vm5 = vcmp.lt.s32.totalorder %v9553_v44, %v9478_v15  ;;  %v9554_v59 = vld [vmem:[#allocation99_spill] sm:$0xff] }
 0x471   : > { %5853 = vpow2.f32 %v2012_v6  ;;  %v2016_v34 = vmul.f32 1.442695, %v1989_v45  ;;  %v5844_v18 = vpop.eup %5843  ;;  %vm1794_vm9 = vmand %vm1760_vm0, %vm1778_vm5  ;;  %vm1762_vm8 = vcmp.ge.s32.totalorder %v9554_v59, %v9476_v1  ;;  %vm1780_vm15 = vcmp.lt.s32.totalorder %v9554_v59, %v9478_v15 }
 0x472   : > { %v2014_v54 = vmul.f32 1.442695, %v1988_v0  ;;  %v1973_v17 = vpop.xlane.xlu1 %1972  ;;  %v5846_v16 = vpop.eup %5845  ;;  %v2030_v57 = vsel %vm7490_vm14, %v5844_v18, 0.0  ;;  %vm1796_vm14 = vmand %vm1762_vm8, %vm1780_vm15  ;;  %vm4567_vm15 = vcmask 1040384  }
 0x473   : > { %v1971_v20 = vpop.xlane.xlu0 %1970  ;;  %v1991_v38 = vsub.f32 %v7333_v58, %v1973_v17  ;;  %2059 = vperm.xlu0 %5803, %v2029_v51   ;;  %v2031_v36 = vsel %vm7499_vm3, %v5846_v16, 0.0  ;;  %vm1782_vm3 = vcmp.lt.s32.totalorder %v9555_v10, %v9478_v15 }
 0x474   : > { %v1990_v8 = vsub.f32 %v9551_v14, %v1971_v20  ;;  %5855 = vpow2.f32 %v2014_v54  ;;  %2064 = vperm.xlu1 %5806, %v2030_v57  }
 0x475   : > { %5857 = vpow2.f32 %v2016_v34  ;;  %v2020_v3 = vmul.f32 1.442695, %v1991_v38  ;;  %v5848_v6 = vpop.eup %5847  ;;  %v9556_v38 = vld [vmem:[#allocation102_spill] sm:$0xff] }
 0x476   : > { %v2018_v63 = vmul.f32 1.442695, %v1990_v8  ;;  %v1977_v4 = vpop.xlane.xlu1 %1976  ;;  %v5850_v41 = vpop.eup %5849  ;;  %v2032_v37 = vsel %vm7509_vm6, %v5848_v6, 0.0  ;;  %v9560_v6 = vld [vmem:[#allocation49_spill] sm:$0xff] }
 0x477   : > { %v1975_v30 = vpop.xlane.xlu0 %1974  ;;  %v1993_v58 = vsub.f32 %v7337_v46, %v1977_v4  ;;  %2069 = vperm.xlu0 %5803, %v2031_v36   ;;  %v2033_v46 = vsel %vm7518_vm13, %v5850_v41, 0.0  ;;  %vm1766_vm13 = vcmp.ge.s32.totalorder %v9556_v38, %v9476_v1  ;;  %v9561_v4 = vld [vmem:[#allocation46_spill] sm:$0xff]  ;;  %v9564_v36 = vld [vmem:[#allocation69_spill] sm:$0xff]  ;;  %v5990_v41 = vmov 5  }
 0x478   : > { %v1992_v29 = vsub.f32 %v9552_v35, %v1975_v30  ;;  %5859 = vpow2.f32 %v2018_v63  ;;  %2074 = vperm.xlu1 %5806, %v2032_v37   ;;  %v9557_v63 = vld [vmem:[#allocation35_spill] sm:$0xff]  ;;  %v9562_v30 = vld [vmem:[#allocation66_spill] sm:$0xff] }
 0x479   : > { %5861 = vpow2.f32 %v2020_v3  ;;  %v2024_v25 = vmul.f32 1.442695, %v1993_v58 }
 0x47a   : > { %v2022_v45 = vmul.f32 1.442695, %v1992_v29  ;;  %v5852_v56 = vpop.eup %5851  ;;  %v5991_v29 = vmov 6  }
 0x47b   : > { %v5854_v0 = vpop.eup %5853  ;;  %2079 = vperm.xlu0 %5803, %v2033_v46   ;;  %v2034_v21 = vsel %vm7526_vm11, %v5852_v56, 0.0  ;;  %vm1764_vm11 = vcmp.ge.s32.totalorder %v9555_v10, %v9476_v1  ;;  %v9558_v1 = vld [vmem:[#allocation39_spill] sm:$0xff]  ;;  %v7709_v46 = vpop.permute.xlu1 %3313 }
 0x47c   : > { %5863 = vpow2.f32 %v2022_v45  ;;  %2084 = vperm.xlu1 %5806, %v2034_v21   ;;  %v2035_v54 = vsel %vm1794_vm9, %v5854_v0, 0.0  ;;  %vm1798_vm6 = vmand %vm1764_vm11, %vm1782_vm3  ;;  %9571 = vst [vmem:[#allocation115_spill] sm:$0xff] %v7709_v46  ;;  %vm4571_vm11 = vcmask 1042432   ;;  %vm4573_vm3 = vcmask 1043456  }
 0x47d   : > { %5865 = vpow2.f32 %v2024_v25 }
 0x47e   : > { %v5856_v34 = vpop.eup %5855  ;;  %v7677_v58 = vpop.permute.xlu0 %2975 }
 0x47f   : > { %v5858_v18 = vpop.eup %5857  ;;  %2089 = vperm.xlu0 %5803, %v2035_v54   ;;  %v2036_v27 = vsel %vm7538_vm2, %v5856_v34, 0.0  ;;  %vm1784_vm2 = vcmp.lt.s32.totalorder %v9556_v38, %v9478_v15  ;;  %v9559_v15 = vld [vmem:[#allocation41_spill] sm:$0xff]  ;;  %9565 = vst [vmem:[#allocation22_spill] sm:$0xff] %v7677_v58  ;;  %v5992_v54 = vmov 7  }
 0x480   : > { %2094 = vperm.xlu1 %5806, %v2036_v27   ;;  %v2037_v20 = vsel %vm1796_vm14, %v5858_v18, 0.0  ;;  %vm1800_vm4 = vmand %vm1766_vm13, %vm1784_vm2  ;;  %vm4569_vm14 = vcmask 1041408   ;;  %vm4577_vm13 = vcmask 1045504   ;;  %vm4579_vm2 = vcmask 1046528  }
 0x482   : > { %v5860_v17 = vpop.eup %5859  ;;  %v7682_v35 = vpop.permute.xlu0 %2980 }
 0x483   : > { %v5862_v51 = vpop.eup %5861  ;;  %2099 = vperm.xlu0 %5803, %v2037_v20   ;;  %v2038_v16 = vsel %vm7548_vm1, %v5860_v17, 0.0  ;;  %9566 = vst [vmem:[#allocation111_spill] sm:$0xff] %v7682_v35 }
 0x484   : > { %2104 = vperm.xlu1 %5806, %v2038_v16   ;;  %v2039_v14 = vsel %vm1798_vm6, %v5862_v51, 0.0  ;;  %vm4575_vm6 = vcmask 1044480  }
 0x486   : > { %v5864_v24 = vpop.eup %5863  ;;  %v7686_v37 = vpop.permute.xlu0 %2985 }
 0x487   : > { %v5866_v8 = vpop.eup %5865  ;;  %2109 = vperm.xlu0 %5803, %v2039_v14   ;;  %v2040_v57 = vsel %vm7560_vm10, %v5864_v24, 0.0  ;;  %9567 = vst [vmem:[#allocation112_spill] sm:$0xff] %v7686_v37 }
 0x488   : > { %2114 = vperm.xlu1 %5806, %v2040_v57   ;;  %v2041_v3 = vsel %vm1800_vm4, %v5866_v8, 0.0 }
 0x48a   : > { %v7692_v44 = vpop.permute.xlu0 %2990 }
 0x48b   : > { %2119 = vperm.xlu0 %5803, %v2041_v3  }
 0x48c   : > { %5808 = vset.pattern.permute.xlu1 %v5989_v48 }
 0x48d   : > { %3358 = vperm.xlu1 %5808, %v9557_v63  }
 0x48e   : > { %v7696_v25 = vpop.permute.xlu0 %2995 }
 0x48f   : > { %5807 = vset.pattern.permute.xlu0 %v5989_v48  ;;  %9568 = vst [vmem:[#allocation113_spill] sm:$0xff] %v7696_v25 }
 0x490   : > { %3354 = vperm.xlu0 %5807, %v9558_v1  }
 0x491   : > { %3362 = vperm.xlu1 %5808, %v9559_v15  }
 0x492   : > { %v7702_v45 = vpop.permute.xlu0 %3000 }
 0x493   : > { %9569 = vst [vmem:[#allocation114_spill] sm:$0xff] %v7702_v45 }
 0x494   : > { %3366 = vperm.xlu0 %5807, %v9560_v6  }
 0x495   : > { %3370 = vperm.xlu1 %5808, %v9561_v4  }
 0x496   : > { %v7706_v56 = vpop.permute.xlu0 %3005 }
 0x497   : > { %9570 = vst [vmem:[#allocation117_spill] sm:$0xff] %v7706_v56 }
 0x498   : > { %3374 = vperm.xlu0 %5807, %v9562_v30  }
 0x499   : > { %3378 = vperm.xlu1 %5808, %v9563_v33  }
 0x49c   : > { %3382 = vperm.xlu0 %5807, %v9564_v36  }
 0x49d   : > { %3386 = vperm.xlu1 %5808, %v6906_v49  }
 0x4a0   : > { %3390 = vperm.xlu0 %5807, %v6955_v2  }
 0x4a1   : > { %3394 = vperm.xlu1 %5808, %v6923_v13  }
 0x4a4   : > { %3398 = vperm.xlu0 %5807, %v6965_v19  }
 0x4a5   : > { %3402 = vperm.xlu1 %5808, %v6934_v53  }
 0x4a8   : > { %3406 = vperm.xlu0 %5807, %v6978_v7  }
 0x4a9   : > { %3410 = vperm.xlu1 %5808, %v6945_v9  }
 0x4ac   : > { %3414 = vperm.xlu0 %5807, %v6996_v22  }
 0x4ad   : > { %5809 = vset.pattern.permute.xlu1 %v5990_v41 }
 0x4ae   : > { %3455 = vperm.xlu1 %5809, %v9558_v1  }
 0x4b0   : > { %5810 = vset.pattern.permute.xlu0 %v5990_v41 }
 0x4b1   : > { %3459 = vperm.xlu0 %5810, %v9557_v63  }
 0x4b2   : > { %3463 = vperm.xlu1 %5809, %v9559_v15  }
 0x4b5   : > { %3471 = vperm.xlu0 %5810, %v9561_v4  }
 0x4b6   : > { %3467 = vperm.xlu1 %5809, %v9560_v6  }
 0x4b9   : > { %3479 = vperm.xlu0 %5810, %v9563_v33  }
 0x4ba   : > { %3475 = vperm.xlu1 %5809, %v9562_v30  }
 0x4bd   : > { %3487 = vperm.xlu0 %5810, %v6906_v49  }
 0x4be   : > { %3483 = vperm.xlu1 %5809, %v9564_v36  }
 0x4c1   : > { %3495 = vperm.xlu0 %5810, %v6923_v13  }
 0x4c2   : > { %3491 = vperm.xlu1 %5809, %v6955_v2  }
 0x4c5   : > { %3503 = vperm.xlu0 %5810, %v6934_v53  }
 0x4c6   : > { %3499 = vperm.xlu1 %5809, %v6965_v19  }
 0x4c9   : > { %3511 = vperm.xlu0 %5810, %v6945_v9  }
 0x4ca   : > { %3507 = vperm.xlu1 %5809, %v6978_v7  }
 0x4cd   : > { %5811 = vset.pattern.permute.xlu0 %v5991_v29 }
 0x4ce   : > { %3515 = vperm.xlu1 %5809, %v6996_v22   ;;  %3556 = vperm.xlu0 %5811, %v9558_v1  }
 0x4d2   : > { %5812 = vset.pattern.permute.xlu1 %v5991_v29  ;;  %3568 = vperm.xlu0 %5811, %v9560_v6  }
 0x4d3   : > { %3560 = vperm.xlu1 %5812, %v9557_v63  }
 0x4d6   : > { %3576 = vperm.xlu0 %5811, %v9562_v30  }
 0x4d7   : > { %3564 = vperm.xlu1 %5812, %v9559_v15  }
 0x4da   : > { %3584 = vperm.xlu0 %5811, %v9564_v36  }
 0x4db   : > { %3572 = vperm.xlu1 %5812, %v9561_v4  }
 0x4de   : > { %3592 = vperm.xlu0 %5811, %v6955_v2  }
 0x4df   : > { %3580 = vperm.xlu1 %5812, %v9563_v33  }
 0x4e2   : > { %3600 = vperm.xlu0 %5811, %v6965_v19  }
 0x4e3   : > { %3588 = vperm.xlu1 %5812, %v6906_v49  }
 0x4e6   : > { %3608 = vperm.xlu0 %5811, %v6978_v7  }
 0x4e7   : > { %3596 = vperm.xlu1 %5812, %v6923_v13  }
 0x4ea   : > { %3616 = vperm.xlu0 %5811, %v6996_v22   ;;  %v7713_v0 = vpop.permute.xlu0 %2044 }
 0x4eb   : > { %v7715_v21 = vpop.permute.xlu1 %2049  ;;  %3604 = vperm.xlu1 %5812, %v6934_v53   ;;  %v2870_v34 = vmul.f32 %v6810_v55, %v7713_v0 }
 0x4ec   : > { %v2871_v59 = vmul.f32 %v6753_v5, %v7715_v21 }
 0x4ee   : > { %5814 = vset.pattern.permute.xlu0 %v5992_v54  ;;  %v7722_v18 = vpop.permute.xlu0 %3010  ;;  %v2886_v17 = vadd.f32 %v2871_v59, %v2870_v34 }
 0x4ef   : > { %9572 = vst [vmem:[#allocation121_spill] sm:$0xff] %v7722_v18  ;;  %v7724_v27 = vpop.permute.xlu1 %2054  ;;  %3612 = vperm.xlu1 %5812, %v6945_v9   ;;  %3661 = vperm.xlu0 %5814, %v9557_v63  }
 0x4f0   : > { %v2872_v10 = vmul.f32 %v6759_v11, %v7724_v27 }
 0x4f2   : > { %v7730_v20 = vpop.permute.xlu0 %2059  ;;  %v2887_v51 = vadd.f32 %v2886_v17, %v2872_v10 }
 0x4f3   : > { %v7732_v16 = vpop.permute.xlu1 %2064  ;;  %5813 = vset.pattern.permute.xlu1 %v5992_v54  ;;  %v2873_v38 = vmul.f32 %v6770_v32, %v7730_v20  ;;  %3673 = vperm.xlu0 %5814, %v9561_v4  }
 0x4f4   : > { %3657 = vperm.xlu1 %5813, %v9558_v1   ;;  %v2874_v24 = vmul.f32 %v6776_v39, %v7732_v16 }
 0x4f5   : > { %v2888_v14 = vadd.f32 %v2887_v51, %v2873_v38 }
 0x4f6   : > { %v7740_v8 = vpop.permute.xlu0 %2069 }
 0x4f7   : > { %v7742_v57 = vpop.permute.xlu1 %2074  ;;  %v2889_v3 = vadd.f32 %v2888_v14, %v2874_v24  ;;  %v2875_v48 = vmul.f32 %v6784_v26, %v7740_v8  ;;  %3681 = vperm.xlu0 %5814, %v9563_v33  }
 0x4f8   : > { %3665 = vperm.xlu1 %5813, %v9559_v15   ;;  %v2876_v41 = vmul.f32 %v6790_v43, %v7742_v57 }
 0x4f9   : > { %v2890_v29 = vadd.f32 %v2889_v3, %v2875_v48 }
 0x4fa   : > { %v7750_v59 = vpop.permute.xlu0 %2079 }
 0x4fb   : > { %v7752_v34 = vpop.permute.xlu1 %2084  ;;  %v2891_v54 = vadd.f32 %v2890_v29, %v2876_v41  ;;  %v2877_v10 = vmul.f32 %v6796_v52, %v7750_v59  ;;  %3689 = vperm.xlu0 %5814, %v6906_v49  }
 0x4fc   : > { %v2878_v17 = vmul.f32 %v7164_v42, %v7752_v34 }
 0x4fd   : > { %v2892_v51 = vadd.f32 %v2891_v54, %v2877_v10 }
 0x4fe   : > { %v7759_v38 = vpop.permute.xlu0 %2089 }
 0x4ff   : > { %v7761_v24 = vpop.permute.xlu1 %2094  ;;  %v2893_v14 = vadd.f32 %v2892_v51, %v2878_v17  ;;  %v2879_v3 = vmul.f32 %v7181_v40, %v7759_v38  ;;  %3697 = vperm.xlu0 %5814, %v6923_v13  }
 0x500   : > { %v2880_v48 = vmul.f32 %v7202_v31, %v7761_v24 }
 0x501   : > { %v2894_v41 = vadd.f32 %v2893_v14, %v2879_v3  ;;  %v9573_v3 = vsub.f32 %v7421_v12, %v7424_v23 }
 0x502   : > { %v7768_v29 = vpop.permute.xlu0 %2099 }
 0x503   : > { %v7770_v46 = vpop.permute.xlu1 %2104  ;;  %v2895_v25 = vadd.f32 %v2894_v41, %v2880_v48  ;;  %v2881_v54 = vmul.f32 %v7219_v62, %v7768_v29  ;;  %3705 = vperm.xlu0 %5814, %v6934_v53   ;;  %v1921_v48 = vmul.f32 1.442695, %v9573_v3 }
 0x504   : > { %v2882_v10 = vmul.f32 %v7245_v61, %v7770_v46 }
 0x505   : > { %v2896_v17 = vadd.f32 %v2895_v25, %v2881_v54  ;;  %5867 = vpow2.f32 %v1921_v48 }
 0x506   : > { %v7777_v51 = vpop.permute.xlu0 %2109 }
 0x507   : > { %v7779_v56 = vpop.permute.xlu1 %2114  ;;  %v2897_v45 = vadd.f32 %v2896_v17, %v2882_v10  ;;  %v2883_v14 = vmul.f32 %v7262_v50, %v7777_v51  ;;  %3713 = vperm.xlu0 %5814, %v6945_v9   ;;  %v9233_v10 = vmov 8  }
 0x508   : > { %v2884_v41 = vmul.f32 %v7282_v47, %v7779_v56 }
 0x509   : > { %v2898_v58 = vadd.f32 %v2897_v45, %v2883_v14 }
 0x50a   : > { %v7789_v18 = vpop.permute.xlu0 %2119 }
 0x50b   : > { %v2899_v25 = vadd.f32 %v2898_v58, %v2884_v41  ;;  %v2885_v54 = vmul.f32 %v7300_v28, %v7789_v18  ;;  %5815 = vset.pattern.permute.xlu0 %v9233_v10 }
 0x50c   : > { %v7794_v17 = vpop.permute.xlu1 %3358  ;;  %3758 = vperm.xlu0 %5815, %v9558_v1  }
 0x50d   : > { %9574 = vst [vmem:[#allocation116_spill] sm:$0xff] %v7794_v17  ;;  %v2900_v12 = vadd.f32 %v2899_v25, %v2885_v54  ;;  %v2868_v17 = vld [vmem:[#allocation4] sm:$0x1] }
 0x50f   : > { %v2901_v23 = vrot.slane %v2900_v12, 4  ;;  %v7797_v3 = vpop.permute.xlu0 %3354  ;;  %v7807_v10 = vpop.eup %5867 }
 0x510   : > { %9575 = vst [vmem:[#allocation127_spill] sm:$0xff] %v7797_v3  ;;  %v7799_v37 = vpop.permute.xlu1 %3362  ;;  %3770 = vperm.xlu0 %5815, %v9560_v6   ;;  %9579 = vst [vmem:[#allocation97_spill] sm:$0xff] %v7807_v10 }
 0x511   : > { %9576 = vst [vmem:[#allocation118_spill] sm:$0xff] %v7799_v37  ;;  %v2902_v58 = vadd.f32 %v2901_v23, %v2900_v12  ;;  %v2869_v12 = vmul.f32 %v7807_v10, %v2868_v17  ;;  %v9587_v17 = vld [vmem:[#allocation31_spill] sm:$0xff] }
 0x513   : > { %v2903_v45 = vrot.slane %v2902_v58, 2  ;;  %v7802_v14 = vpop.permute.xlu0 %3366 }
 0x514   : > { %9577 = vst [vmem:[#allocation119_spill] sm:$0xff] %v7802_v14  ;;  %v7804_v41 = vpop.permute.xlu1 %3370  ;;  %3778 = vperm.xlu0 %5815, %v9562_v30  }
 0x515   : > { %9578 = vst [vmem:[#allocation130_spill] sm:$0xff] %v7804_v41  ;;  %v2904_v48 = vadd.f32 %v2903_v45, %v2902_v58  ;;  %v9584_v58 = vld [vmem:[#allocation32_spill] sm:$0xff] }
 0x516   : > { %v2122_v45 = vmul.f32 %v9584_v58, %v7713_v0  ;;  %v9592_v58 = vld [vmem:[#allocation33_spill] sm:$0xff] }
 0x517   : > { %v2905_v25 = vrot.slane %v2904_v48, 1  ;;  %v7809_v54 = vpop.permute.xlu0 %3374 }
 0x518   : > { %9580 = vst [vmem:[#allocation99_spill] sm:$0xff] %v7809_v54  ;;  %v7811_v3 = vpop.permute.xlu1 %3378  ;;  %3786 = vperm.xlu0 %5815, %v9564_v36  }
 0x519   : > { %9581 = vst [vmem:[#allocation101_spill] sm:$0xff] %v7811_v3  ;;  %v2906_v23 = vadd.f32 %v2905_v25, %v2904_v48  ;;  %v2123_v48 = vmul.f32 %v9587_v17, %v7715_v21  ;;  %v9235_v17 = vmov 9   ;;  %v9705_v3 = vld [vmem:[#allocation76_spill] sm:$0xff] }
 0x51b   : > { %v2907_v37 = vadd.f32 %v2906_v23, %v2869_v12  ;;  %v7815_v14 = vpop.permute.xlu0 %3382 }
 0x51c   : > { %9582 = vst [vmem:[#allocation102_spill] sm:$0xff] %v7815_v14  ;;  %v7817_v41 = vpop.permute.xlu1 %3386  ;;  %3794 = vperm.xlu0 %5815, %v6955_v2  }
 0x51d   : > { %9583 = vst [vmem:[#allocation138_spill] sm:$0xff] %v7817_v41  ;;  %2908 = vst [vmem:[#allocation4] sm:$0x1] %v2907_v37  ;;  %v9590_v37 = vld [vmem:[#allocation34_spill] sm:$0xff] }
 0x51e   : > { %v2124_v0 = vmul.f32 %v9590_v37, %v7724_v27  ;;  %v9595_v27 = vld [vmem:[#allocation37_spill] sm:$0xff] }
 0x51f   : > { %v7822_v35 = vpop.permute.xlu0 %3390 }
 0x520   : > { %9585 = vst [vmem:[#allocation32_spill] sm:$0xff] %v7822_v35  ;;  %v7824_v54 = vpop.permute.xlu1 %3394  ;;  %3802 = vperm.xlu0 %5815, %v6965_v19  }
 0x521   : > { %9586 = vst [vmem:[#allocation139_spill] sm:$0xff] %v7824_v54  ;;  %2138 = vxpose.xlu1.b32.start [1/16] (narrow) %v2122_v45, 16  ;;  %v2125_v45 = vmul.f32 %v9592_v58, %v7730_v20  ;;  %v9598_v20 = vld [vmem:[#allocation36_spill] sm:$0xff]  ;;  %v9685_v54 = vmov 9  }
 0x523   : > { %v7829_v25 = vpop.permute.xlu0 %3398 }
 0x524   : > { %9588 = vst [vmem:[#allocation31_spill] sm:$0xff] %v7829_v25  ;;  %3810 = vperm.xlu0 %5815, %v6978_v7   ;;  %v7832_v12 = vpop.permute.xlu1 %3402 }
 0x525   : > { %9589 = vst [vmem:[#allocation140_spill] sm:$0xff] %v7832_v12  ;;  %2139 = vxpose.xlu1.b32.cont [2/16] (narrow) %v2123_v48, 16  ;;  %v2126_v48 = vmul.f32 %v9595_v27, %v7732_v16  ;;  %v9603_v27 = vld [vmem:[#allocation38_spill] sm:$0xff] }
 0x527   : > { %v7836_v23 = vpop.permute.xlu0 %3406 }
 0x528   : > { %9591 = vst [vmem:[#allocation34_spill] sm:$0xff] %v7836_v23  ;;  %3818 = vperm.xlu0 %5815, %v6996_v22   ;;  %v7841_v10 = vpop.permute.xlu1 %3410 }
 0x529   : > { %2140 = vxpose.xlu1.b32.cont [3/16] (narrow) %v2124_v0, 16  ;;  %9593 = vst [vmem:[#allocation33_spill] sm:$0xff] %v7841_v10  ;;  %v2127_v0 = vmul.f32 %v9598_v20, %v7740_v8  ;;  %v9606_v20 = vld [vmem:[#allocation43_spill] sm:$0xff] }
 0x52b   : > { %v7843_v21 = vpop.permute.xlu0 %3414 }
 0x52c   : > { %9594 = vst [vmem:[#allocation141_spill] sm:$0xff] %v7843_v21  ;;  %5818 = vset.pattern.permute.xlu0 %v9235_v17 }
 0x52d   : > { %2141 = vxpose.xlu1.b32.cont [4/16] (narrow) %v2125_v45, 16  ;;  %3863 = vperm.xlu0 %5818, %v9557_v63   ;;  %v7851_v23 = vpop.permute.xlu1 %3455  ;;  %v9600_v45 = vld [vmem:[#allocation40_spill] sm:$0xff] }
 0x52e   : > { %9597 = vst [vmem:[#allocation142_spill] sm:$0xff] %v7851_v23  ;;  %v2128_v17 = vmul.f32 %v9600_v45, %v7742_v57  ;;  %v2130_v57 = vmul.f32 %v9606_v20, %v7752_v34  ;;  %v9236_v20 = vmov 10  }
 0x530   : > { %v7849_v37 = vpop.permute.xlu0 %3459 }
 0x531   : > { %9596 = vst [vmem:[#allocation37_spill] sm:$0xff] %v7849_v37  ;;  %2142 = vxpose.xlu1.b32.cont [5/16] (narrow) %v2126_v48, 16  ;;  %3875 = vperm.xlu0 %5818, %v9561_v4   ;;  %v7861_v21 = vpop.permute.xlu1 %3463  ;;  %v2129_v48 = vmul.f32 %v9603_v27, %v7750_v59  ;;  %v9611_v27 = vld [vmem:[#allocation45_spill] sm:$0xff] }
 0x532   : > { %9601 = vst [vmem:[#allocation40_spill] sm:$0xff] %v7861_v21 }
 0x534   : > { %v7856_v58 = vpop.permute.xlu0 %3471 }
 0x535   : > { %9599 = vst [vmem:[#allocation36_spill] sm:$0xff] %v7856_v58  ;;  %2143 = vxpose.xlu1.b32.cont [6/16] (narrow) %v2127_v0, 16  ;;  %3883 = vperm.xlu0 %5818, %v9563_v33   ;;  %v7870_v8 = vpop.permute.xlu1 %3467  ;;  %v9674_v58 = vld [vmem:[#allocation58_spill] sm:$0xff] }
 0x536   : > { %9605 = vst [vmem:[#allocation144_spill] sm:$0xff] %v7870_v8  ;;  %v9675_v10 = vand.u32 4294901760, %v9674_v58 }
 0x538   : > { %v7863_v16 = vpop.permute.xlu0 %3479 }
 0x539   : > { %9602 = vst [vmem:[#allocation143_spill] sm:$0xff] %v7863_v16  ;;  %2144 = vxpose.xlu1.b32.cont [7/16] (narrow) %v2128_v17, 16  ;;  %3891 = vperm.xlu0 %5818, %v6906_v49   ;;  %v9608_v17 = vld [vmem:[#allocation42_spill] sm:$0xff]  ;;  %v7880_v21 = vpop.permute.xlu1 %3475 }
 0x53a   : > { %v2131_v45 = vmul.f32 %v9608_v17, %v7759_v38  ;;  %9609 = vst [vmem:[#allocation42_spill] sm:$0xff] %v7880_v21  ;;  %v9614_v38 = vld [vmem:[#allocation44_spill] sm:$0xff] }
 0x53c   : > { %v7868_v37 = vpop.permute.xlu0 %3487 }
 0x53d   : > { %9604 = vst [vmem:[#allocation38_spill] sm:$0xff] %v7868_v37  ;;  %2145 = vxpose.xlu1.b32.cont [8/16] (narrow) %v2129_v48, 16  ;;  %3899 = vperm.xlu0 %5818, %v6923_v13   ;;  %v2132_v48 = vmul.f32 %v9611_v27, %v7761_v24  ;;  %v7889_v34 = vpop.permute.xlu1 %3483  ;;  %v9616_v24 = vld [vmem:[#allocation48_spill] sm:$0xff] }
 0x53e   : > { %9613 = vst [vmem:[#allocation146_spill] sm:$0xff] %v7889_v34 }
 0x540   : > { %v7875_v0 = vpop.permute.xlu0 %3495 }
 0x541   : > { %9607 = vst [vmem:[#allocation43_spill] sm:$0xff] %v7875_v0  ;;  %2146 = vxpose.xlu1.b32.cont [9/16] (narrow) %v2130_v57, 16  ;;  %3907 = vperm.xlu0 %5818, %v6934_v53   ;;  %v2133_v57 = vmul.f32 %v9614_v38, %v7768_v29  ;;  %v7900_v27 = vpop.permute.xlu1 %3491  ;;  %v9622_v38 = vld [vmem:[#allocation52_spill] sm:$0xff] }
 0x542   : > { %9617 = vst [vmem:[#allocation48_spill] sm:$0xff] %v7900_v27 }
 0x544   : > { %v7882_v59 = vpop.permute.xlu0 %3503 }
 0x545   : > { %9610 = vst [vmem:[#allocation145_spill] sm:$0xff] %v7882_v59  ;;  %2147 = vxpose.xlu1.b32.cont [10/16] (narrow) %v2131_v45, 16  ;;  %3915 = vperm.xlu0 %5818, %v6945_v9   ;;  %v2134_v45 = vmul.f32 %v9616_v24, %v7770_v46  ;;  %v2136_v46 = vmul.f32 %v9622_v38, %v7779_v56  ;;  %v9624_v24 = vld [vmem:[#allocation51_spill] sm:$0xff] }
 0x548   : > { %v7887_v8 = vpop.permute.xlu0 %3511 }
 0x549   : > { %9612 = vst [vmem:[#allocation45_spill] sm:$0xff] %v7887_v8  ;;  %2148 = vxpose.xlu1.b32.cont [11/16] (narrow) %v2132_v48, 16  ;;  %5819 = vset.pattern.permute.xlu0 %v9236_v20  ;;  %v9619_v20 = vld [vmem:[#allocation47_spill] sm:$0xff]  ;;  %v7907_v8 = vpop.permute.xlu1 %3499 }
 0x54a   : > { %3960 = vperm.xlu0 %5819, %v9558_v1   ;;  %v2135_v59 = vmul.f32 %v9619_v20, %v7777_v51  ;;  %9620 = vst [vmem:[#allocation47_spill] sm:$0xff] %v7907_v8  ;;  %v9239_v8 = vmov 13  }
 0x54d   : > { %2149 = vxpose.xlu1.b32.cont [12/16] (narrow) %v2133_v57, 16  ;;  %v7895_v17 = vpop.permute.xlu0 %3556 }
 0x54e   : > { %9615 = vst [vmem:[#allocation44_spill] sm:$0xff] %v7895_v17  ;;  %3972 = vperm.xlu0 %5819, %v9560_v6   ;;  %v9650_v17 = vmov 8  }
 0x551   : > { %2150 = vxpose.xlu1.b32.cont [13/16] (narrow) %v2134_v45, 16  ;;  %v7902_v48 = vpop.permute.xlu0 %3568  ;;  %v2137_v45 = vmul.f32 %v9624_v24, %v7789_v18 }
 0x552   : > { %9618 = vst [vmem:[#allocation147_spill] sm:$0xff] %v7902_v48  ;;  %3980 = vperm.xlu0 %5819, %v9562_v30   ;;  %v7919_v48 = vpop.permute.xlu1 %3507 }
 0x553   : > { %9625 = vst [vmem:[#allocation51_spill] sm:$0xff] %v7919_v48 }
 0x555   : > { %2151 = vxpose.xlu1.b32.cont [14/16] (narrow) %v2135_v59, 16  ;;  %v7909_v29 = vpop.permute.xlu0 %3576 }
 0x556   : > { %9621 = vst [vmem:[#allocation148_spill] sm:$0xff] %v7909_v29  ;;  %3988 = vperm.xlu0 %5819, %v9564_v36   ;;  %v7924_v59 = vpop.permute.xlu1 %3515  ;;  %v9238_v29 = vmov 12  }
 0x557   : > { %9627 = vst [vmem:[#allocation150_spill] sm:$0xff] %v7924_v59 }
 0x559   : > { %2152 = vxpose.xlu1.b32.cont [15/16] (narrow) %v2136_v46, 16  ;;  %v7914_v57 = vpop.permute.xlu0 %3584  ;;  %v9237_v46 = vmov 11  }
 0x55a   : > { %9623 = vst [vmem:[#allocation52_spill] sm:$0xff] %v7914_v57  ;;  %3996 = vperm.xlu0 %5819, %v6955_v2   ;;  %v7932_v38 = vpop.permute.xlu1 %3560  ;;  %v9660_v57 = vld [vmem:[#allocation53_spill] sm:$0xff] }
 0x55b   : > { %9630 = vst [vmem:[#allocation153_spill] sm:$0xff] %v7932_v38 }
 0x55d   : > { %2153 = vxpose.xlu1.b32.end [16/16] (narrow) %v2137_v45, 16  ;;  %v7921_v51 = vpop.permute.xlu0 %3592 }
 0x55e   : > { %9626 = vst [vmem:[#allocation149_spill] sm:$0xff] %v7921_v51  ;;  %4004 = vperm.xlu0 %5819, %v6965_v19   ;;  %v7938_v24 = vpop.permute.xlu1 %3564 }
 0x55f   : > { %9632 = vst [vmem:[#allocation155_spill] sm:$0xff] %v7938_v24 }
 0x561   : > { %v7926_v20 = vpop.permute.xlu0 %3600 }
 0x562   : > { %9628 = vst [vmem:[#allocation151_spill] sm:$0xff] %v7926_v20  ;;  %4012 = vperm.xlu0 %5819, %v6978_v7  }
 0x565   : > { %v7929_v56 = vpop.permute.xlu0 %3608 }
 0x566   : > { %9629 = vst [vmem:[#allocation152_spill] sm:$0xff] %v7929_v56  ;;  %4020 = vperm.xlu0 %5819, %v6996_v22   ;;  %v7945_v56 = vpop.permute.xlu1 %3572 }
 0x567   : > { %9635 = vst [vmem:[#allocation158_spill] sm:$0xff] %v7945_v56  ;;  %v9661_v56 = vand.u32 4294901760, %v9660_v57 }
 0x569   : > { %v7934_v18 = vpop.permute.xlu0 %3616  ;;  %v2289_v48 = vsub.f32 %v9660_v57, %v9661_v56 }
 0x56a   : > { %9631 = vst [vmem:[#allocation154_spill] sm:$0xff] %v7934_v18  ;;  %5822 = vset.pattern.permute.xlu0 %v9237_v46  ;;  %v7951_v18 = vpop.permute.xlu1 %3580 }
 0x56b   : > { %4065 = vperm.xlu0 %5822, %v9557_v63   ;;  %9637 = vst [vmem:[#allocation160_spill] sm:$0xff] %v7951_v18  ;;  %v9662_v18 = vld [vmem:[#allocation54_spill] sm:$0xff]  ;;  %v2290_v27 = vand.u32 4294901760, %v2289_v48  ;;  %v8051_v48 = vsub.f32 %v7181_v40, %v7181_v40 }
 0x56e   : > { %v7940_v45 = vpop.permute.xlu0 %3661  ;;  %v7959_v20 = vpop.permute.xlu1 %3588 }
 0x56f   : > { %9633 = vst [vmem:[#allocation156_spill] sm:$0xff] %v7940_v45  ;;  %4077 = vperm.xlu0 %5822, %v9561_v4   ;;  %9640 = vst [vmem:[#allocation163_spill] sm:$0xff] %v7959_v20 }
 0x572   : > { %v7943_v51 = vpop.permute.xlu0 %3673 }
 0x573   : > { %9634 = vst [vmem:[#allocation157_spill] sm:$0xff] %v7943_v51  ;;  %4085 = vperm.xlu0 %5822, %v9563_v33  }
 0x576   : > { %v7948_v38 = vpop.permute.xlu0 %3681 }
 0x577   : > { %9636 = vst [vmem:[#allocation159_spill] sm:$0xff] %v7948_v38  ;;  %4093 = vperm.xlu0 %5822, %v6906_v49   ;;  %v7967_v38 = vpop.permute.xlu1 %3596 }
 0x578   : > { %9642 = vst [vmem:[#allocation165_spill] sm:$0xff] %v7967_v38 }
 0x57a   : > { %v7953_v46 = vpop.permute.xlu0 %3689 }
 0x57b   : > { %9638 = vst [vmem:[#allocation161_spill] sm:$0xff] %v7953_v46  ;;  %3669 = vperm.xlu1 %5813, %v9560_v6   ;;  %4101 = vperm.xlu0 %5822, %v6923_v13  }
 0x57e   : > { %v7957_v45 = vpop.permute.xlu0 %3697 }
 0x57f   : > { %9639 = vst [vmem:[#allocation162_spill] sm:$0xff] %v7957_v45  ;;  %3677 = vperm.xlu1 %5813, %v9562_v30   ;;  %4109 = vperm.xlu0 %5822, %v6934_v53   ;;  %v7974_v45 = vpop.permute.xlu1 %3604 }
 0x580   : > { %9644 = vst [vmem:[#allocation167_spill] sm:$0xff] %v7974_v45 }
 0x582   : > { %v7963_v51 = vpop.permute.xlu0 %3705 }
 0x583   : > { %9641 = vst [vmem:[#allocation164_spill] sm:$0xff] %v7963_v51  ;;  %3685 = vperm.xlu1 %5813, %v9564_v36   ;;  %4117 = vperm.xlu0 %5822, %v6945_v9  }
 0x586   : > { %v7969_v46 = vpop.permute.xlu0 %3713 }
 0x587   : > { %9643 = vst [vmem:[#allocation166_spill] sm:$0xff] %v7969_v46  ;;  %3693 = vperm.xlu1 %5813, %v6955_v2   ;;  %5823 = vset.pattern.permute.xlu0 %v9238_v29  ;;  %v7984_v46 = vpop.permute.xlu1 %3612 }
 0x588   : > { %4162 = vperm.xlu0 %5823, %v9558_v1   ;;  %9647 = vst [vmem:[#allocation170_spill] sm:$0xff] %v7984_v46 }
 0x58b   : > { %3701 = vperm.xlu1 %5813, %v6965_v19   ;;  %v7977_v51 = vpop.permute.xlu0 %3758  ;;  %v7990_v45 = vpop.permute.xlu1 %3657 }
 0x58c   : > { %9645 = vst [vmem:[#allocation168_spill] sm:$0xff] %v7977_v51  ;;  %4174 = vperm.xlu0 %5823, %v9560_v6   ;;  %9649 = vst [vmem:[#allocation172_spill] sm:$0xff] %v7990_v45 }
 0x58f   : > { %3709 = vperm.xlu1 %5813, %v6978_v7   ;;  %v7981_v20 = vpop.permute.xlu0 %3770  ;;  %v8001_v46 = vpop.permute.xlu1 %3665 }
 0x590   : > { %9646 = vst [vmem:[#allocation169_spill] sm:$0xff] %v7981_v20  ;;  %4182 = vperm.xlu0 %5823, %v9562_v30   ;;  %9653 = vst [vmem:[#allocation175_spill] sm:$0xff] %v8001_v46 }
 0x593   : > { %3717 = vperm.xlu1 %5813, %v6996_v22   ;;  %v7987_v29 = vpop.permute.xlu0 %3778 }
 0x594   : > { %9648 = vst [vmem:[#allocation171_spill] sm:$0xff] %v7987_v29  ;;  %4190 = vperm.xlu0 %5823, %v9564_v36  }
 0x597   : > { %5816 = vset.pattern.permute.xlu1 %v9650_v17  ;;  %v7993_v51 = vpop.permute.xlu0 %3786 }
 0x598   : > { %9651 = vst [vmem:[#allocation173_spill] sm:$0xff] %v7993_v51  ;;  %3762 = vperm.xlu1 %5816, %v9557_v63   ;;  %4198 = vperm.xlu0 %5823, %v6955_v2  }
 0x59b   : > { %v7997_v20 = vpop.permute.xlu0 %3794 }
 0x59c   : > { %9652 = vst [vmem:[#allocation174_spill] sm:$0xff] %v7997_v20  ;;  %3766 = vperm.xlu1 %5816, %v9559_v15   ;;  %4206 = vperm.xlu0 %5823, %v6965_v19  }
 0x59f   : > { %v8003_v29 = vpop.permute.xlu0 %3802 }
 0x5a0   : > { %9654 = vst [vmem:[#allocation176_spill] sm:$0xff] %v8003_v29  ;;  %3774 = vperm.xlu1 %5816, %v9561_v4   ;;  %4214 = vperm.xlu0 %5823, %v6978_v7  }
 0x5a1   : > { %v2154_v17 = vpop.trf.xlu1 }
 0x5a2   : > { %v8007_v51 = vand.u32 4294901760, %v2154_v17 }
 0x5a3   : > { %v8009_v45 = vpop.permute.xlu0 %3810 }
 0x5a4   : > { %9655 = vst [vmem:[#allocation177_spill] sm:$0xff] %v8007_v51  ;;  %9656 = vst [vmem:[#allocation178_spill] sm:$0xff] %v8009_v45  ;;  %v8012_v38 = vsub.f32 %v2154_v17, %v8007_v51  ;;  %3782 = vperm.xlu1 %5816, %v9563_v33   ;;  %4222 = vperm.xlu0 %5823, %v6996_v22   ;;  %v9663_v45 = vand.u32 4294901760, %v9662_v18 }
 0x5a5   : > { %v2155_v20 = vpop.trf.xlu1 }
 0x5a6   : > { %9657 = vst [vmem:[#allocation179_spill] sm:$0xff] %v8012_v38  ;;  %v8016_v46 = vand.u32 4294901760, %v2155_v20  ;;  %v9240_v29 = vand.u32 4294901760, %v8012_v38  ;;  %v2296_v17 = vsub.f32 %v9662_v18, %v9663_v45  ;;  %v9665_v45 = vld [vmem:[#allocation55_spill] sm:$0xff] }
 0x5a7   : > { %v8019_v24 = vpop.permute.xlu0 %3818  ;;  %v9666_v34 = vand.u32 4294901760, %v9665_v45  ;;  %9670 = vst [vmem:[#allocation55_spill] sm:$0xff] %v8051_v48 }
 0x5a8   : > { %9658 = vst [vmem:[#allocation180_spill] sm:$0xff] %v8016_v46  ;;  %9659 = vst [vmem:[#allocation181_spill] sm:$0xff] %v8019_v24  ;;  %v8028_v59 = vsub.f32 %v2155_v20, %v8016_v46  ;;  %3790 = vperm.xlu1 %5816, %v6906_v49   ;;  %5826 = vset.pattern.permute.xlu0 %v9239_v8  ;;  %v2254_v24 = vsub.f32 %v8012_v38, %v9240_v29  ;;  %v2297_v37 = vand.u32 4294901760, %v2296_v17  ;;  %v9668_v29 = vld [vmem:[#allocation56_spill] sm:$0xff] }
 0x5a9   : > { %4267 = vperm.xlu0 %5826, %v9557_v63   ;;  %v2303_v20 = vsub.f32 %v9665_v45, %v9666_v34  ;;  %v9669_v16 = vand.u32 4294901760, %v9668_v29  ;;  %v8056_v17 = vsub.f32 %v7164_v42, %v7164_v42  ;;  %v9716_v63 = vld [vmem:[#allocation95_spill] sm:$0xff] }
 0x5aa   : > { %9664 = vst [vmem:[#allocation53_spill] sm:$0xff] %v8028_v59  ;;  %v2255_v0 = vand.u32 4294901760, %v2254_v24  ;;  %v9241_v56 = vand.u32 4294901760, %v8028_v59 }
 0x5ab   : > { %v2310_v24 = vsub.f32 %v9668_v29, %v9669_v16  ;;  %9671 = vst [vmem:[#allocation56_spill] sm:$0xff] %v8056_v17  ;;  %v2324_v16 = vsub.f32 %v9674_v58, %v9675_v10  ;;  %v8089_v10 = vsub.f32 %v7262_v50, %v7262_v50 }
 0x5ac   : > { %3798 = vperm.xlu1 %5816, %v6923_v13   ;;  %v8041_v23 = vpop.permute.xlu0 %3863  ;;  %5203 = vmatprep.mubr.f32.mxu1 %v2255_v0  ;;  %v2264_v8 = vsub.f32 %v8028_v59, %v9241_v56  ;;  %v5417_v0 = vpack.c.bf16 %v2297_v37, %v2290_v27  ;;  %v2304_v59 = vand.u32 4294901760, %v2303_v20  ;;  %v8070_v37 = vsub.f32 %v7219_v62, %v7219_v62  ;;  %v9678_v27 = vld [vmem:[#allocation129_spill] sm:$0xff] }
 0x5ad   : > { %9667 = vst [vmem:[#allocation54_spill] sm:$0xff] %v8041_v23  ;;  %4279 = vperm.xlu0 %5826, %v9561_v4   ;;  %v9672_v23 = vld [vmem:[#allocation57_spill] sm:$0xff]  ;;  %9682 = vst [vmem:[#allocation183_spill] sm:$0xff] %v8089_v10 }
 0x5ae   : > { %v2265_v34 = vand.u32 4294901760, %v2264_v8  ;;  %v9673_v21 = vand.u32 4294901760, %v9672_v23  ;;  %v2311_v8 = vand.u32 4294901760, %v2310_v24  ;;  %9677 = vst [vmem:[#allocation58_spill] sm:$0xff] %v8070_v37  ;;  %v2325_v24 = vand.u32 4294901760, %v2324_v16 }
 0x5b0   : > { %v2317_v56 = vsub.f32 %v9672_v23, %v9673_v21  ;;  %3806 = vperm.xlu1 %5816, %v6934_v53   ;;  %5204 = vmatmul.mubr.f32.vlgmr.msra.gmra.mrb[0].mxu1 %v2265_v34  ;;  %v8065_v12 = vpop.permute.xlu0 %3875  ;;  %v8077_v21 = vsub.f32 %v7202_v31, %v7202_v31  ;;  %v5421_v34 = vpack.c.bf16 %v2311_v8, %v2304_v59 }
 0x5b1   : > { %9676 = vst [vmem:[#allocation57_spill] sm:$0xff] %v8065_v12  ;;  %5416 = vmatpush3.bf16.msra.mxu1 %v9678_v27  ;;  %4287 = vperm.xlu0 %5826, %v9563_v33   ;;  %v9681_v27 = vand.u32 4294901760, %v8051_v48  ;;  %v8098_v8 = vsub.f32 %v7245_v61, %v7245_v61 }
 0x5b2   : > { %5418 = vmatprep.subr.bf16.mxu1 %v5417_v0  ;;  %9679 = vst [vmem:[#allocation129_spill] sm:$0xff] %v8077_v21  ;;  %5238 = vmatprep.mubr.f32.mxu1 %v8007_v51  ;;  %v2318_v20 = vand.u32 4294901760, %v2317_v56  ;;  %v9683_v56 = vand.u32 4294901760, %v8056_v17  ;;  %v9248_v16 = vand.u32 4294901760, %v8077_v21 }
 0x5b3   : > { %v2338_v12 = vsub.f32 %v8051_v48, %v9681_v27  ;;  %9684 = vst [vmem:[#allocation184_spill] sm:$0xff] %v8098_v8 }
 0x5b4   : > { %3814 = vperm.xlu1 %5816, %v6945_v9   ;;  %v8081_v25 = vpop.permute.xlu0 %3883  ;;  %v2331_v59 = vsub.f32 %v8056_v17, %v9683_v56  ;;  %v5425_v27 = vpack.c.bf16 %v2325_v24, %v2318_v20  ;;  %v8109_v56 = vsub.f32 %v7300_v28, %v7300_v28  ;;  %v9249_v20 = vand.u32 4294901760, %v8098_v8 }
 0x5b5   : > { %9680 = vst [vmem:[#allocation182_spill] sm:$0xff] %v8081_v25  ;;  %5420 = vmatpush3.bf16.msra.mxu1 %v5417_v0  ;;  %4295 = vperm.xlu0 %5826, %v6906_v49   ;;  %v2339_v51 = vand.u32 4294901760, %v2338_v12  ;;  %v9687_v0 = vand.u32 4294901760, %v8070_v37  ;;  %v2345_v12 = vsub.f32 %v8077_v21, %v9248_v16  ;;  %v8119_v24 = vsub.f32 %v7282_v47, %v7282_v47 }
 0x5b6   : > { %5422 = vmatprep.subr.bf16.mxu1 %v5421_v34  ;;  %9688 = vst [vmem:[#allocation186_spill] sm:$0xff] %v8109_v56 }
 0x5b7   : > { %v2352_v49 = vsub.f32 %v8070_v37, %v9687_v0  ;;  %9689 = vst [vmem:[#allocation187_spill] sm:$0xff] %v8119_v24  ;;  %v2346_v16 = vand.u32 4294901760, %v2345_v12 }
 0x5b8   : > { %5817 = vset.pattern.permute.xlu1 %v9685_v54  ;;  %v8101_v25 = vpop.permute.xlu0 %3891  ;;  %v2332_v54 = vand.u32 4294901760, %v2331_v59  ;;  %v9250_v59 = vand.u32 4294901760, %v8109_v56 }
 0x5b9   : > { %9686 = vst [vmem:[#allocation185_spill] sm:$0xff] %v8101_v25  ;;  %5424 = vmatpush3.bf16.msra.mxu1 %v5421_v34  ;;  %3859 = vperm.xlu1 %5817, %v9558_v1   ;;  %v2353_v34 = vand.u32 4294901760, %v2352_v49  ;;  %v9691_v25 = vand.u32 4294901760, %v8089_v10 }
 0x5ba   : > { %5426 = vmatprep.subr.bf16.mxu1 %v5425_v27  ;;  %4303 = vperm.xlu0 %5826, %v6923_v13   ;;  %v5429_v0 = vpack.c.bf16 %v2339_v51, %v2332_v54  ;;  %v2359_v51 = vsub.f32 %v8098_v8, %v9249_v20  ;;  %v9251_v54 = vand.u32 4294901760, %v8119_v24 }
 0x5bb   : > { %v2366_v41 = vsub.f32 %v8089_v10, %v9691_v25  ;;  %v5433_v49 = vpack.c.bf16 %v2353_v34, %v2346_v16  ;;  %v2380_v25 = vsub.f32 %v8109_v56, %v9250_v59  ;;  %v9694_v59 = vld [vmem:[#allocation80_spill] sm:$0xff] }
 0x5bc   : > { %v8121_v35 = vpop.permute.xlu0 %3899  ;;  %v2373_v12 = vsub.f32 %v8119_v24, %v9251_v54 }
 0x5bd   : > { %9690 = vst [vmem:[#allocation188_spill] sm:$0xff] %v8121_v35  ;;  %5428 = vmatpush3.bf16.msra.mxu1 %v5425_v27  ;;  %3867 = vperm.xlu1 %5817, %v9559_v15   ;;  %v2367_v14 = vand.u32 4294901760, %v2366_v41  ;;  %v2360_v27 = vand.u32 4294901760, %v2359_v51  ;;  %v2381_v34 = vand.u32 4294901760, %v2380_v25  ;;  %v9252_v41 = vmov 14   ;;  %v9709_v15 = vld [vmem:[#allocation85_spill] sm:$0xff] }
 0x5be   : > { %5430 = vmatprep.subr.bf16.mxu1 %v5429_v0  ;;  %4311 = vperm.xlu0 %5826, %v6934_v53   ;;  %v3219_v51 = vmul.f32 %v6776_v39, %v9694_v59  ;;  %v9699_v59 = vld [vmem:[#allocation79_spill] sm:$0xff] }
 0x5bf   : > { %v5437_v20 = vpack.c.bf16 %v2367_v14, %v2360_v27  ;;  %v9696_v27 = vld [vmem:[#allocation83_spill] sm:$0xff] }
 0x5c0   : > { %v8133_v35 = vpop.permute.xlu0 %3907  ;;  %v8154_v25 = vmul.f32 %v6790_v43, %v9696_v27  ;;  %v9701_v27 = vld [vmem:[#allocation86_spill] sm:$0xff] }
 0x5c1   : > { %9692 = vst [vmem:[#allocation189_spill] sm:$0xff] %v8133_v35  ;;  %5432 = vmatpush3.bf16.msra.mxu1 %v5429_v0  ;;  %3871 = vperm.xlu1 %5817, %v9560_v6   ;;  %v2374_v0 = vand.u32 4294901760, %v2373_v12  ;;  %v9695_v35 = vld [vmem:[#allocation90_spill] sm:$0xff]  ;;  %v5449_v12 = vpack.c.bf16 %v9662_v18, %v9660_v57  ;;  %v3119_v57 = vmul.f32 %v6784_v26, %v9701_v27  ;;  %v9702_v18 = vld [vmem:[#allocation87_spill] sm:$0xff] }
 0x5c2   : > { %5434 = vmatprep.subr.bf16.mxu1 %v5433_v49  ;;  %4319 = vperm.xlu0 %5826, %v6945_v9   ;;  %v3118_v54 = vmul.f32 %v6776_v39, %v9695_v35  ;;  %v3215_v9 = vmul.f32 %v6810_v55, %v9699_v59  ;;  %v8167_v35 = vpack.c.bf16 %v9668_v29, %v9665_v45  ;;  %v9704_v29 = vld [vmem:[#allocation75_spill] sm:$0xff]  ;;  %v9707_v27 = vld [vmem:[#allocation82_spill] sm:$0xff] }
 0x5c3   : > { %v5441_v14 = vpack.c.bf16 %v2381_v34, %v2374_v0  ;;  %v9700_v34 = vld [vmem:[#allocation78_spill] sm:$0xff]  ;;  %v3216_v45 = vmul.f32 %v6753_v5, %v9704_v29 }
 0x5c4   : > { %v8143_v16 = vpop.permute.xlu0 %3915  ;;  %v3217_v0 = vmul.f32 %v6759_v11, %v9700_v34  ;;  %v9706_v34 = vld [vmem:[#allocation81_spill] sm:$0xff] }
 0x5c5   : > { %9693 = vst [vmem:[#allocation190_spill] sm:$0xff] %v8143_v16  ;;  %5436 = vmatpush3.bf16.msra.mxu1 %v5433_v49  ;;  %3879 = vperm.xlu1 %5817, %v9562_v30   ;;  %v3117_v4 = vmul.f32 %v6770_v32, %v9706_v34  ;;  %v9712_v34 = vld [vmem:[#allocation60_spill] sm:$0xff] }
 0x5c6   : > { %5438 = vmatprep.subr.bf16.mxu1 %v5437_v20  ;;  %5827 = vset.pattern.permute.xlu0 %v9252_v41  ;;  %v9698_v41 = vld [vmem:[#allocation77_spill] sm:$0xff] }
 0x5c7   : > { %4364 = vperm.xlu0 %5827, %v9558_v1   ;;  %v3114_v16 = vmul.f32 %v6810_v55, %v9698_v41  ;;  %v3223_v41 = vmul.f32 %v7164_v42, %v9702_v18  ;;  %v3218_v1 = vmul.f32 %v6770_v32, %v9707_v27  ;;  %v3233_v18 = vmax.f32 %v3217_v0, %v8154_v25  ;;  %v9713_v0 = vld [vmem:[#allocation94_spill] sm:$0xff] }
 0x5c9   : > { %5440 = vmatpush3.bf16.msra.mxu1 %v5437_v20  ;;  %3887 = vperm.xlu1 %5817, %v9564_v36   ;;  %v8157_v49 = vpop.permute.xlu0 %3960  ;;  %v8171_v20 = vpack.c.bf16 %v9674_v58, %v9672_v23  ;;  %v3115_v23 = vmul.f32 %v6753_v5, %v9705_v3  ;;  %v3231_v58 = vmax.f32 %v3215_v9, %v3219_v51  ;;  %v9710_v9 = vld [vmem:[#allocation92_spill] sm:$0xff] }
 0x5ca   : > { %9697 = vst [vmem:[#allocation80_spill] sm:$0xff] %v8157_v49  ;;  %5442 = vmatprep.subr.bf16.mxu1 %v5441_v14  ;;  %v9703_v49 = vld [vmem:[#allocation88_spill] sm:$0xff]  ;;  %v3130_v33 = vmax.f32 %v3114_v16, %v3118_v54  ;;  %v3122_v3 = vmul.f32 %v7164_v42, %v9709_v15  ;;  %v3121_v54 = vmul.f32 %v6796_v52, %v9710_v9  ;;  %v9711_v16 = vld [vmem:[#allocation93_spill] sm:$0xff]  ;;  %v9715_v42 = vld [vmem:[#allocation91_spill] sm:$0xff] }
 0x5cb   : > { %v3220_v59 = vmul.f32 %v6784_v26, %v9703_v49  ;;  %4376 = vperm.xlu0 %5827, %v9560_v6   ;;  %v9708_v6 = vld [vmem:[#allocation84_spill] sm:$0xff]  ;;  %v3222_v51 = vmul.f32 %v6796_v52, %v9711_v16  ;;  %v3131_v27 = vmax.f32 %v3115_v23, %v3119_v57  ;;  %v8201_v25 = vmax.f32 %v3231_v58, %v3223_v41  ;;  %v9717_v57 = vld [vmem:[#allocation98_spill] sm:$0xff] }
 0x5cc   : > { %v3116_v29 = vmul.f32 %v6759_v11, %v9708_v6  ;;  %v9714_v6 = vld [vmem:[#allocation89_spill] sm:$0xff]  ;;  %v3227_v9 = vmul.f32 %v7245_v61, %v9715_v42  ;;  %v3134_v39 = vmax.f32 %v3130_v33, %v3122_v3  ;;  %v3123_v16 = vmul.f32 %v7181_v40, %v9716_v63  ;;  %v9719_v23 = vld [vmem:[#allocation100_spill] sm:$0xff] }
 0x5cd   : > { %5444 = vmatpush3.bf16.msra.mxu1 %v5441_v14  ;;  %3895 = vperm.xlu1 %5817, %v6955_v2   ;;  %v3973_v49 = vpop.permute.xlu0 %3972  ;;  %v3232_v14 = vmax.f32 %v3216_v45, %v3220_v59  ;;  %v3120_v2 = vmul.f32 %v6790_v43, %v9713_v0  ;;  %v3225_v15 = vmul.f32 %v7202_v31, %v9714_v6  ;;  %v9718_v59 = vld [vmem:[#allocation96_spill] sm:$0xff]  ;;  %v9722_v6 = vld [vmem:[#allocation107_spill] sm:$0xff] }
 0x5ce   : > { %5446 = vmatprep.subr.bf16.mxu1 %v9712_v34  ;;  %v3125_v41 = vmul.f32 %v7219_v62, %v9717_v57  ;;  %v3224_v45 = vmul.f32 %v7181_v40, %v9718_v59  ;;  %v3226_v58 = vmul.f32 %v7219_v62, %v9719_v23  ;;  %v3133_v33 = vmax.f32 %v3117_v4, %v3121_v54  ;;  %v9721_v63 = vld [vmem:[#allocation104_spill] sm:$0xff]  ;;  %v9725_v4 = vld [vmem:[#allocation106_spill] sm:$0xff] }
 0x5cf   : > { %4384 = vperm.xlu0 %5827, %v9562_v30   ;;  %v3234_v3 = vmax.f32 %v3218_v1, %v3222_v51  ;;  %v3127_v0 = vmul.f32 %v7262_v50, %v9721_v63  ;;  %v3229_v57 = vmul.f32 %v7282_v47, %v9722_v6  ;;  %v3132_v59 = vmax.f32 %v3116_v29, %v3120_v2  ;;  %v9726_v54 = vld [vmem:[#allocation108_spill] sm:$0xff]  ;;  %v9728_v6 = vld [vmem:[#allocation110_spill] sm:$0xff] }
 0x5d0   : > { %5239 = vmatmul.mubr.f32.vlgmr.msra.gmra.mrb[0].mxu1 %v8016_v46  ;;  %v9723_v46 = vld [vmem:[#allocation103_spill] sm:$0xff]  ;;  %v3126_v1 = vmul.f32 %v7245_v61, %v9725_v4  ;;  %v3129_v51 = vmul.f32 %v7300_v28, %v9726_v54  ;;  %v3135_v63 = vmax.f32 %v3131_v27, %v3123_v16  ;;  %v3128_v2 = vmul.f32 %v7282_v47, %v9728_v6 }
 0x5d1   : > { %5448 = vmatpush3.bf16.msra.mxu1 %v9712_v34  ;;  %5273 = vmatprep.mubr.f32.mxu1 %v8012_v38  ;;  %v8221_v42 = vpop.permute.xlu0 %3980  ;;  %v3124_v23 = vmul.f32 %v7202_v31, %v9723_v46  ;;  %v9724_v34 = vld [vmem:[#allocation105_spill] sm:$0xff]  ;;  %v3137_v29 = vmax.f32 %v3133_v33, %v3125_v41  ;;  %v3236_v46 = vmax.f32 %v3232_v14, %v3224_v45 }
 0x5d2   : > { %9720 = vst [vmem:[#allocation90_spill] sm:$0xff] %v8221_v42  ;;  %3903 = vperm.xlu1 %5817, %v6965_v19   ;;  %5450 = vmatprep.subr.bf16.mxu1 %v5449_v12  ;;  %v3228_v38 = vmul.f32 %v7262_v50, %v9724_v34  ;;  %v9727_v42 = vld [vmem:[#allocation109_spill] sm:$0xff]  ;;  %v3238_v30 = vmax.f32 %v3234_v3, %v3226_v58  ;;  %v9729_v3 = vld [vmem:[#allocation23_spill] sm:$0xff] }
 0x5d3   : > { %4392 = vperm.xlu0 %5827, %v9564_v36   ;;  %v3230_v19 = vmul.f32 %v7300_v28, %v9727_v42  ;;  %v3139_v50 = vmax.f32 %v3135_v63, %v3127_v0  ;;  %v4026_v36 = vmul.f32 %v6770_v32, %v3973_v49  ;;  %v3237_v16 = vmax.f32 %v3233_v18, %v3225_v15  ;;  %v9733_v15 = vld [vmem:[#allocation131_spill] sm:$0xff] }
 0x5d4   : > { %v3239_v42 = vmax.f32 %v8201_v25, %v3227_v9  ;;  %v3136_v4 = vmax.f32 %v3132_v59, %v3124_v23  ;;  %v3240_v54 = vmax.f32 %v3236_v46, %v3228_v38  ;;  %v3138_v14 = vmax.f32 %v3134_v39, %v3126_v1  ;;  %v9734_v1 = vld [vmem:[#allocation132_spill] sm:$0xff] }
 0x5d5   : > { %5452 = vmatpush3.bf16.msra.mxu1 %v5449_v12  ;;  %v3989_v34 = vpop.permute.xlu0 %3988  ;;  %v3141_v41 = vmax.f32 %v3137_v29, %v3129_v51  ;;  %v3242_v12 = vmax.f32 %v3238_v30, %v3230_v19  ;;  %v3241_v58 = vmax.f32 %v3237_v16, %v3229_v57  ;;  %v8249_v49 = vmul.f32 %v6796_v52, %v7365_v60  ;;  %v9731_v19 = vld [vmem:[#allocation133_spill] sm:$0xff]  ;;  %v9737_v16 = vld [vmem:[#allocation19_spill] sm:$0xff] }
 0x5d6   : > { %3911 = vperm.xlu1 %5817, %v6978_v7   ;;  %5454 = vmatprep.subr.bf16.mxu1 %v8167_v35  ;;  %v4030_v27 = vmul.f32 %v6796_v52, %v3989_v34  ;;  %v3140_v33 = vmax.f32 %v3136_v4, %v3128_v2  ;;  %v8253_v0 = vmul.f32 %v6753_v5, %v9729_v3  ;;  %v9735_v2 = vld [vmem:[#allocation21_spill] sm:$0xff]  ;;  %v9736_v34 = vld [vmem:[#allocation18_spill] sm:$0xff]  ;;  %v9738_v4 = vmov 10   ;;  %v9742_v3 = vld [vmem:[#allocation15_spill] sm:$0xff] }
 0x5d7   : > { %4404 = vperm.xlu0 %5827, %v6923_v13   ;;  %v8258_v38 = vmax.f32 %v3138_v14, %v3139_v50  ;;  %v5461_v39 = vpack.c.bf16 %v8051_v48, %v8056_v17  ;;  %v5465_v60 = vpack.c.bf16 %v8070_v37, %v8077_v21  ;;  %v8268_v30 = vmul.f32 %v6770_v32, %v9731_v19  ;;  %v9739_v14 = vld [vmem:[#allocation14_spill] sm:$0xff]  ;;  %v9743_v19 = vld [vmem:[#allocation17_spill] sm:$0xff]  ;;  %v9763_v21 = vld [vmem:[#allocation20_spill] sm:$0xff] }
 0x5d8   : > { %v4042_v45 = vmax.f32 %v4026_v36, %v4030_v27  ;;  %v9732_v36 = vld [vmem:[#allocation134_spill] sm:$0xff]  ;;  %v8272_v25 = vmax.f32 %v3239_v42, %v3240_v54  ;;  %v8277_v50 = vpack.c.bf16 %v8089_v10, %v8098_v8  ;;  %v8281_v9 = vmul.f32 %v6810_v55, %v9733_v15  ;;  %v9762_v8 = vld [vmem:[#allocation136_spill] sm:$0xff] }
 0x5d9   : > { %5456 = vmatpush3.bf16.msra.mxu1 %v8167_v35  ;;  %v8256_v18 = vpop.permute.xlu0 %3996  ;;  %v3321_v35 = vmul.f32 %v6784_v26, %v9732_v36  ;;  %v8283_v57 = vmax.f32 %v3140_v33, %v3141_v41  ;;  %v8285_v59 = vmax.f32 %v3241_v58, %v3242_v12  ;;  %v8289_v23 = vpack.c.bf16 %v8109_v56, %v8119_v24  ;;  %v9740_v12 = vld [vmem:[#allocation16_spill] sm:$0xff]  ;;  %v9741_v33 = vld [vmem:[#allocation35_spill] sm:$0xff]  ;;  %v9744_v36 = vld [vmem:[#allocation50_spill] sm:$0xff] }
 0x5da   : > { %9730 = vst [vmem:[#allocation83_spill] sm:$0xff] %v8256_v18  ;;  %3919 = vperm.xlu1 %5817, %v6996_v22   ;;  %5458 = vmatprep.subr.bf16.mxu1 %v8171_v20  ;;  %v8293_v51 = vmul.f32 %v6759_v11, %v9734_v1  ;;  %v3020_v29 = vmul.f32 %v6796_v52, %v9735_v2  ;;  %v9746_v2 = vld [vmem:[#allocation111_spill] sm:$0xff]  ;;  %v9754_v18 = vld [vmem:[#allocation124_spill] sm:$0xff] }
 0x5db   : > { %4412 = vperm.xlu0 %5827, %v6934_v53   ;;  %v3333_v6 = vmax.f32 %v8253_v0, %v3321_v35  ;;  %v3018_v27 = vmul.f32 %v6784_v26, %v9736_v34  ;;  %v3019_v42 = vmul.f32 %v6790_v43, %v9737_v16  ;;  %v3014_v41 = vmul.f32 %v6753_v5, %v9739_v14  ;;  %v9747_v34 = vld [vmem:[#allocation112_spill] sm:$0xff] }
 0x5dc   : > { %v3016_v58 = vmul.f32 %v6770_v32, %v9740_v12  ;;  %v3015_v0 = vmul.f32 %v6759_v11, %v9742_v3  ;;  %v3017_v35 = vmul.f32 %v9744_v36, %v9743_v19  ;;  %v3023_v16 = vmul.f32 %v7202_v31, %v9747_v34  ;;  %v9750_v12 = vld [vmem:[#allocation13_spill] sm:$0xff] }
 0x5dd   : > { %5460 = vmatpush3.bf16.msra.mxu1 %v8171_v20  ;;  %v4005_v46 = vpop.permute.xlu0 %4004  ;;  %v3024_v20 = vmul.f32 %v7219_v62, %v7692_v44  ;;  %v9748_v44 = vld [vmem:[#allocation121_spill] sm:$0xff]  ;;  %v3013_v3 = vmul.f32 %v6810_v55, %v9750_v12  ;;  %v3030_v63 = vmax.f32 %v3014_v41, %v3018_v27  ;;  %v9760_v12 = vld [vmem:[#allocation39_spill] sm:$0xff] }
 0x5de   : > { %5820 = vset.pattern.permute.xlu1 %v9738_v4  ;;  %5462 = vmatprep.subr.bf16.mxu1 %v5461_v39  ;;  %v4034_v54 = vmul.f32 %v7219_v62, %v4005_v46  ;;  %v3032_v1 = vmax.f32 %v3016_v58, %v3020_v29  ;;  %v3022_v46 = vmul.f32 %v7181_v40, %v9746_v2  ;;  %v9753_v2 = vld [vmem:[#allocation114_spill] sm:$0xff]  ;;  %v9755_v34 = vld [vmem:[#allocation117_spill] sm:$0xff] }
 0x5df   : > { %3964 = vperm.xlu1 %5820, %v9741_v33   ;;  %4424 = vperm.xlu0 %5827, %v6996_v22   ;;  %v3028_v4 = vmul.f32 %v7300_v28, %v9748_v44  ;;  %v3031_v19 = vmax.f32 %v3015_v0, %v3019_v42  ;;  %v3026_v56 = vmul.f32 %v9754_v18, %v9753_v2  ;;  %v9756_v44 = vld [vmem:[#allocation41_spill] sm:$0xff]  ;;  %v9758_v42 = vld [vmem:[#allocation24_spill] sm:$0xff]  ;;  %v9821_v22 = vld [vmem:[#allocation150_spill] sm:$0xff] }
 0x5e0   : > { %v8319_v15 = vmax.f32 %v4042_v45, %v4034_v54  ;;  %v9751_v45 = vld [vmem:[#allocation22_spill] sm:$0xff]  ;;  %v9752_v54 = vld [vmem:[#allocation120_spill] sm:$0xff]  ;;  %v3036_v58 = vmax.f32 %v3032_v1, %v3024_v20  ;;  %v3027_v24 = vmul.f32 %v7282_v47, %v9755_v34  ;;  %v3320_v41 = vmul.f32 %v9744_v36, %v9758_v42  ;;  %v9759_v0 = vld [vmem:[#allocation25_spill] sm:$0xff] }
 0x5e1   : > { %5464 = vmatpush3.bf16.msra.mxu1 %v5461_v39  ;;  %v8327_v14 = vpop.permute.xlu0 %4012  ;;  %v3021_v29 = vmul.f32 %v9752_v54, %v9751_v45  ;;  %v9280_v39 = vmov 15   ;;  %v3322_v20 = vmul.f32 %v6790_v43, %v9759_v0  ;;  %v3029_v1 = vmax.f32 %v3013_v3, %v3017_v35  ;;  %v9761_v34 = vld [vmem:[#allocation113_spill] sm:$0xff] }
 0x5e2   : > { %9745 = vst [vmem:[#allocation77_spill] sm:$0xff] %v8319_v15  ;;  %9749 = vst [vmem:[#allocation79_spill] sm:$0xff] %v8327_v14  ;;  %5466 = vmatprep.subr.bf16.mxu1 %v5465_v60  ;;  %v9757_v14 = vld [vmem:[#allocation135_spill] sm:$0xff]  ;;  %v3034_v45 = vmax.f32 %v3030_v63, %v3022_v46  ;;  %v3035_v2 = vmax.f32 %v3031_v19, %v3023_v16  ;;  %v3025_v33 = vmul.f32 %v7245_v61, %v9761_v34  ;;  %v9767_v19 = vld [vmem:[#allocation137_spill] sm:$0xff] }
 0x5e3   : > { %3968 = vperm.xlu1 %5820, %v9756_v44   ;;  %5833 = vset.pattern.permute.xlu0 %v9280_v39  ;;  %v3325_v27 = vmul.f32 %v7181_v40, %v9757_v14  ;;  %v3040_v10 = vmax.f32 %v3036_v58, %v3028_v4  ;;  %v3327_v14 = vmul.f32 %v7219_v62, %v9762_v8  ;;  %v9765_v63 = vld [vmem:[#allocation11_spill] sm:$0xff]  ;;  %v9768_v58 = vld [vmem:[#allocation10_spill] sm:$0xff] }
 0x5e4   : > { %4465 = vperm.xlu0 %5833, %v9760_v12   ;;  %v3324_v42 = vmul.f32 %v9752_v54, %v9763_v21  ;;  %v3326_v46 = vmul.f32 %v7202_v31, %v9765_v63  ;;  %v3033_v16 = vmax.f32 %v3029_v1, %v3021_v29  ;;  %v3038_v3 = vmax.f32 %v3034_v45, %v3026_v56  ;;  %v9770_v29 = vld [vmem:[#allocation115_spill] sm:$0xff]  ;;  %v9775_v63 = vld [vmem:[#allocation130_spill] sm:$0xff] }
 0x5e5   : > { %5468 = vmatpush3.bf16.msra.mxu1 %v5465_v60  ;;  %v4021_v39 = vpop.permute.xlu0 %4020  ;;  %v3337_v37 = vmax.f32 %v3333_v6, %v3325_v27  ;;  %v3039_v4 = vmax.f32 %v3035_v2, %v3027_v24  ;;  %v9766_v60 = vld [vmem:[#allocation46_spill] sm:$0xff]  ;;  %v3329_v8 = vmul.f32 %v9754_v18, %v9767_v19  ;;  %v3332_v6 = vmax.f32 %v8281_v9, %v3320_v41  ;;  %v9769_v27 = vld [vmem:[#allocation49_spill] sm:$0xff]  ;;  %v9773_v34 = vld [vmem:[#allocation59_spill] sm:$0xff] }
 0x5e6   : > { %5470 = vmatprep.subr.bf16.mxu1 %v8277_v50  ;;  %v8354_v35 = vmul.f32 %v7300_v28, %v4021_v39  ;;  %v3328_v21 = vmul.f32 %v7245_v61, %v9768_v58  ;;  %v3334_v0 = vmax.f32 %v8293_v51, %v3322_v20  ;;  %v3331_v56 = vmul.f32 %v7300_v28, %v9770_v29  ;;  %v9783_v29 = vld [vmem:[#allocation32_spill] sm:$0xff]  ;;  %v9794_v39 = vld [vmem:[#allocation69_spill] sm:$0xff] }
 0x5e7   : > { %3976 = vperm.xlu1 %5820, %v9766_v60   ;;  %v3037_v24 = vmax.f32 %v3033_v16, %v3025_v33  ;;  %v3042_v1 = vmax.f32 %v3039_v4, %v3040_v10  ;;  %v3336_v45 = vmax.f32 %v3332_v6, %v3324_v42  ;;  %v8373_v9 = vmax.f32 %v8258_v38, %v8283_v57  ;;  %v9774_v38 = vld [vmem:[#allocation12_spill] sm:$0xff]  ;;  %v9777_v4 = vld [vmem:[#allocation66_spill] sm:$0xff]  ;;  %v9781_v6 = vld [vmem:[#allocation127_spill] sm:$0xff] }
 0x5e8   : > { %9764 = vst [vmem:[#allocation78_spill] sm:$0xff] %v8354_v35  ;;  %4477 = vperm.xlu0 %5833, %v9769_v27   ;;  %v8377_v41 = vmax.f32 %v8272_v25, %v8285_v59  ;;  %v9772_v51 = vmax.f32 %v8268_v30, %v8249_v49  ;;  %v3338_v10 = vmax.f32 %v3334_v0, %v3326_v46  ;;  %v9776_v59 = vld [vmem:[#allocation99_spill] sm:$0xff]  ;;  %v9778_v30 = vld [vmem:[#allocation101_spill] sm:$0xff] }
 0x5e9   : > { %5472 = vmatpush3.bf16.msra.mxu1 %v8277_v50  ;;  %v3341_v20 = vmax.f32 %v3337_v37, %v3329_v8  ;;  %v3041_v50 = vmax.f32 %v3037_v24, %v3038_v3  ;;  %v3340_v42 = vmax.f32 %v3336_v45, %v3328_v21  ;;  %v3330_v57 = vmul.f32 %v7282_v47, %v9774_v38  ;;  %v9780_v3 = vld [vmem:[#allocation116_spill] sm:$0xff]  ;;  %v9782_v21 = vld [vmem:[#allocation138_spill] sm:$0xff]  ;;  %v9790_v38 = vld [vmem:[#allocation139_spill] sm:$0xff] }
 0x5ea   : > { %5474 = vmatprep.subr.bf16.mxu1 %v8289_v23  ;;  %v8380_v2 = vpop.permute.xlu0 %4065  ;;  %v3339_v33 = vmax.f32 %v9772_v51, %v3327_v14  ;;  %v3421_v25 = vmul.f32 %v9744_v36, %v9775_v63  ;;  %v3422_v16 = vmul.f32 %v6784_v26, %v9776_v59  ;;  %v3423_v37 = vmul.f32 %v6790_v43, %v9778_v30  ;;  %v9779_v14 = vld [vmem:[#allocation102_spill] sm:$0xff]  ;;  %v9791_v59 = vld [vmem:[#allocation31_spill] sm:$0xff]  ;;  %v9820_v60 = vld [vmem:[#allocation45_spill] sm:$0xff] }
 0x5eb   : > { %9771 = vst [vmem:[#allocation86_spill] sm:$0xff] %v8380_v2  ;;  %3984 = vperm.xlu1 %5820, %v9773_v34   ;;  %v8393_v49 = vmax.f32 %v3041_v50, %v3042_v1  ;;  %v3424_v46 = vmul.f32 %v6796_v52, %v9779_v14  ;;  %v3418_v8 = vmul.f32 %v6753_v5, %v9780_v3  ;;  %v9784_v24 = vmov 1.0|1.0   ;;  %v9785_v1 = vld [vmem:[#allocation26_spill] sm:$0xff]  ;;  %v9792_v14 = vld [vmem:[#allocation65_spill] sm:$0xff] }
 0x5ec   : > { %4485 = vperm.xlu0 %5833, %v9777_v4   ;;  %v3343_v19 = vmax.f32 %v3339_v33, %v3331_v56  ;;  %v3417_v58 = vmul.f32 %v6810_v55, %v9781_v6  ;;  %v3425_v0 = vmul.f32 %v9752_v54, %v9782_v21  ;;  %v3426_v56 = vmul.f32 %v7181_v40, %v9783_v29  ;;  %v9788_v51 = vld [vmem:[#allocation118_spill] sm:$0xff]  ;;  %v9789_v33 = vld [vmem:[#allocation119_spill] sm:$0xff]  ;;  %v9793_v29 = vld [vmem:[#allocation53_spill] sm:$0xff] }
 0x5ed   : > { %5476 = vmatpush3.bf16.msra.mxu1 %v8289_v23  ;;  %vm9786_vm7 = vnez %v9785_v1  ;;  %v3419_v23 = vmul.f32 %v6759_v11, %v9788_v51  ;;  %v3420_v50 = vmul.f32 %v6770_v32, %v9789_v33  ;;  %v3427_v63 = vmul.f32 %v7202_v31, %v9790_v38  ;;  %v9795_v33 = vld [vmem:[#allocation179_spill] sm:$0xff] }
 0x5ee   : > { %5478 = vmatprep.subr.msk.bf16.mxu1 %vm9786_vm7, %v9784_v24  ;;  %v8411_v45 = vpop.permute.xlu0 %4077  ;;  %v3428_v30 = vmul.f32 %v7219_v62, %v9791_v59  ;;  %v3342_v3 = vmax.f32 %v3338_v10, %v3330_v57  ;;  %v3433_v6 = vmax.f32 %v3417_v58, %v3421_v25  ;;  %v3434_v21 = vmax.f32 %v3418_v8, %v3422_v16  ;;  %v9801_v8 = vld [vmem:[#allocation34_spill] sm:$0xff] }
 0x5ef   : > { %9787 = vst [vmem:[#allocation87_spill] sm:$0xff] %v8411_v45  ;;  %3992 = vperm.xlu1 %5820, %v9792_v14   ;;  %v8424_v2 = vmax.f32 %v3340_v42, %v3341_v20  ;;  %v3435_v51 = vmax.f32 %v3419_v23, %v3423_v37  ;;  %v3436_v45 = vmax.f32 %v3420_v50, %v3424_v46  ;;  %v9796_v38 = vand.u32 4294901760, %v9795_v33  ;;  %v9797_v20 = vld [vmem:[#allocation27_spill] sm:$0xff]  ;;  %v9800_v37 = vld [vmem:[#allocation140_spill] sm:$0xff]  ;;  %v9808_v33 = vld [vmem:[#allocation142_spill] sm:$0xff] }
 0x5f0   : > { %5274 = vmatmul.mubr.f32.vlgmr.msra.gmra.mrb[0].mxu1 %v9793_v29  ;;  %4493 = vperm.xlu0 %5833, %v9794_v39   ;;  %v8431_v59 = vmax.f32 %v3342_v3, %v3343_v19  ;;  %v8434_v57 = vmax.f32 %v3433_v6, %v3425_v0  ;;  %v8436_v25 = vmax.f32 %v3434_v21, %v3426_v56  ;;  %v9802_v0 = vld [vmem:[#allocation33_spill] sm:$0xff]  ;;  %v9803_v23 = vld [vmem:[#allocation36_spill] sm:$0xff]  ;;  %v9805_v6 = vld [vmem:[#allocation143_spill] sm:$0xff] }
 0x5f1   : > { %5480 = vmatpush3.bf16.msk.msra.mxu1 %vm9786_vm7, %v9784_v24  ;;  %5308 = vmatprep.mubr.f32.mxu1 %v9796_v38  ;;  %vm9798_vm1 = vnez %v9797_v20  ;;  %v8443_v16 = vmax.f32 %v3435_v51, %v3427_v63  ;;  %v8447_v46 = vmul.f32 %v7245_v61, %v9800_v37  ;;  %v8449_v19 = vmax.f32 %v3436_v45, %v3428_v30  ;;  %v9804_v63 = vld [vmem:[#allocation42_spill] sm:$0xff]  ;;  %v9806_v30 = vld [vmem:[#allocation71_spill] sm:$0xff]  ;;  %v9807_v21 = vld [vmem:[#allocation141_spill] sm:$0xff] }
 0x5f2   : > { %5482 = vmatprep.subr.msk.bf16.mxu1 %vm9798_vm1, %v9784_v24  ;;  %v8441_v42 = vpop.permute.xlu0 %4085  ;;  %v8453_v58 = vmul.f32 %v9754_v18, %v9801_v8  ;;  %v8458_v56 = vmul.f32 %v7282_v47, %v9802_v0  ;;  %v3522_v50 = vmul.f32 %v9744_v36, %v9803_v23  ;;  %v3523_v3 = vmul.f32 %v6784_v26, %v9804_v63  ;;  %v9809_v37 = vld [vmem:[#allocation37_spill] sm:$0xff]  ;;  %v9810_v0 = vld [vmem:[#allocation146_spill] sm:$0xff]  ;;  %v9811_v63 = vld [vmem:[#allocation40_spill] sm:$0xff] }
 0x5f3   : > { %9799 = vst [vmem:[#allocation88_spill] sm:$0xff] %v8441_v42  ;;  %4000 = vperm.xlu1 %5820, %v6923_v13   ;;  %v3524_v45 = vmul.f32 %v6790_v43, %v9805_v6  ;;  %v8469_v51 = vmul.f32 %v7300_v28, %v9807_v21  ;;  %v3518_v38 = vmul.f32 %v6810_v55, %v9808_v33  ;;  %v9812_v10 = vld [vmem:[#allocation38_spill] sm:$0xff]  ;;  %v9813_v42 = vld [vmem:[#allocation48_spill] sm:$0xff]  ;;  %v9814_v33 = vld [vmem:[#allocation43_spill] sm:$0xff] }
 0x5f4   : > { %4501 = vperm.xlu0 %5833, %v9806_v30   ;;  %v3519_v8 = vmul.f32 %v6753_v5, %v9809_v37  ;;  %v3525_v23 = vmul.f32 %v6796_v52, %v9810_v0  ;;  %v3520_v6 = vmul.f32 %v6759_v11, %v9811_v63  ;;  %v3526_v21 = vmul.f32 %v9752_v54, %v9812_v10  ;;  %v9815_v37 = vld [vmem:[#allocation28_spill] sm:$0xff]  ;;  %v9819_v20 = vld [vmem:[#allocation47_spill] sm:$0xff]  ;;  %v9846_v29 = vld [vmem:[#allocation154_spill] sm:$0xff] }
 0x5f5   : > { %5484 = vmatpush3.bf16.msk.msra.mxu1 %vm9798_vm1, %v9784_v24  ;;  %v3527_v35 = vmul.f32 %v7181_v40, %v9813_v42  ;;  %v3528_v15 = vmul.f32 %v7202_v31, %v9814_v33  ;;  %vm9816_vm12 = vnez %v9815_v37  ;;  %v9818_v14 = vld [vmem:[#allocation144_spill] sm:$0xff]  ;;  %v3529_v42 = vmul.f32 %v7219_v62, %v9819_v20 }
 0x5f6   : > { %5486 = vmatprep.subr.msk.bf16.mxu1 %vm9816_vm12, %v9784_v24  ;;  %v8491_v0 = vpop.permute.xlu0 %4093  ;;  %v3521_v10 = vmul.f32 %v6770_v32, %v9818_v14  ;;  %v3534_v33 = vmax.f32 %v3518_v38, %v3522_v50  ;;  %v3535_v34 = vmax.f32 %v3519_v8, %v3523_v3  ;;  %v3536_v1 = vmax.f32 %v3520_v6, %v3524_v45  ;;  %v9823_v8 = vld [vmem:[#allocation29_spill] sm:$0xff] }
 0x5f7   : > { %9817 = vst [vmem:[#allocation75_spill] sm:$0xff] %v8491_v0  ;;  %4008 = vperm.xlu1 %5820, %v6934_v53   ;;  %v3532_v0 = vmul.f32 %v7282_v47, %v9820_v60  ;;  %v3443_v13 = vmax.f32 %v8443_v16, %v8458_v56  ;;  %v3444_v63 = vmax.f32 %v8449_v19, %v8469_v51  ;;  %v9822_v60 = vld [vmem:[#allocation160_spill] sm:$0xff] }
 0x5f8   : > { %4517 = vperm.xlu0 %5833, %v6978_v7   ;;  %v3537_v14 = vmax.f32 %v3521_v10, %v3525_v23  ;;  %v3533_v20 = vmul.f32 %v7300_v28, %v9821_v22  ;;  %v3538_v50 = vmax.f32 %v3534_v33, %v3526_v21  ;;  %v3539_v3 = vmax.f32 %v3535_v34, %v3527_v35  ;;  %v9826_v22 = vld [vmem:[#allocation51_spill] sm:$0xff]  ;;  %v9827_v23 = vld [vmem:[#allocation158_spill] sm:$0xff]  ;;  %v9828_v35 = vld [vmem:[#allocation52_spill] sm:$0xff] }
 0x5f9   : > { %5488 = vmatpush3.bf16.msk.msra.mxu1 %vm9816_vm12, %v9784_v24  ;;  %v3540_v45 = vmax.f32 %v3536_v1, %v3528_v15  ;;  %v3625_v38 = vmul.f32 %v6790_v43, %v9822_v60  ;;  %vm9824_vm10 = vnez %v9823_v8  ;;  %v3531_v51 = vmul.f32 %v9754_v18, %v9826_v22  ;;  %v9829_v34 = vld [vmem:[#allocation70_spill] sm:$0xff]  ;;  %v9830_v1 = vld [vmem:[#allocation145_spill] sm:$0xff]  ;;  %v9831_v33 = vld [vmem:[#allocation155_spill] sm:$0xff] }
 0x5fa   : > { %5490 = vmatprep.subr.msk.bf16.mxu1 %vm9824_vm10, %v9784_v24  ;;  %v8519_v16 = vpop.permute.xlu1 %3669  ;;  %v8521_v19 = vpop.permute.xlu0 %4101  ;;  %v3541_v56 = vmax.f32 %v3537_v14, %v3529_v42  ;;  %v3623_v6 = vmul.f32 %v9744_v36, %v9827_v23  ;;  %v3626_v15 = vmul.f32 %v6796_v52, %v9828_v35  ;;  %v3530_v21 = vmul.f32 %v7245_v61, %v9830_v1  ;;  %v9833_v22 = vld [vmem:[#allocation44_spill] sm:$0xff]  ;;  %v9834_v23 = vld [vmem:[#allocation147_spill] sm:$0xff]  ;;  %v9842_v8 = vld [vmem:[#allocation153_spill] sm:$0xff] }
 0x5fb   : > { %9825 = vst [vmem:[#allocation76_spill] sm:$0xff] %v8521_v19  ;;  %4016 = vperm.xlu1 %5820, %v9829_v34   ;;  %v3544_v10 = vmax.f32 %v3540_v45, %v3532_v0  ;;  %v3621_v60 = vmul.f32 %v6759_v11, %v9831_v33  ;;  %v9832_v19 = vld [vmem:[#allocation165_spill] sm:$0xff]  ;;  %v3619_v53 = vmul.f32 %v6810_v55, %v9833_v22  ;;  %v9835_v35 = vld [vmem:[#allocation148_spill] sm:$0xff]  ;;  %v9836_v45 = vld [vmem:[#allocation163_spill] sm:$0xff] }
 0x5fc   : > { %v3629_v42 = vmul.f32 %v7202_v31, %v9832_v19  ;;  %v3545_v14 = vmax.f32 %v3541_v56, %v3533_v20  ;;  %v3622_v37 = vmul.f32 %v6770_v32, %v9834_v23  ;;  %v3624_v34 = vmul.f32 %v6784_v26, %v9835_v35  ;;  %v9837_v33 = vld [vmem:[#allocation151_spill] sm:$0xff]  ;;  %v9838_v19 = vld [vmem:[#allocation170_spill] sm:$0xff]  ;;  %v9844_v7 = vld [vmem:[#allocation149_spill] sm:$0xff] }
 0x5fd   : > { %5492 = vmatpush3.bf16.msk.msra.mxu1 %vm9824_vm10, %v9784_v24  ;;  %v3637_v0 = vmax.f32 %v3621_v60, %v3625_v38  ;;  %v3627_v1 = vmul.f32 %v9752_v54, %v9836_v45  ;;  %v3630_v20 = vmul.f32 %v7219_v62, %v9837_v33  ;;  %v3633_v56 = vmul.f32 %v7282_v47, %v9838_v19  ;;  %v9839_v22 = vld [vmem:[#allocation122_spill] sm:$0xff]  ;;  %v9845_v19 = vld [vmem:[#allocation167_spill] sm:$0xff] }
 0x5fe   : > { %vm9840_vm0 = vnez %v9839_v22  ;;  %v3678_v23 = vpop.permute.xlu1 %3677  ;;  %v8554_v35 = vpop.permute.xlu0 %4109  ;;  %v3543_v48 = vmax.f32 %v3539_v3, %v3531_v51  ;;  %v3620_v38 = vmul.f32 %v6753_v5, %v9842_v8  ;;  %v3635_v60 = vmax.f32 %v3619_v53, %v3623_v6 }
 0x5ff   : > { %5494 = vmatprep.subr.msk.bf16.mxu1 %vm9840_vm0, %v9784_v24  ;;  %9841 = vst [vmem:[#allocation81_spill] sm:$0xff] %v8554_v35  ;;  %v3638_v17 = vmax.f32 %v3622_v37, %v3626_v15  ;;  %v9843_v45 = vmov 11   ;;  %v3628_v33 = vmul.f32 %v7181_v40, %v9844_v7  ;;  %v3641_v30 = vmax.f32 %v3637_v0, %v3629_v42  ;;  %v9847_v7 = vld [vmem:[#allocation152_spill] sm:$0xff]  ;;  %v9848_v42 = vld [vmem:[#allocation123_spill] sm:$0xff] }
 0x600   : > { %5821 = vset.pattern.permute.xlu1 %v9843_v45  ;;  %v3631_v47 = vmul.f32 %v7245_v61, %v9845_v19  ;;  %v3634_v39 = vmul.f32 %v7300_v28, %v9846_v29  ;;  %v3446_v3 = vmax.f32 %v3443_v13, %v3444_v63  ;;  %v3542_v51 = vmax.f32 %v3538_v50, %v3530_v21  ;;  %v9857_v19 = vld [vmem:[#allocation128_spill] sm:$0xff] }
 0x601   : > { %4061 = vperm.xlu1 %5821, %v9760_v12   ;;  %v3547_v35 = vmax.f32 %v3544_v10, %v3545_v14  ;;  %v3636_v8 = vmax.f32 %v3620_v38, %v3624_v34  ;;  %5496 = vmatpush3.bf16.msk.msra.mxu1 %vm9840_vm0, %v9784_v24  ;;  %v3639_v53 = vmax.f32 %v3635_v60, %v3627_v1  ;;  %v3145_v63 = vrot.slane %v8373_v9, 4 }
 0x602   : > { %v3642_v37 = vmax.f32 %v3638_v17, %v3630_v20  ;;  %v3632_v6 = vmul.f32 %v9754_v18, %v9847_v7  ;;  %v3645_v15 = vmax.f32 %v3641_v30, %v3633_v56  ;;  %vm9849_vm5 = vnez %v9848_v42  ;;  %v3686_v29 = vpop.permute.xlu1 %3685  ;;  %v8574_v0 = vpop.permute.xlu0 %4117  ;;  %v9859_v7 = vld [vmem:[#allocation172_spill] sm:$0xff] }
 0x603   : > { %5498 = vmatprep.subr.msk.bf16.mxu1 %vm9849_vm5, %v9784_v24  ;;  %9850 = vst [vmem:[#allocation82_spill] sm:$0xff] %v8574_v0  ;;  %v3346_v13 = vmax.f32 %v8424_v2, %v8431_v59  ;;  %v9851_v50 = vrot.slane %v8393_v49, 4  ;;  %v9852_v34 = vmax.f32 %v8436_v25, %v8453_v58  ;;  %v9853_v30 = vmax.f32 %v8434_v57, %v8447_v46  ;;  %v9854_v58 = vld [vmem:[#allocation125_spill] sm:$0xff] }
 0x604   : > { %v3546_v10 = vmax.f32 %v3542_v51, %v3543_v48  ;;  %v3640_v14 = vmax.f32 %v3636_v8, %v3628_v33  ;;  %v3643_v1 = vmax.f32 %v3639_v53, %v3631_v47  ;;  %v3646_v20 = vmax.f32 %v3642_v37, %v3634_v39 }
 0x605   : > { %v3045_v17 = vmax.f32 %v8393_v49, %v9851_v50  ;;  %v3445_v21 = vmax.f32 %v9853_v30, %v9852_v34  ;;  %4069 = vperm.xlu1 %5821, %v9756_v44   ;;  %5500 = vmatpush3.bf16.msk.msra.mxu1 %vm9849_vm5, %v9784_v24  ;;  %v3246_v49 = vrot.slane %v8377_v41, 4  ;;  %vm9855_vm9 = vnez %v9854_v58  ;;  %v9862_v34 = vld [vmem:[#allocation159_spill] sm:$0xff]  ;;  %v9918_v58 = vld [vmem:[#allocation54_spill] sm:$0xff] }
 0x606   : > { %v3548_v59 = vmax.f32 %v3546_v10, %v3547_v35  ;;  %v3644_v56 = vmax.f32 %v3640_v14, %v3632_v6  ;;  %v3648_v25 = vmax.f32 %v3645_v15, %v3646_v20  ;;  %5502 = vmatprep.subr.msk.bf16.mxu1 %vm9855_vm9, %v9784_v24  ;;  %v3694_v48 = vpop.permute.xlu1 %3693  ;;  %v3347_v57 = vrot.slane %v3346_v13, 4  ;;  %v9864_v20 = vld [vmem:[#allocation161_spill] sm:$0xff] }
 0x607   : > { %v3447_v2 = vmax.f32 %v3445_v21, %v3446_v3  ;;  %v3146_v47 = vmax.f32 %v8373_v9, %v3145_v63  ;;  %v3046_v39 = vrot.slane %v3045_v17, 2  ;;  %v8597_v46 = vpop.permute.xlu0 %4162  ;;  %v8604_v35 = vmax.f32 %v8377_v41, %v3246_v49  ;;  %v9860_v41 = vld [vmem:[#allocation157_spill] sm:$0xff]  ;;  %v9861_v63 = vld [vmem:[#allocation175_spill] sm:$0xff] }
 0x608   : > { %9856 = vst [vmem:[#allocation84_spill] sm:$0xff] %v8597_v46  ;;  %v3647_v38 = vmax.f32 %v3643_v1, %v3644_v56  ;;  %v3549_v45 = vrot.slane %v3548_v59, 4  ;;  %vm9858_vm8 = vnez %v9857_v19  ;;  %v8609_v3 = vmax.f32 %v3346_v13, %v3347_v57  ;;  %v9865_v56 = vld [vmem:[#allocation162_spill] sm:$0xff] }
 0x609   : > { %4073 = vperm.xlu1 %5821, %v9769_v27   ;;  %v3448_v60 = vrot.slane %v3447_v2, 4  ;;  %5504 = vmatpush3.bf16.msk.msra.mxu1 %vm9855_vm9, %v9784_v24  ;;  %v3147_v51 = vrot.slane %v3146_v47, 2  ;;  %v8611_v8 = vmax.f32 %v3045_v17, %v3046_v39  ;;  %v3725_v53 = vmul.f32 %v6784_v26, %v3678_v23  ;;  %v9863_v17 = vld [vmem:[#allocation156_spill] sm:$0xff] }
 0x60a   : > { %v3649_v33 = vmax.f32 %v3647_v38, %v3648_v25  ;;  %5506 = vmatprep.subr.msk.bf16.mxu1 %vm9858_vm8, %v9784_v24  ;;  %v3702_v9 = vpop.permute.xlu1 %3701  ;;  %v3720_v6 = vmul.f32 %v6810_v55, %v9859_v7  ;;  %v3724_v15 = vmul.f32 %v9744_v36, %v9860_v41  ;;  %v3722_v50 = vmul.f32 %v6759_v11, %v9861_v63  ;;  %v9868_v7 = vld [vmem:[#allocation164_spill] sm:$0xff]  ;;  %v9869_v63 = vld [vmem:[#allocation69_spill] sm:$0xff] }
 0x60b   : > { %v4175_v37 = vpop.permute.xlu0 %4174  ;;  %v3726_v30 = vmul.f32 %v6790_v43, %v9862_v34  ;;  %v3449_v13 = vmax.f32 %v3447_v2, %v3448_v60  ;;  %v3721_v21 = vmul.f32 %v6753_v5, %v9863_v17  ;;  %v3727_v23 = vmul.f32 %v6796_v52, %v3686_v29  ;;  %v9866_v2 = vld [vmem:[#allocation61_spill] sm:$0xff] }
 0x60c   : > { %v3729_v10 = vmul.f32 %v7181_v40, %v3694_v48  ;;  %v3550_v14 = vmax.f32 %v3548_v59, %v3549_v45  ;;  %v3650_v1 = vrot.slane %v3649_v33, 4  ;;  %v3728_v49 = vmul.f32 %v9752_v54, %v9864_v20  ;;  %v9870_v34 = vld [vmem:[#allocation53_spill] sm:$0xff] }
 0x60d   : > { %4081 = vperm.xlu1 %5821, %v9777_v4   ;;  %5508 = vmatpush3.bf16.msk.msra.mxu1 %vm9858_vm8, %v9784_v24  ;;  %v3730_v25 = vmul.f32 %v7202_v31, %v9865_v56  ;;  %v3723_v29 = vmul.f32 %v6770_v32, %v8519_v16  ;;  %v3737_v39 = vmax.f32 %v3721_v21, %v3725_v53  ;;  %v9871_v17 = vand.u32 4294901760, %v9870_v34  ;;  %v9872_v16 = vld [vmem:[#allocation166_spill] sm:$0xff] }
 0x60e   : > { %5510 = vmatprep.subr.bf16.mxu1 %v9866_v2  ;;  %v3710_v57 = vpop.permute.xlu1 %3709  ;;  %v3731_v48 = vmul.f32 %v7219_v62, %v3702_v9  ;;  %v3736_v59 = vmax.f32 %v3720_v6, %v3724_v15  ;;  %v3738_v45 = vmax.f32 %v3722_v50, %v3726_v30  ;;  %v3732_v41 = vmul.f32 %v7245_v61, %v9868_v7  ;;  %v9873_v53 = vld [vmem:[#allocation126_spill] sm:$0xff] }
 0x60f   : > { %v3733_v38 = vmul.f32 %v9754_v18, %v3710_v57  ;;  %v8639_v60 = vpop.permute.xlu0 %4182  ;;  %v3248_v20 = vrot.slane %v8604_v35, 2  ;;  %v3734_v21 = vmul.f32 %v9873_v53, %v9872_v16  ;;  %v3739_v9 = vmax.f32 %v3723_v29, %v3727_v23  ;;  %v9874_v57 = vld [vmem:[#allocation177_spill] sm:$0xff]  ;;  %v9875_v7 = vld [vmem:[#allocation62_spill] sm:$0xff]  ;;  %v9876_v29 = vld [vmem:[#allocation71_spill] sm:$0xff] }
 0x610   : > { %9867 = vst [vmem:[#allocation85_spill] sm:$0xff] %v8639_v60  ;;  %5309 = vmatmul.mubr.f32.vlgmr.msra.gmra.mrb[0].mxu1 %v9871_v17  ;;  %v3741_v56 = vmax.f32 %v3737_v39, %v3729_v10  ;;  %v3349_v6 = vrot.slane %v8609_v3, 2  ;;  %v3148_v15 = vmax.f32 %v3146_v47, %v3147_v51  ;;  %v3651_v50 = vmax.f32 %v3649_v33, %v3650_v1 }
 0x611   : > { %4089 = vperm.xlu1 %5821, %v9869_v63   ;;  %5512 = vmatpush3.bf16.msra.mxu1 %v9866_v2  ;;  %v3740_v30 = vmax.f32 %v3736_v59, %v3728_v49  ;;  %v3742_v17 = vmax.f32 %v3738_v45, %v3730_v25  ;;  %v3743_v46 = vmax.f32 %v3739_v9, %v3731_v48  ;;  %v3048_v23 = vrot.slane %v8611_v8, 1 }
 0x612   : > { %5343 = vmatprep.mubr.f32.mxu1 %v9874_v57  ;;  %5514 = vmatprep.subr.bf16.mxu1 %v9875_v7  ;;  %v3718_v34 = vpop.permute.xlu1 %3717  ;;  %v3745_v60 = vmax.f32 %v3741_v56, %v3733_v38  ;;  %v3450_v10 = vrot.slane %v3449_v13, 2  ;;  %v4228_v2 = vmul.f32 %v6770_v32, %v4175_v37  ;;  %v3551_v33 = vrot.slane %v3550_v14, 2  ;;  %v9877_v38 = vld [vmem:[#allocation63_spill] sm:$0xff] }
 0x613   : > { %v3735_v0 = vmul.f32 %v7300_v28, %v3718_v34  ;;  %v4191_v16 = vpop.permute.xlu0 %4190  ;;  %v3744_v51 = vmax.f32 %v3740_v30, %v3732_v41  ;;  %v3746_v1 = vmax.f32 %v3742_v17, %v3734_v21  ;;  %v3249_v25 = vmax.f32 %v8604_v35, %v3248_v20 }
 0x614   : > { %v4232_v47 = vmul.f32 %v6796_v52, %v4191_v16  ;;  %v3652_v39 = vrot.slane %v3651_v50, 2  ;;  %v3149_v59 = vrot.slane %v3148_v15, 1  ;;  %v3451_v34 = vmax.f32 %v3449_v13, %v3450_v10  ;;  %v9878_v16 = vld [vmem:[#allocation72_spill] sm:$0xff] }
 0x615   : > { %4097 = vperm.xlu1 %5821, %v9876_v29   ;;  %v3747_v49 = vmax.f32 %v3743_v46, %v3735_v0  ;;  %5516 = vmatpush3.bf16.msra.mxu1 %v9875_v7  ;;  %v3748_v45 = vmax.f32 %v3744_v51, %v3745_v60  ;;  %v3350_v0 = vmax.f32 %v8609_v3, %v3349_v6  ;;  %v3250_v20 = vrot.slane %v3249_v25, 1  ;;  %v9879_v60 = vld [vmem:[#allocation64_spill] sm:$0xff]  ;;  %v9883_v6 = vld [vmem:[#allocation55_spill] sm:$0xff] }
 0x616   : > { %v4244_v48 = vmax.f32 %v4228_v2, %v4232_v47  ;;  %5518 = vmatprep.subr.bf16.mxu1 %v9877_v38  ;;  %v3049_v46 = vmax.f32 %v8611_v8, %v3048_v23  ;;  %v3552_v41 = vmax.f32 %v3550_v14, %v3551_v33  ;;  %v3653_v21 = vmax.f32 %v3651_v50, %v3652_v39  ;;  %v9880_v2 = vld [vmem:[#allocation73_spill] sm:$0xff]  ;;  %v9881_v8 = vld [vmem:[#allocation56_spill] sm:$0xff] }
 0x617   : > { %v3749_v9 = vmax.f32 %v3746_v1, %v3747_v49  ;;  %v8661_v37 = vpop.permute.xlu1 %3762  ;;  %v8663_v56 = vpop.permute.xlu0 %4198  ;;  %v3150_v30 = vmax.f32 %v3148_v15, %v3149_v59  ;;  %v3452_v10 = vrot.slane %v3451_v34, 1  ;;  %v9882_v14 = vand.u32 4294901760, %v9881_v8  ;;  %v9885_v8 = vld [vmem:[#allocation74_spill] sm:$0xff] }
 0x618   : > { %v9884_v23 = vand.u32 4294901760, %v9883_v6  ;;  %v3351_v33 = vrot.slane %v3350_v0, 1  ;;  %v3553_v51 = vrot.slane %v3552_v41, 1  ;;  %v3251_v1 = vmax.f32 %v3249_v25, %v3250_v20 }
 0x619   : > { %4105 = vperm.xlu1 %5821, %v9878_v16   ;;  %v3750_v35 = vmax.f32 %v3748_v45, %v3749_v9  ;;  %5520 = vmatpush3.bf16.msra.mxu1 %v9877_v38  ;;  %v4568_v50 = vsel %vm4567_vm15, %v3049_v46, %v3150_v30  ;;  %v3654_v49 = vrot.slane %v3653_v21, 1  ;;  %v9886_v46 = vld [vmem:[#allocation129_spill] sm:$0xff]  ;;  %v9888_v30 = vld [vmem:[#allocation58_spill] sm:$0xff] }
 0x61a   : > { %5522 = vmatprep.subr.bf16.mxu1 %v9879_v60  ;;  %v5525_v47 = vpack.c.bf16 %v9884_v23, %v9882_v14  ;;  %v4570_v9 = vsel %vm4569_vm14, %v4568_v50, %v3251_v1  ;;  %v3352_v20 = vmax.f32 %v3350_v0, %v3351_v33  ;;  %v9890_v50 = vmov 12   ;;  %v9893_v33 = vld [vmem:[#allocation183_spill] sm:$0xff]  ;;  %v4565_v1 = vld [vmem:[#allocation6] sm:$0xff] }
 0x61b   : > { %v3751_v7 = vrot.slane %v3750_v35, 4  ;;  %v8670_v17 = vpop.permute.xlu1 %3766  ;;  %v4207_v13 = vpop.permute.xlu0 %4206 }
 0x61c   : > { %v4236_v3 = vmul.f32 %v7219_v62, %v4207_v13  ;;  %v3453_v13 = vmax.f32 %v3451_v34, %v3452_v10  ;;  %v4572_v14 = vsel %vm4571_vm11, %v4570_v9, %v3352_v20 }
 0x61d   : > { %4113 = vperm.xlu1 %5821, %v9880_v2   ;;  %v3752_v15 = vmax.f32 %v3750_v35, %v3751_v7  ;;  %5524 = vmatpush3.bf16.msra.mxu1 %v9879_v60  ;;  %v9887_v35 = vand.u32 4294901760, %v9886_v46  ;;  %v9889_v60 = vand.u32 4294901760, %v9888_v30 }
 0x61e   : > { %v8680_v39 = vmax.f32 %v4244_v48, %v4236_v3  ;;  %5526 = vmatprep.subr.bf16.mxu1 %v5525_v47  ;;  %v3554_v48 = vmax.f32 %v3552_v41, %v3553_v51  ;;  %v3655_v3 = vmax.f32 %v3653_v21, %v3654_v49  ;;  %v4574_v23 = vsel %vm4573_vm3, %v4572_v14, %v3453_v13  ;;  %v9891_v41 = vld [vmem:[#allocation184_spill] sm:$0xff]  ;;  %v9898_v14 = vld [vmem:[#allocation186_spill] sm:$0xff] }
 0x61f   : > { %v3753_v38 = vrot.slane %v3752_v15, 2  ;;  %v8682_v59 = vpop.permute.xlu1 %3774  ;;  %v8684_v45 = vpop.permute.xlu0 %4214  ;;  %v5529_v25 = vpack.c.bf16 %v9889_v60, %v9887_v35  ;;  %v9894_v21 = vand.u32 4294901760, %v9893_v33  ;;  %v9896_v60 = vld [vmem:[#allocation187_spill] sm:$0xff]  ;;  %v9905_v33 = vld [vmem:[#allocation65_spill] sm:$0xff] }
 0x620   : > { %v9897_v20 = vand.u32 4294901760, %v9896_v60 }
 0x621   : > { %4121 = vperm.xlu1 %5821, %v9885_v8   ;;  %v3754_v7 = vmax.f32 %v3752_v15, %v3753_v38  ;;  %5528 = vmatpush3.bf16.msra.mxu1 %v5525_v47  ;;  %v9892_v47 = vand.u32 4294901760, %v9891_v41  ;;  %v4576_v15 = vsel %vm4575_vm6, %v4574_v23, %v3554_v48  ;;  %v9895_v38 = vld [vmem:[#allocation35_spill] sm:$0xff]  ;;  %v9899_v48 = vand.u32 4294901760, %v9898_v14  ;;  %v9902_v23 = vld [vmem:[#allocation180_spill] sm:$0xff] }
 0x622   : > { %5530 = vmatprep.subr.bf16.mxu1 %v5529_v25  ;;  %v4578_v9 = vsel %vm4577_vm13, %v4576_v15, %v3655_v3  ;;  %v9907_v15 = vld [vmem:[#allocation57_spill] sm:$0xff] }
 0x623   : > { %v3755_v6 = vrot.slane %v3754_v7, 1  ;;  %v8693_v34 = vpop.permute.xlu1 %3782  ;;  %v4223_v10 = vpop.permute.xlu0 %4222  ;;  %v5533_v51 = vpack.c.bf16 %v9894_v21, %v9892_v47  ;;  %v9913_v21 = vld [vmem:[#allocation68_spill] sm:$0xff] }
 0x624   : > { %v8698_v0 = vmul.f32 %v7300_v28, %v4223_v10  ;;  %v5537_v10 = vpack.c.bf16 %v9899_v48, %v9897_v20  ;;  %v9911_v20 = vld [vmem:[#allocation182_spill] sm:$0xff] }
 0x625   : > { %5824 = vset.pattern.permute.xlu1 %v9890_v50  ;;  %v3756_v49 = vmax.f32 %v3754_v7, %v3755_v6  ;;  %5532 = vmatpush3.bf16.msra.mxu1 %v5529_v25  ;;  %v9900_v7 = vld [vmem:[#allocation46_spill] sm:$0xff]  ;;  %v9903_v50 = vld [vmem:[#allocation59_spill] sm:$0xff]  ;;  %v3928_v14 = vmul.f32 %v6790_v43, %v9911_v20 }
 0x626   : > { %4166 = vperm.xlu1 %5824, %v9895_v38   ;;  %5534 = vmatprep.subr.bf16.mxu1 %v5533_v51 }
 0x627   : > { %v4580_v46 = vsel %vm4579_vm2, %v4578_v9, %v3756_v49  ;;  %v8710_v35 = vpop.permute.xlu1 %3790  ;;  %v9916_v9 = vld [vmem:[#allocation70_spill] sm:$0xff] }
 0x628   : > { %v4588_v30 = vmax.f32 %v4565_v1, %v4580_v46  ;;  %v9908_v1 = vld [vmem:[#allocation67_spill] sm:$0xff]  ;;  %v9910_v46 = vld [vmem:[#allocation185_spill] sm:$0xff] }
 0x629   : > { %5536 = vmatpush3.bf16.msra.mxu1 %v5533_v51 }
 0x62a   : > { %4170 = vperm.xlu1 %5824, %v9756_v44   ;;  %4590 = vst [vmem:[#allocation6] sm:$0xff] %v4588_v30  ;;  %5538 = vmatprep.subr.bf16.mxu1 %v5537_v10  ;;  %v3930_v30 = vmul.f32 %v9752_v54, %v9910_v46 }
 0x62b   : > { %v8717_v25 = vpop.permute.xlu1 %3798 }
 0x62d   : > { %5540 = vmatpush3.bf16.msra.mxu1 %v5537_v10  ;;  %v9912_v10 = vld [vmem:[#allocation189_spill] sm:$0xff] }
 0x62e   : > { %4178 = vperm.xlu1 %5824, %v9900_v7   ;;  %5542 = vmatprep.subr.msk.bf16.mxu1 %vm9786_vm7, %v9784_v24  ;;  %v3934_v3 = vmul.f32 %v7245_v61, %v9912_v10  ;;  %v9915_v10 = vld [vmem:[#allocation190_spill] sm:$0xff] }
 0x62f   : > { %v8723_v6 = vpop.permute.xlu1 %3806 }
 0x630   : > { %5344 = vmatmul.mubr.f32.vlgmr.msra.gmra.mrb[0].mxu1 %v9902_v23 }
 0x631   : > { %5544 = vmatpush3.bf16.msk.msra.mxu1 %vm9786_vm7, %v9784_v24  ;;  %5378 = vmatprep.mubr.f32.mxu1 %v9874_v57  ;;  %v3926_v57 = vmul.f32 %v9744_v36, %v9907_v15  ;;  %v9914_v15 = vld [vmem:[#allocation188_spill] sm:$0xff] }
 0x632   : > { %4186 = vperm.xlu1 %5824, %v9903_v50   ;;  %5546 = vmatprep.subr.msk.bf16.mxu1 %vm9798_vm1, %v9784_v24 }
 0x633   : > { %v8734_v47 = vpop.permute.xlu1 %3814 }
 0x635   : > { %5548 = vmatpush3.bf16.msk.msra.mxu1 %vm9798_vm1, %v9784_v24 }
 0x636   : > { %4194 = vperm.xlu1 %5824, %v9905_v33   ;;  %5550 = vmatprep.subr.msk.bf16.mxu1 %vm9816_vm12, %v9784_v24 }
 0x638   : > { %v3860_v51 = vpop.permute.xlu1 %3859 }
 0x639   : > { %5552 = vmatpush3.bf16.msk.msra.mxu1 %vm9816_vm12, %v9784_v24  ;;  %v3922_v49 = vmul.f32 %v6810_v55, %v3860_v51 }
 0x63a   : > { %4202 = vperm.xlu1 %5824, %v9908_v1   ;;  %5554 = vmatprep.subr.msk.bf16.mxu1 %vm9824_vm10, %v9784_v24 }
 0x63b   : > { %v3938_v60 = vmax.f32 %v3922_v49, %v3926_v57  ;;  %v3932_v57 = vmul.f32 %v7202_v31, %v9914_v15 }
 0x63c   : > { %v3868_v48 = vpop.permute.xlu1 %3867 }
 0x63d   : > { %v3942_v41 = vmax.f32 %v3938_v60, %v3930_v30  ;;  %5556 = vmatpush3.bf16.msk.msra.mxu1 %vm9824_vm10, %v9784_v24  ;;  %v3924_v51 = vmul.f32 %v6759_v11, %v3868_v48  ;;  %v3936_v30 = vmul.f32 %v9873_v53, %v9915_v10 }
 0x63e   : > { %4210 = vperm.xlu1 %5824, %v9913_v21   ;;  %5558 = vmatprep.subr.msk.bf16.mxu1 %vm9840_vm0, %v9784_v24 }
 0x63f   : > { %v3940_v49 = vmax.f32 %v3924_v51, %v3928_v14  ;;  %v3946_v46 = vmax.f32 %v3942_v41, %v3934_v3  ;;  %v9917_v14 = vmov 13   ;;  %v3923_v41 = vmul.f32 %v6753_v5, %v9918_v58 }
 0x640   : > { %v3872_v20 = vpop.permute.xlu1 %3871 }
 0x641   : > { %v3944_v60 = vmax.f32 %v3940_v49, %v3932_v57  ;;  %5560 = vmatpush3.bf16.msk.msra.mxu1 %vm9840_vm0, %v9784_v24  ;;  %v3925_v19 = vmul.f32 %v6770_v32, %v3872_v20 }
 0x642   : > { %4218 = vperm.xlu1 %5824, %v9916_v9   ;;  %5562 = vmatprep.subr.msk.bf16.mxu1 %vm9849_vm5, %v9784_v24 }
 0x643   : > { %v3948_v48 = vmax.f32 %v3944_v60, %v3936_v30 }
 0x644   : > { %v3880_v13 = vpop.permute.xlu1 %3879 }
 0x645   : > { %5564 = vmatpush3.bf16.msk.msra.mxu1 %vm9849_vm5, %v9784_v24  ;;  %v3927_v3 = vmul.f32 %v6784_v26, %v3880_v13 }
 0x646   : > { %5825 = vset.pattern.permute.xlu1 %v9917_v14  ;;  %5566 = vmatprep.subr.msk.bf16.mxu1 %vm9855_vm9, %v9784_v24 }
 0x647   : > { %4263 = vperm.xlu1 %5825, %v9760_v12  }
 0x648   : > { %v3888_v22 = vpop.permute.xlu1 %3887 }
 0x649   : > { %5568 = vmatpush3.bf16.msk.msra.mxu1 %vm9855_vm9, %v9784_v24  ;;  %v3929_v51 = vmul.f32 %v6796_v52, %v3888_v22 }
 0x64a   : > { %5570 = vmatprep.subr.msk.bf16.mxu1 %vm9858_vm8, %v9784_v24 }
 0x64b   : > { %4271 = vperm.xlu1 %5825, %v9756_v44   ;;  %v3941_v13 = vmax.f32 %v3925_v19, %v3929_v51  ;;  %v9921_v19 = vld [vmem:[#allocation79_spill] sm:$0xff] }
 0x64c   : > { %v3896_v42 = vpop.permute.xlu1 %3895 }
 0x64d   : > { %5572 = vmatpush3.bf16.msk.msra.mxu1 %vm9858_vm8, %v9784_v24  ;;  %v3931_v15 = vmul.f32 %v7181_v40, %v3896_v42  ;;  %v3939_v24 = vmax.f32 %v3923_v41, %v3927_v3  ;;  %v9920_v41 = vld [vmem:[#allocation83_spill] sm:$0xff] }
 0x64e   : > { %v4032_v51 = vmul.f32 %v7181_v40, %v9920_v41 }
 0x64f   : > { %4275 = vperm.xlu1 %5825, %v9769_v27   ;;  %v3943_v49 = vmax.f32 %v3939_v24, %v3931_v15  ;;  %v3822_v24 = vmul.f32 %v6753_v5, %v8661_v37 }
 0x650   : > { %5379 = vmatmul.mubr.f32.vlgmr.msra.gmra.mrb[0].mxu1 %v9902_v23 }
 0x651   : > { %v3904_v12 = vpop.permute.xlu1 %3903 }
 0x652   : > { %v3933_v27 = vmul.f32 %v7219_v62, %v3904_v12  ;;  %v9919_v12 = vld [vmem:[#allocation90_spill] sm:$0xff] }
 0x653   : > { %4283 = vperm.xlu1 %5825, %v9777_v4   ;;  %v4028_v3 = vmul.f32 %v6784_v26, %v9919_v12  ;;  %v9926_v12 = vld [vmem:[#allocation176_spill] sm:$0xff] }
 0x654   : > { %v3945_v10 = vmax.f32 %v3941_v13, %v3933_v27  ;;  %v3827_v27 = vmul.f32 %v6790_v43, %v8693_v34  ;;  %v9924_v34 = vld [vmem:[#allocation168_spill] sm:$0xff] }
 0x655   : > { %v3912_v57 = vpop.permute.xlu1 %3911 }
 0x656   : > { %v3935_v23 = vmul.f32 %v9754_v18, %v3912_v57 }
 0x657   : > { %4291 = vperm.xlu1 %5825, %v9869_v63  }
 0x658   : > { %v3947_v30 = vmax.f32 %v3943_v49, %v3935_v23  ;;  %v9922_v23 = vld [vmem:[#allocation173_spill] sm:$0xff] }
 0x659   : > { %v3920_v4 = vpop.permute.xlu1 %3919  ;;  %v3828_v13 = vmul.f32 %v6796_v52, %v9922_v23 }
 0x65a   : > { %v3937_v60 = vmul.f32 %v7300_v28, %v3920_v4  ;;  %v3950_v22 = vmax.f32 %v3946_v46, %v3947_v30  ;;  %v4036_v46 = vmul.f32 %v9754_v18, %v9921_v19  ;;  %v9923_v4 = vld [vmem:[#allocation171_spill] sm:$0xff]  ;;  %v3823_v30 = vmul.f32 %v6759_v11, %v8670_v17  ;;  %v9928_v19 = vld [vmem:[#allocation181_spill] sm:$0xff] }
 0x65b   : > { %4299 = vperm.xlu1 %5825, %v9876_v29  }
 0x65c   : > { %v3949_v14 = vmax.f32 %v3945_v10, %v3937_v60  ;;  %v3826_v10 = vmul.f32 %v6784_v26, %v9923_v4  ;;  %v3825_v60 = vmul.f32 %v9744_v36, %v8682_v59  ;;  %v3839_v17 = vmax.f32 %v3823_v30, %v3827_v27 }
 0x65d   : > { %v3829_v59 = vmul.f32 %v9752_v54, %v8710_v35  ;;  %v3833_v4 = vmul.f32 %v7245_v61, %v8723_v6 }
 0x65e   : > { %v3951_v42 = vmax.f32 %v3948_v48, %v3949_v14  ;;  %v3965_v20 = vpop.permute.xlu1 %3964  ;;  %v3831_v14 = vmul.f32 %v7202_v31, %v8717_v25  ;;  %v3835_v25 = vmul.f32 %v9873_v53, %v8734_v47 }
 0x65f   : > { %4307 = vperm.xlu1 %5825, %v9878_v16   ;;  %v4024_v63 = vmul.f32 %v6753_v5, %v3965_v20 }
 0x660   : > { %v8814_v58 = vmax.f32 %v3950_v22, %v3951_v42  ;;  %v3821_v22 = vmul.f32 %v6810_v55, %v9924_v34  ;;  %v9925_v42 = vld [vmem:[#allocation169_spill] sm:$0xff]  ;;  %v3843_v23 = vmax.f32 %v3839_v17, %v3831_v14  ;;  %v9930_v34 = vld [vmem:[#allocation80_spill] sm:$0xff] }
 0x661   : > { %v4040_v15 = vmax.f32 %v4024_v63, %v4028_v3  ;;  %v3824_v20 = vmul.f32 %v6770_v32, %v9925_v42  ;;  %v3832_v3 = vmul.f32 %v7219_v62, %v9926_v12  ;;  %v3838_v63 = vmax.f32 %v3822_v24, %v3826_v10 }
 0x662   : > { %v3969_v57 = vpop.permute.xlu1 %3968  ;;  %v9929_v24 = vmov 14   ;;  %v3847_v30 = vmax.f32 %v3843_v23, %v3835_v25  ;;  %v4023_v42 = vmul.f32 %v6810_v55, %v9930_v34 }
 0x663   : > { %4315 = vperm.xlu1 %5825, %v9880_v2   ;;  %v4044_v48 = vmax.f32 %v4040_v15, %v4032_v51  ;;  %v3840_v41 = vmax.f32 %v3824_v20, %v3828_v13  ;;  %v9927_v51 = vld [vmem:[#allocation174_spill] sm:$0xff] }
 0x664   : > { %v3830_v15 = vmul.f32 %v7181_v40, %v9927_v51  ;;  %v9931_v20 = vld [vmem:[#allocation178_spill] sm:$0xff] }
 0x665   : > { %v4048_v49 = vmax.f32 %v4044_v48, %v4036_v46  ;;  %v3836_v46 = vmul.f32 %v7300_v28, %v9928_v19  ;;  %v3837_v48 = vmax.f32 %v3821_v22, %v3825_v60  ;;  %v3844_v47 = vmax.f32 %v3840_v41, %v3832_v3 }
 0x666   : > { %v3977_v37 = vpop.permute.xlu1 %3976  ;;  %v3842_v13 = vmax.f32 %v3838_v63, %v3830_v15  ;;  %v3834_v60 = vmul.f32 %v9754_v18, %v9931_v20  ;;  %v3953_v15 = vrot.slane %v8814_v58, 4 }
 0x667   : > { %4323 = vperm.xlu1 %5825, %v9885_v8   ;;  %v4027_v35 = vmul.f32 %v9744_v36, %v3977_v37  ;;  %v3841_v10 = vmax.f32 %v3837_v48, %v3829_v59  ;;  %v3848_v14 = vmax.f32 %v3844_v47, %v3836_v46  ;;  %v4025_v46 = vmul.f32 %v6759_v11, %v3969_v57 }
 0x668   : > { %v3846_v37 = vmax.f32 %v3842_v13, %v3834_v60  ;;  %v3954_v13 = vmax.f32 %v8814_v58, %v3953_v15  ;;  %v9932_v60 = vld [vmem:[#allocation77_spill] sm:$0xff]  ;;  %v9938_v15 = vld [vmem:[#allocation88_spill] sm:$0xff] }
 0x669   : > { %v3845_v22 = vmax.f32 %v3841_v10, %v3833_v4  ;;  %v4039_v12 = vmax.f32 %v4023_v42, %v4027_v35  ;;  %v3850_v51 = vmax.f32 %v3847_v30, %v3848_v14  ;;  %v9933_v14 = vld [vmem:[#allocation78_spill] sm:$0xff] }
 0x66a   : > { %v3985_v27 = vpop.permute.xlu1 %3984  ;;  %v3955_v20 = vrot.slane %v3954_v13, 2 }
 0x66b   : > { %5828 = vset.pattern.permute.xlu1 %v9929_v24  ;;  %v3849_v63 = vmax.f32 %v3845_v22, %v3846_v37  ;;  %v4029_v41 = vmul.f32 %v6790_v43, %v3985_v27  ;;  %v9934_v22 = vmax.f32 %v9932_v60, %v9933_v14  ;;  %v9936_v37 = vld [vmem:[#allocation87_spill] sm:$0xff]  ;;  %v9941_v14 = vld [vmem:[#allocation82_spill] sm:$0xff] }
 0x66c   : > { %4368 = vperm.xlu1 %5828, %v9895_v38   ;;  %v4128_v58 = vmul.f32 %v9744_v36, %v9936_v37 }
 0x66d   : > { %v3851_v25 = vmax.f32 %v3849_v63, %v3850_v51  ;;  %v4041_v35 = vmax.f32 %v4025_v46, %v4029_v41  ;;  %v9937_v63 = vld [vmem:[#allocation75_spill] sm:$0xff] }
 0x66e   : > { %v3993_v6 = vpop.permute.xlu1 %3992 }
 0x66f   : > { %v4031_v17 = vmul.f32 %v9752_v54, %v3993_v6  ;;  %v3852_v4 = vrot.slane %v3851_v25, 4 }
 0x670   : > { %4372 = vperm.xlu1 %5828, %v9756_v44  }
 0x671   : > { %v4043_v3 = vmax.f32 %v4039_v12, %v4031_v17  ;;  %v3853_v42 = vmax.f32 %v3851_v25, %v3852_v4  ;;  %v9935_v12 = vmov 15   ;;  %v3956_v25 = vmax.f32 %v3954_v13, %v3955_v20 }
 0x672   : > { %v4001_v59 = vpop.permute.xlu1 %4000 }
 0x673   : > { %v4033_v48 = vmul.f32 %v7202_v31, %v4001_v59  ;;  %v3854_v51 = vrot.slane %v3853_v42, 2  ;;  %v4132_v59 = vmul.f32 %v9752_v54, %v9937_v63  ;;  %v3957_v13 = vrot.slane %v3956_v25, 1 }
 0x674   : > { %4380 = vperm.xlu1 %5828, %v9900_v7  }
 0x675   : > { %v4045_v30 = vmax.f32 %v4041_v35, %v4033_v48  ;;  %v3855_v35 = vmax.f32 %v3853_v42, %v3854_v51  ;;  %v3958_v37 = vmax.f32 %v3956_v25, %v3957_v13 }
 0x676   : > { %v4009_v19 = vpop.permute.xlu1 %4008 }
 0x677   : > { %v4035_v23 = vmul.f32 %v7245_v61, %v4009_v19  ;;  %v4130_v19 = vmul.f32 %v6790_v43, %v9938_v15 }
 0x678   : > { %4388 = vperm.xlu1 %5828, %v9903_v50  }
 0x679   : > { %v4047_v47 = vmax.f32 %v4043_v3, %v4035_v23  ;;  %v9939_v23 = vld [vmem:[#allocation81_spill] sm:$0xff] }
 0x67a   : > { %v4017_v10 = vpop.permute.xlu1 %4016  ;;  %v4136_v4 = vmul.f32 %v7245_v61, %v9939_v23 }
 0x67b   : > { %v4051_v34 = vmax.f32 %v4047_v47, %v4048_v49  ;;  %v4037_v27 = vmul.f32 %v9873_v53, %v4017_v10 }
 0x67c   : > { %4396 = vperm.xlu1 %5828, %v9905_v33  }
 0x67d   : > { %v4049_v57 = vmax.f32 %v4045_v30, %v4037_v27  ;;  %v9940_v30 = vld [vmem:[#allocation76_spill] sm:$0xff] }
 0x67f   : > { %v4052_v6 = vmax.f32 %v4049_v57, %v9934_v22  ;;  %v4138_v22 = vmul.f32 %v9873_v53, %v9941_v14 }
 0x680   : > { %5829 = vset.pattern.permute.xlu1 %v9935_v12  ;;  %v4062_v17 = vpop.permute.xlu1 %4061 }
 0x681   : > { %v4124_v49 = vmul.f32 %v6810_v55, %v4062_v17  ;;  %4469 = vperm.xlu1 %5829, %v9895_v38   ;;  %v4053_v3 = vmax.f32 %v4051_v34, %v4052_v6  ;;  %v4134_v34 = vmul.f32 %v7202_v31, %v9940_v30  ;;  %v3856_v6 = vrot.slane %v3855_v35, 1 }
 0x683   : > { %v4140_v41 = vmax.f32 %v4124_v49, %v4128_v58  ;;  %v4054_v46 = vrot.slane %v4053_v3, 4  ;;  %v9942_v49 = vld [vmem:[#allocation86_spill] sm:$0xff]  ;;  %v3857_v63 = vmax.f32 %v3855_v35, %v3856_v6  ;;  %v9943_v6 = vld [vmem:[#allocation85_spill] sm:$0xff] }
 0x684   : > { %v4070_v48 = vpop.permute.xlu1 %4069 }
 0x685   : > { %v4144_v47 = vmax.f32 %v4140_v41, %v4132_v59  ;;  %v4126_v10 = vmul.f32 %v6759_v11, %v4070_v48  ;;  %4473 = vperm.xlu1 %5829, %v9756_v44   ;;  %v4055_v38 = vmax.f32 %v4053_v3, %v4054_v46  ;;  %v4125_v3 = vmul.f32 %v6753_v5, %v9942_v49 }
 0x686   : > { %v4581_v15 = vsel %vm4567_vm15, %v3857_v63, %v3958_v37 }
 0x687   : > { %v4142_v27 = vmax.f32 %v4126_v10, %v4130_v19  ;;  %v4148_v57 = vmax.f32 %v4144_v47, %v4136_v4  ;;  %v4056_v20 = vrot.slane %v4055_v38, 2 }
 0x688   : > { %v4074_v60 = vpop.permute.xlu1 %4073 }
 0x689   : > { %v4146_v17 = vmax.f32 %v4142_v27, %v4134_v34  ;;  %4481 = vperm.xlu1 %5829, %v9900_v7   ;;  %v4057_v42 = vmax.f32 %v4055_v38, %v4056_v20  ;;  %v4127_v25 = vmul.f32 %v6770_v32, %v4074_v60 }
 0x68b   : > { %v4150_v58 = vmax.f32 %v4146_v17, %v4138_v22  ;;  %v4058_v44 = vrot.slane %v4057_v42, 1  ;;  %v4230_v17 = vmul.f32 %v6784_v26, %v9943_v6 }
 0x68c   : > { %v4082_v51 = vpop.permute.xlu1 %4081 }
 0x68d   : > { %v4129_v59 = vmul.f32 %v6784_v26, %v4082_v51  ;;  %4489 = vperm.xlu1 %5829, %v9903_v50   ;;  %v4059_v41 = vmax.f32 %v4057_v42, %v4058_v44 }
 0x68f   : > { %v4141_v19 = vmax.f32 %v4125_v3, %v4129_v59  ;;  %v4582_v46 = vsel %vm4569_vm14, %v4581_v15, %v4059_v41  ;;  %v9944_v59 = vld [vmem:[#allocation84_spill] sm:$0xff] }
 0x690   : > { %v4090_v7 = vpop.permute.xlu1 %4089 }
 0x691   : > { %v4131_v48 = vmul.f32 %v6796_v52, %v4090_v7  ;;  %5830 = vset.pattern.permute.xlu1 %v9929_v24 }
 0x692   : > { %4400 = vperm.xlu1 %5830, %v9876_v29  }
 0x693   : > { %v4143_v23 = vmax.f32 %v4127_v25, %v4131_v48 }
 0x694   : > { %v4098_v4 = vpop.permute.xlu1 %4097 }
 0x695   : > { %v4133_v35 = vmul.f32 %v7181_v40, %v4098_v4 }
 0x696   : > { %4408 = vperm.xlu1 %5830, %v9878_v16  }
 0x697   : > { %v4145_v50 = vmax.f32 %v4141_v19, %v4133_v35 }
 0x698   : > { %v4106_v47 = vpop.permute.xlu1 %4105 }
 0x699   : > { %v4135_v10 = vmul.f32 %v7219_v62, %v4106_v47 }
 0x69a   : > { %5831 = vset.pattern.permute.xlu1 %v9935_v12 }
 0x69b   : > { %v4147_v38 = vmax.f32 %v4143_v23, %v4135_v10  ;;  %4497 = vperm.xlu1 %5831, %v9905_v33  }
 0x69c   : > { %v4114_v30 = vpop.permute.xlu1 %4113 }
 0x69d   : > { %v4137_v34 = vmul.f32 %v9754_v18, %v4114_v30 }
 0x69f   : > { %v4149_v13 = vmax.f32 %v4145_v50, %v4137_v34  ;;  %4505 = vperm.xlu1 %5831, %v9908_v1   ;;  %v4234_v1 = vmul.f32 %v7181_v40, %v8663_v56 }
 0x6a0   : > { %v4122_v29 = vpop.permute.xlu1 %4121 }
 0x6a1   : > { %v4152_v27 = vmax.f32 %v4148_v57, %v4149_v13  ;;  %v4139_v20 = vmul.f32 %v7300_v28, %v4122_v29 }
 0x6a3   : > { %v4151_v60 = vmax.f32 %v4147_v38, %v4139_v20  ;;  %4509 = vperm.xlu1 %5831, %v9878_v16   ;;  %v4238_v16 = vmul.f32 %v9754_v18, %v8684_v45  ;;  %v4268_v38 = vpop.permute.xlu0 %4267  ;;  %v9945_v20 = vmax.f32 %v8680_v39, %v8698_v0 }
 0x6a4   : > { %v4327_v39 = vmul.f32 %v6753_v5, %v4268_v38 }
 0x6a5   : > { %v4153_v14 = vmax.f32 %v4150_v58, %v4151_v60  ;;  %v4167_v22 = vpop.permute.xlu1 %4166 }
 0x6a6   : > { %v4226_v33 = vmul.f32 %v6753_v5, %v4167_v22 }
 0x6a7   : > { %v4154_v42 = vmax.f32 %v4152_v27, %v4153_v14  ;;  %5832 = vset.pattern.permute.xlu1 %v9929_v24  ;;  %v4225_v24 = vmul.f32 %v6810_v55, %v9944_v59 }
 0x6a8   : > { %v4242_v37 = vmax.f32 %v4226_v33, %v4230_v17  ;;  %4416 = vperm.xlu1 %5832, %v9880_v2  }
 0x6a9   : > { %v4155_v57 = vrot.slane %v4154_v42, 4  ;;  %v4171_v44 = vpop.permute.xlu1 %4170 }
 0x6aa   : > { %v4246_v58 = vmax.f32 %v4242_v37, %v4234_v1  ;;  %v4227_v19 = vmul.f32 %v6759_v11, %v4171_v44 }
 0x6ab   : > { %v4156_v51 = vmax.f32 %v4154_v42, %v4155_v57 }
 0x6ac   : > { %4420 = vperm.xlu1 %5832, %v9916_v9   ;;  %v4250_v49 = vmax.f32 %v4246_v58, %v4238_v16 }
 0x6ad   : > { %v4157_v3 = vrot.slane %v4156_v51, 2  ;;  %v4179_v63 = vpop.permute.xlu1 %4178 }
 0x6ae   : > { %v4229_v56 = vmul.f32 %v9744_v36, %v4179_v63 }
 0x6af   : > { %v4158_v41 = vmax.f32 %v4156_v51, %v4157_v3 }
 0x6b0   : > { %v4241_v15 = vmax.f32 %v4225_v24, %v4229_v56  ;;  %5834 = vset.pattern.permute.xlu1 %v9935_v12 }
 0x6b1   : > { %v4159_v2 = vrot.slane %v4158_v41, 1  ;;  %4513 = vperm.xlu1 %5834, %v9913_v21   ;;  %v4187_v45 = vpop.permute.xlu1 %4186 }
 0x6b2   : > { %v4231_v7 = vmul.f32 %v6790_v43, %v4187_v45 }
 0x6b3   : > { %v4160_v25 = vmax.f32 %v4158_v41, %v4159_v2 }
 0x6b4   : > { %v4243_v48 = vmax.f32 %v4227_v19, %v4231_v7 }
 0x6b5   : > { %v4583_v23 = vsel %vm4571_vm11, %v4582_v46, %v4160_v25  ;;  %4521 = vperm.xlu1 %5834, %v9916_v9   ;;  %v4195_v4 = vpop.permute.xlu1 %4194  ;;  %v4280_v9 = vpop.permute.xlu0 %4279 }
 0x6b6   : > { %v4233_v35 = vmul.f32 %v9752_v54, %v4195_v4  ;;  %v4330_v14 = vmul.f32 %v9744_v36, %v4280_v9 }
 0x6b8   : > { %v4245_v50 = vmax.f32 %v4241_v15, %v4233_v35 }
 0x6b9   : > { %4525 = vperm.xlu1 %5834, %v9885_v8   ;;  %v4203_v12 = vpop.permute.xlu1 %4202  ;;  %v4288_v1 = vpop.permute.xlu0 %4287 }
 0x6ba   : > { %v4235_v21 = vmul.f32 %v7202_v31, %v4203_v12  ;;  %v4332_v35 = vmul.f32 %v6790_v43, %v4288_v1 }
 0x6bc   : > { %v4247_v47 = vmax.f32 %v4243_v48, %v4235_v21 }
 0x6bd   : > { %v4211_v10 = vpop.permute.xlu1 %4210  ;;  %v4296_v58 = vpop.permute.xlu0 %4295 }
 0x6be   : > { %v4237_v30 = vmul.f32 %v7245_v61, %v4211_v10 }
 0x6c0   : > { %v4249_v34 = vmax.f32 %v4245_v50, %v4237_v30  ;;  %v4334_v50 = vmul.f32 %v9752_v54, %v4296_v58 }
 0x6c1   : > { %v4219_v13 = vpop.permute.xlu1 %4218  ;;  %v4304_v15 = vpop.permute.xlu0 %4303 }
 0x6c2   : > { %v4253_v29 = vmax.f32 %v4249_v34, %v4250_v49  ;;  %v4239_v46 = vmul.f32 %v9873_v53, %v4219_v13  ;;  %v4336_v38 = vmul.f32 %v7202_v31, %v4304_v15 }
 0x6c4   : > { %v4251_v27 = vmax.f32 %v4247_v47, %v4239_v46 }
 0x6c5   : > { %v4312_v48 = vpop.permute.xlu0 %4311 }
 0x6c6   : > { %v4254_v60 = vmax.f32 %v4251_v27, %v9945_v20  ;;  %v4264_v8 = vpop.permute.xlu1 %4263  ;;  %v4338_v30 = vmul.f32 %v7245_v61, %v4312_v48 }
 0x6c7   : > { %v4326_v22 = vmul.f32 %v6810_v55, %v4264_v8 }
 0x6c8   : > { %v4255_v6 = vmax.f32 %v4253_v29, %v4254_v60 }
 0x6c9   : > { %v4342_v17 = vmax.f32 %v4326_v22, %v4330_v14  ;;  %v4320_v13 = vpop.permute.xlu0 %4319 }
 0x6ca   : > { %v4256_v33 = vrot.slane %v4255_v6, 4  ;;  %v4272_v42 = vpop.permute.xlu1 %4271  ;;  %v4340_v20 = vmul.f32 %v9873_v53, %v4320_v13 }
 0x6cb   : > { %v4328_v7 = vmul.f32 %v6759_v11, %v4272_v42  ;;  %v4346_v12 = vmax.f32 %v4342_v17, %v4334_v50 }
 0x6cc   : > { %v4257_v37 = vmax.f32 %v4255_v6, %v4256_v33 }
 0x6cd   : > { %v4344_v21 = vmax.f32 %v4328_v7, %v4332_v35  ;;  %v4350_v46 = vmax.f32 %v4346_v12, %v4338_v30  ;;  %v4365_v33 = vpop.permute.xlu0 %4364 }
 0x6ce   : > { %v4258_v57 = vrot.slane %v4257_v37, 2  ;;  %v4276_v44 = vpop.permute.xlu1 %4275 }
 0x6cf   : > { %v4329_v56 = vmul.f32 %v6770_v32, %v4276_v44  ;;  %v4348_v29 = vmax.f32 %v4344_v21, %v4336_v38  ;;  %v9947_v21 = vld [vmem:[#allocation97_spill] sm:$0xff] }
 0x6d0   : > { %v4259_v16 = vmax.f32 %v4257_v37, %v4258_v57  ;;  %v2854_v38 = vld [vmem:[#allocation3] sm:$0xff] }
 0x6d1   : > { %v4352_v14 = vmax.f32 %v4348_v29, %v4340_v20  ;;  %v4377_v44 = vpop.permute.xlu0 %4376 }
 0x6d2   : > { %v4260_v51 = vrot.slane %v4259_v16, 1  ;;  %v4284_v49 = vpop.permute.xlu1 %4283 }
 0x6d3   : > { %v4331_v0 = vmul.f32 %v6784_v26, %v4284_v49 }
 0x6d4   : > { %v4261_v3 = vmax.f32 %v4259_v16, %v4260_v51 }
 0x6d5   : > { %v4343_v63 = vmax.f32 %v4327_v39, %v4331_v0  ;;  %v4385_v0 = vpop.permute.xlu0 %4384 }
 0x6d6   : > { %v4584_v59 = vsel %vm4573_vm3, %v4583_v23, %v4261_v3  ;;  %v4292_v24 = vpop.permute.xlu1 %4291 }
 0x6d7   : > { %v4333_v41 = vmul.f32 %v6796_v52, %v4292_v24 }
 0x6d9   : > { %v4345_v2 = vmax.f32 %v4329_v56, %v4333_v41  ;;  %v4393_v56 = vpop.permute.xlu0 %4392 }
 0x6da   : > { %v4300_v45 = vpop.permute.xlu1 %4299 }
 0x6db   : > { %v4335_v19 = vmul.f32 %v7181_v40, %v4300_v45 }
 0x6dd   : > { %v4347_v25 = vmax.f32 %v4343_v63, %v4335_v19 }
 0x6de   : > { %v4308_v4 = vpop.permute.xlu1 %4307 }
 0x6df   : > { %v4337_v23 = vmul.f32 %v7219_v62, %v4308_v4 }
 0x6e1   : > { %v4349_v47 = vmax.f32 %v4345_v2, %v4337_v23  ;;  %v4405_v2 = vpop.permute.xlu0 %4404 }
 0x6e2   : > { %v4316_v10 = vpop.permute.xlu1 %4315 }
 0x6e3   : > { %v4339_v34 = vmul.f32 %v9754_v18, %v4316_v10  ;;  %v2855_v10 = vld [vmem:[#allocation3 + $0x8] sm:$0xff] }
 0x6e5   : > { %v4351_v9 = vmax.f32 %v4347_v25, %v4339_v34  ;;  %v4413_v19 = vpop.permute.xlu0 %4412  ;;  %v4434_v34 = vmul.f32 %v6796_v52, %v4393_v56 }
 0x6e6   : > { %v4324_v27 = vpop.permute.xlu1 %4323 }
 0x6e7   : > { %v4354_v60 = vmax.f32 %v4350_v46, %v4351_v9  ;;  %v4341_v8 = vmul.f32 %v7300_v28, %v4324_v27  ;;  %v4427_v9 = vmul.f32 %v6810_v55, %v4365_v33 }
 0x6e9   : > { %v4353_v22 = vmax.f32 %v4349_v47, %v4341_v8  ;;  %v4425_v25 = vpop.permute.xlu0 %4424 }
 0x6eb   : > { %v4355_v6 = vmax.f32 %v4352_v14, %v4353_v22  ;;  %v4369_v17 = vpop.permute.xlu1 %4368  ;;  %v4430_v14 = vmul.f32 %v6770_v32, %v4377_v44  ;;  %v4432_v22 = vmul.f32 %v6784_v26, %v4385_v0 }
 0x6ec   : > { %v4428_v27 = vmul.f32 %v6753_v5, %v4369_v17 }
 0x6ed   : > { %v4356_v42 = vmax.f32 %v4354_v60, %v4355_v6  ;;  %v4466_v35 = vpop.permute.xlu0 %4465 }
 0x6ef   : > { %v4357_v1 = vrot.slane %v4356_v42, 4  ;;  %v4373_v37 = vpop.permute.xlu1 %4372 }
 0x6f0   : > { %v4429_v6 = vmul.f32 %v6759_v11, %v4373_v37  ;;  %v4437_v37 = vmul.f32 %v7202_v31, %v4405_v2 }
 0x6f1   : > { %v4358_v57 = vmax.f32 %v4356_v42, %v4357_v1  ;;  %v4478_v23 = vpop.permute.xlu0 %4477 }
 0x6f3   : > { %v4359_v16 = vrot.slane %v4358_v57, 2  ;;  %v4381_v58 = vpop.permute.xlu1 %4380 }
 0x6f4   : > { %v4431_v20 = vmul.f32 %v9744_v36, %v4381_v58 }
 0x6f5   : > { %v4360_v51 = vmax.f32 %v4358_v57, %v4359_v16  ;;  %v4486_v13 = vpop.permute.xlu0 %4485 }
 0x6f7   : > { %v4361_v49 = vrot.slane %v4360_v51, 1  ;;  %v4389_v39 = vpop.permute.xlu1 %4388 }
 0x6f8   : > { %v4433_v60 = vmul.f32 %v6790_v43, %v4389_v39  ;;  %v4443_v39 = vmax.f32 %v4427_v9, %v4431_v20 }
 0x6f9   : > { %v4362_v3 = vmax.f32 %v4360_v51, %v4361_v49  ;;  %v4446_v51 = vmax.f32 %v4430_v14, %v4434_v34  ;;  %v4444_v49 = vmax.f32 %v4428_v27, %v4432_v22  ;;  %v4494_v0 = vpop.permute.xlu0 %4493  ;;  %v4528_v22 = vmul.f32 %v6810_v55, %v4466_v35 }
 0x6fa   : > { %v4535_v14 = vmul.f32 %v6796_v52, %v4494_v0 }
 0x6fb   : > { %v8956_v63 = vsel %vm4575_vm6, %v4584_v59, %v4362_v3  ;;  %v4397_v24 = vpop.permute.xlu1 %4396  ;;  %v9946_v59 = vld [vmem:[#allocation30_spill] sm:$0xff]  ;;  %v4445_v3 = vmax.f32 %v4429_v6, %v4433_v60 }
 0x6fc   : > { %v2860_v47 = vrot.slane %v9947_v21, %v9946_v59  ;;  %v4435_v57 = vmul.f32 %v9752_v54, %v4397_v24 }
 0x6fd   : > { %v4502_v9 = vpop.permute.xlu0 %4501 }
 0x6fe   : > { %v2863_v29 = vmul.f32 %v2860_v47, %v2855_v10  ;;  %v2862_v46 = vmul.f32 %v2860_v47, %v2854_v38  ;;  %v4447_v56 = vmax.f32 %v4443_v39, %v4435_v57  ;;  %v4449_v38 = vmax.f32 %v4445_v3, %v4437_v37 }
 0x700   : > { %v4470_v41 = vpop.permute.xlu1 %4469 }
 0x701   : > { %v4529_v27 = vmul.f32 %v6753_v5, %v4470_v41  ;;  %v4531_v5 = vmul.f32 %v6770_v32, %v4478_v23  ;;  %v4537_v41 = vmul.f32 %v7181_v40, %v4502_v9 }
 0x704   : > { %v8958_v15 = vpop.permute.xlu1 %4473 }
 0x708   : > { %v4482_v45 = vpop.permute.xlu1 %4481 }
 0x70c   : > { %v8960_v7 = vpop.permute.xlu1 %4489 }
 0x711   : > { %v4401_v48 = vpop.permute.xlu1 %4400 }
 0x712   : > { %v4436_v16 = vmul.f32 %v7181_v40, %v4401_v48  ;;  %v4439_v48 = vmul.f32 %v7245_v61, %v4413_v19  ;;  %v4532_v19 = vmul.f32 %v9744_v36, %v4482_v45  ;;  %v4518_v45 = vpop.permute.xlu0 %4517 }
 0x714   : > { %v4448_v59 = vmax.f32 %v4444_v49, %v4436_v16  ;;  %v4451_v34 = vmax.f32 %v4447_v56, %v4439_v48  ;;  %v4544_v52 = vmax.f32 %v4528_v22, %v4532_v19 }
 0x715   : > { %v4409_v4 = vpop.permute.xlu1 %4408 }
 0x716   : > { %v4438_v33 = vmul.f32 %v7219_v62, %v4409_v4  ;;  %v4442_v4 = vmul.f32 %v7300_v28, %v4425_v25 }
 0x718   : > { %v4450_v24 = vmax.f32 %v4446_v51, %v4438_v33 }
 0x71a   : > { %v4498_v50 = vpop.permute.xlu1 %4497 }
 0x71e   : > { %v8962_v12 = vpop.permute.xlu1 %4505 }
 0x71f   : > { %v4538_v55 = vmul.f32 %v7202_v31, %v8962_v12 }
 0x722   : > { %v4510_v30 = vpop.permute.xlu1 %4509 }
 0x723   : > { %v5380_v8 = vpop.f32.mrb[0].mxu1  ;;  %v4539_v35 = vmul.f32 %v7219_v62, %v4510_v30 }
 0x724   : > { %v2865_v42 = vadd.f32 %v5380_v8, %v2863_v29  ;;  %v2844_v1 = vpop.f32.mrb[1].mxu1  ;;  %v4454_v29 = vmax.f32 %v4450_v24, %v4442_v4  ;;  %v4533_v8 = vmul.f32 %v6784_v26, %v4486_v13  ;;  %v4530_v26 = vmul.f32 %v6759_v11, %v8958_v15  ;;  %v4598_v4 = vld [vmem:[#allocation4] sm:$0x1] (!%p4800_p0) }
 0x725   : > { %v2864_v17 = vadd.f32 %v2862_v46, %v2844_v1  ;;  %v4536_v1 = vmul.f32 %v9752_v54, %v4498_v50  ;;  %v4541_v11 = vmul.f32 %v9754_v18, %v4518_v45 }
 0x726   : > { %2867 = vst [vmem:[#allocation3 + $0x8] sm:$0xff] %v2865_v42  ;;  %v4545_v6 = vmax.f32 %v4529_v27, %v4533_v8  ;;  %v4534_v42 = vmul.f32 %v6790_v43, %v8960_v7  ;;  %v4547_v7 = vmax.f32 %v4531_v5, %v4535_v14 }
 0x727   : > { %v4417_v58 = vpop.permute.xlu1 %4416  ;;  %2866 = vst [vmem:[#allocation3] sm:$0xff] %v2864_v17  ;;  %v4548_v23 = vmax.f32 %v4544_v52, %v4536_v1 }
 0x728   : > { %v4440_v44 = vmul.f32 %v9754_v18, %v4417_v58  ;;  %v4549_v50 = vmax.f32 %v4545_v6, %v4537_v41  ;;  %v4546_v32 = vmax.f32 %v4530_v26, %v4534_v42  ;;  %v4551_v33 = vmax.f32 %v4547_v7, %v4539_v35 }
 0x72a   : > { %v4452_v47 = vmax.f32 %v4448_v59, %v4440_v44  ;;  %v4550_v16 = vmax.f32 %v4546_v32, %v4538_v55  ;;  %v4553_v62 = vmax.f32 %v4549_v50, %v4541_v11  ;;  %v4566_v59 = vld [vmem:[#allocation6 + $0x8] sm:$0xff] }
 0x72b   : > { %v4421_v21 = vpop.permute.xlu1 %4420 }
 0x72c   : > { %v4441_v10 = vmul.f32 %v9873_v53, %v4421_v21  ;;  %v4455_v20 = vmax.f32 %v4451_v34, %v4452_v47  ;;  %v4596_v21 = vld [vmem:[#allocation5] sm:$0x1] (!%p4800_p0)  ;;  %v4620_v47 = vld [vmem:[#allocation6] sm:$0xff] (!%p4800_p0)  ;;  %v6001_v34 = vmov (!%p4800_p0), 0  }
 0x72d   : > { %vm4597_vm4 = vcmp.gt.f32.partialorder (!%p4800_p0), %v4596_v21, 0.5  ;;  %4624 = vst [vmem:[%s6114_s24 + $0x10] sm:$0xff] (!%p4800_p0), %v4620_v47 }
 0x72e   : > { %v4453_v46 = vmax.f32 %v4449_v38, %v4441_v10 }
 0x730   : > { %v4456_v2 = vmax.f32 %v4453_v46, %v4454_v29  ;;  %v4514_v60 = vpop.permute.xlu1 %4513  ;;  %v4612_v29 = vsel (!%p4800_p0), %vm4597_vm4, 1, %v6001_v34  ;;  %v9948_v46 = vld [vmem:[#allocation30_spill] sm:$0xff] (!%p4800_p0) }
 0x731   : > { %v4540_v43 = vmul.f32 %v7245_v61, %v4514_v60  ;;  %v4616_v9 = vrot.slane (!%p4800_p0), %v4612_v29, %v9948_v46 }
 0x732   : > { %v4457_v25 = vmax.f32 %v4455_v20, %v4456_v2  ;;  %v4602_v20 = vld [vmem:[#allocation3] sm:$0xff] (!%p4800_p0)  ;;  %v4603_v2 = vld [vmem:[#allocation3 + $0x8] sm:$0xff] (!%p4800_p0) }
 0x733   : > { %v4552_v17 = vmax.f32 %v4548_v23, %v4540_v43  ;;  %vm4617_vm7 = vcmp.eq.s32.totalorder (!%p4800_p0), %v4616_v9, 1 }
 0x734   : > { %v4458_v13 = vrot.slane %v4457_v25, 4  ;;  %v4522_v36 = vpop.permute.xlu1 %4521 }
 0x735   : > { %v4542_v40 = vmul.f32 %v9873_v53, %v4522_v36  ;;  %v4556_v58 = vmax.f32 %v4552_v17, %v4553_v62 }
 0x736   : > { %v4459_v54 = vmax.f32 %v4457_v25, %v4458_v13 }
 0x737   : > { %v4554_v30 = vmax.f32 %v4550_v16, %v4542_v40 }
 0x738   : > { %v4460_v15 = vrot.slane %v4459_v54, 2  ;;  %v4526_v57 = vpop.permute.xlu1 %4525 }
 0x739   : > { %v4543_v31 = vmul.f32 %v7300_v28, %v4526_v57 }
 0x73a   : > { %v4461_v12 = vmax.f32 %v4459_v54, %v4460_v15 }
 0x73b   : > { %v4555_v61 = vmax.f32 %v4551_v33, %v4543_v31 }
 0x73c   : > { %v4462_v51 = vrot.slane %v4461_v12, 1 }
 0x73d   : > { %v4557_v49 = vmax.f32 %v4554_v30, %v4555_v61 }
 0x73e   : > { %v4463_v39 = vmax.f32 %v4461_v12, %v4462_v51 }
 0x73f   : > { %v4558_v3 = vmax.f32 %v4556_v58, %v4557_v49 }
 0x740   : > { %v4586_v53 = vsel %vm4577_vm13, %v8956_v63, %v4463_v39  ;;  %v4599_v63 = vmul.f32 (!%p4800_p0), %v4598_v4, %v4596_v21 }
 0x741   : > { %v4559_v18 = vrot.slane %v4558_v3, 4 }
 0x742   : > { %v4600_v38 = vsel (!%p4800_p0), %vm4597_vm4, %v4599_v63, 1.0 }
 0x743   : > { %v4560_v44 = vmax.f32 %v4558_v3, %v4559_v18  ;;  %5881 = vrcp.f32 (!%p4800_p0), %v4600_v38 }
 0x745   : > { %v4561_v0 = vrot.slane %v4560_v44, 2 }
 0x747   : > { %v4562_v37 = vmax.f32 %v4560_v44, %v4561_v0 }
 0x749   : > { %v4563_v56 = vrot.slane %v4562_v37, 1 }
 0x74a   : > { %4595 = sbr.rel (%p4800_p0) target bundleno = 1881 (0x759), region = 44 }
 0x74b   : > { %v4564_v24 = vmax.f32 %v4562_v37, %v4563_v56 }
 0x74d   : > { %v4587_v28 = vsel %vm4579_vm2, %v4586_v53, %v4564_v24  ;;  %v5882_v27 = vpop.eup (!%p4800_p0), %5881 }
 0x74e   : > { %v4589_v48 = vmax.f32 %v4566_v59, %v4587_v28  ;;  %v4608_v60 = vrot.slane (!%p4800_p0), %v5882_v27, %v9948_v46 }
 0x750   : > { %4591 = vst [vmem:[#allocation6 + $0x8] sm:$0xff] %v4589_v48  ;;  %v4610_v8 = vmul.f32 (!%p4800_p0), %v4608_v60, %v4602_v20  ;;  %v4611_v19 = vmul.f32 (!%p4800_p0), %v4608_v60, %v4603_v2 }
 0x752   : > { %v4618_v14 = vsel %vm4617_vm7, %v4610_v8, 0.0  ;;  %v4619_v25 = vsel %vm4617_vm7, %v4611_v19, 0.0 }
 0x753   : > { %4622 = vst [vmem:[%s6114_s24] sm:$0xff] %v4618_v14  ;;  %4623 = vst [vmem:[%s6114_s24 + $0x8] sm:$0xff] %v4619_v25 }
 0x757   : > { %v4621_v10 = vld [vmem:[#allocation6 + $0x8] sm:$0xff] }
 0x758   : > { %4625 = vst [vmem:[%s6114_s24 + $0x18] sm:$0xff] %v4621_v10 }
 0x759 PF: > { %s9015_s13 = scalar_lea.hbm %s9078_s4, %s6328_s7  ;;  %s4639_s14 = sshll.u32 %s6114_s24, 4  ;;  %s9018_s14 = int_to_ptr.vmem [resolvable:$true] %s4639_s14 }
 0x75a   : > { %s9022_s23 = scalar_lea.sflag [#allocation8], %s217_s6  ;;  %s5883_s29 = scalar_lea.vmem %s9018_s14, 512 }
 0x75b   : > { %p5884_p1 = scmp.ne.s32.totalorder %s9018_s14, %s5883_s29  ;;  %s6002_s30 = smov [#allocation7]  }
 0x75c   : > { %s5887_s8 = sshll.u32 %s6002_s30, 4  ;;  %s5888_s8 = int_to_ptr.vmem [resolvable:$false] %s5887_s8 }
 0x75d   : > { %p5885_p2 = pnand %p5884_p1, %p6080_p3  ;;  %s5889_s19 = scalar_lea.vmem %s5888_s8, 1024 }
 0x75e   : > { %p5890_p5 = scmp.lt.s32.totalorder %s9018_s14, %s5888_s8  ;;  %p5891_p6 = scmp.lt.s32.totalorder %s5889_s19, %s5883_s29 }
 0x75f   : > { %p5886_p4 = pneg %p5885_p2 }
 0x760   : > { %p5892_p7 = por %p5891_p6, %p5890_p5 }
 0x762   : > { %p5893_p8 = pnand %p5892_p7, %p5886_p4 }
 0x764   : > { %5896 = shalt.err (!%p5893_p8)
}
 0x765   : > { %s5897_s6 = scalar_lea.hbm %s9015_s13, 512  ;;  %s5901_s9 = scalar_lea.hbm %s9078_s4, 1024 }
 0x766   : > { %p5898_p10 = scmp.ne.s32.totalorder %s9015_s13, %s5897_s6  ;;  %p5902_p13 = scmp.lt.u32.totalorder %s9015_s13, %s9078_s4 }
 0x767   : > { %p5903_p0 = scmp.lt.u32.totalorder %s5901_s9, %s5897_s6  ;;  %p5905_p2 = scmp.lt.u32.totalorder %s5897_s6, %s9015_s13 }
 0x768   : > { %p5899_p11 = pnand %p5898_p10, %p6080_p3 }
 0x769   : > { %p5904_p1 = por %p5903_p0, %p5902_p13 }
 0x76a   : > { %p5900_p12 = pneg %p5899_p11 }
 0x76b   : > { %p5906_p4 = por %p5905_p2, %p5904_p1 }
 0x76d   : > { %p5907_p5 = pnand %p5906_p4, %p5900_p12 }
 0x76f   : > { %5910 = shalt.err (!%p5907_p5)
}
 0x770   : > { %s6003_s18 = smov 128   ;;  %s6004_s12 = smov 256  }
 0x771   : > { %s6005_s29 = smov 8  }
 0x772   : > { %5679 = dma.vmem_to_hbm [thread:$0]  (%p6080_p3), %s9018_s14, 512, %s9015_s13, %s9022_s23, %s6003_s18, %s6004_s12, %s6005_s29  }
 0x773 PF: > { %p5685_p6 = scmp.ge.s32.totalorder %s5977_s22, 2  ;;  %s4654_s30 = sand.u32 1, %s5949_s15  }
 0x774   : > { %s4655_s8 = scalar_lea.sflag [#allocation8], %s4654_s30 }
 0x775   : > { %p5682_p7 = pnand %p5685_p6, %p6090_p9 }
 0x777   : > { %5944 = dma.done.wait (!%p5682_p7), %s4655_s8, 512  }
 0x778   : > { %5946 = vsyncadd (!%p5682_p7), %s4655_s8, 4294966784  ;;  %s17_s22 = sadd.s32 1, %s5977_s22   ;;  %s9949_s15 = smov %s5953_s16 }
 0x779   : > { %p14_p8 = scmp.ge.s32.totalorder %s17_s22, 12   ;;  %s9950_s16 = smov %s5957_s17 }
 0x77a   : > { %s9951_s17 = smov %s6098_s5  ;;  %s9952_s18 = smov %s5969_s20 }
 0x77b   : > { %s9953_s19 = smov %s5973_s21  ;;  %s9954_s20 = smov %s9957_s25 }
 0x77c   : > { %s9955_s21 = smov %s9961_s26  ;;  %16 = sbr.rel (!%p14_p8) target bundleno = 5 (0x5), region = 82 }
 0x783   :  { %4660 = vsyncpa [#allocation8], 1 }
 0x784   :  { %4662 = vsyncpa [#allocation8 + $0x1], 1 }

</bundles_post_ra>
